<compile_context>
chip_gen: v7x
topology: tpu7x:2x2x1
jax: 0.10.0
libtpu: 0.0.40
codegen_flags: <defaults>
</compile_context>

<pallas_src>
import jax
import jax.numpy as jnp
from jax.experimental import pallas as pl
from jax.experimental.pallas import tpu as pltpu

LANE = 128      # f32 lane width
SUBLANE = 8     # f32 sublane count
MAX_TB = 256    # max batch-tile rows (fills the 256x256 MXU on v6e/v7x)


def _round_up(n, m):
    return ((n + m - 1) // m) * m


def _cdiv(a, b):
    return (a + b - 1) // b


def _pad2(a, rows, cols):
    """Zero-pad a 2-D array to (rows, cols)."""
    out = jnp.zeros((rows, cols), a.dtype)
    return out.at[: a.shape[0], : a.shape[1]].set(a)


def _choose_batch_tile(B):
    """Batch tile: multiple of 8 sublanes, <= 256 rows, >= 2 grid steps once B > 128
    (so both v7x TensorCores get work), minimal padded-row waste."""
    if B <= SUBLANE:
        return SUBLANE
    if B <= 2 * MAX_TB:
        steps = 1 if B <= LANE else 2
    else:
        steps = _cdiv(B, MAX_TB)
    return min(MAX_TB, _round_up(_cdiv(B, steps), SUBLANE))


# --------------------------------------------------------------------------- #
# Kernel: one batch tile of the full VAE forward (encoder -> reparam -> decoder)
# --------------------------------------------------------------------------- #
def vae_kernel(x_ref, eps_ref,
               w1_ref, b1_ref, w2_ref, b2_ref, w3_ref, b3_ref,
               whead_ref, bhead_ref,
               d1_ref, db1_ref, d2_ref, db2_ref, d3_ref, db3_ref,
               d4_ref, db4_ref,
               logits_ref, mulv_ref):
    f32 = jnp.float32
    bf16 = jnp.bfloat16
    lp = eps_ref.shape[-1]          # padded latent width (multiple of 128)

    def linear(h_bf16, w_ref, b_ref):
        # bf16 operands -> MXU, f32 accumulation, f32 bias add on the VPU.
        return jnp.dot(h_bf16, w_ref[...], preferred_element_type=f32) + b_ref[...]

    def relu_to_bf16(h_f32):
        # ReLU in f32 (no bf16 VPU on v5e), single cast for the next MXU operand.
        return jnp.maximum(h_f32, 0.0).astype(bf16)

    # ---- Encoder ----
    h = relu_to_bf16(linear(x_ref[...], w1_ref, b1_ref))
    h = relu_to_bf16(linear(h, w2_ref, b2_ref))
    h = relu_to_bf16(linear(h, w3_ref, b3_ref))

    # ---- Fused mu/logvar head: single matmul, packed lane-dense output ----
    head = linear(h, whead_ref, bhead_ref)      # f32 (TB, 2*lp) = [mu_pad | logvar_pad]
    mulv_ref[...] = head

    mu = head[:, :lp]               # lane-aligned (128-boundary) slices
    logvar = head[:, lp:]

    # ---- Reparameterize: z = mu + eps * exp(0.5*logvar) (eps sampled outside) ----
    # Padded lanes: mu=logvar=0 -> exp=1, but eps pad is 0 => z pad stays exactly 0.
    z = (mu + eps_ref[...] * jnp.exp(0.5 * logvar)).astype(bf16)

    # ---- Decoder (trailing ReLU matches torch: Linear -> ReLU -> Unflatten) ----
    d = relu_to_bf16(linear(z, d1_ref, db1_ref))
    d = relu_to_bf16(linear(d, d2_ref, db2_ref))
    d = relu_to_bf16(linear(d, d3_ref, db3_ref))
    logits_ref[...] = jnp.maximum(linear(d, d4_ref, db4_ref), 0.0)


# --------------------------------------------------------------------------- #
# Parameter init (original/unpadded shapes, mirrors nn.Linear default init)
# --------------------------------------------------------------------------- #
def init_params(key, input_dim, latent_dim, num_classes, hidden_dim):
    ks = jax.random.split(key, 18)

    def lin(kw, kb, fan_in, fan_out):
        scale = 1.0 / jnp.sqrt(jnp.float32(fan_in))
        w = jax.random.uniform(kw, (fan_in, fan_out), jnp.float32, -scale, scale)
        b = jax.random.uniform(kb, (1, fan_out), jnp.float32, -scale, scale)
        return w, b

    p = {}
    p["w1"], p["b1"] = lin(ks[0], ks[1], input_dim, hidden_dim)
    p["w2"], p["b2"] = lin(ks[2], ks[3], hidden_dim, hidden_dim)
    p["w3"], p["b3"] = lin(ks[4], ks[5], hidden_dim, hidden_dim)
    p["wmu"], p["bmu"] = lin(ks[6], ks[7], hidden_dim, latent_dim)
    p["wlv"], p["blv"] = lin(ks[8], ks[9], hidden_dim, latent_dim)
    p["d1"], p["db1"] = lin(ks[10], ks[11], latent_dim, hidden_dim)
    p["d2"], p["db2"] = lin(ks[12], ks[13], hidden_dim, hidden_dim)
    p["d3"], p["db3"] = lin(ks[14], ks[15], hidden_dim, hidden_dim)
    p["d4"], p["db4"] = lin(ks[16], ks[17], hidden_dim, num_classes * input_dim)
    return p


# --------------------------------------------------------------------------- #
# One-time checkpoint preparation: pad / fuse heads / cast weights to bf16.
# (Hoisted out of the per-forward path per perf feedback.)
# --------------------------------------------------------------------------- #
def prepare_padded_params(params):
    input_dim, hidden_dim = params["w1"].shape
    latent_dim = params["wmu"].shape[1]
    d_out = params["d4"].shape[1]

    d_in = _round_up(input_dim, LANE)
    hp = _round_up(hidden_dim, LANE)
    lp = _round_up(latent_dim, LANE)
    d_out_p = _round_up(d_out, LANE)

    bf16 = jnp.bfloat16

    def wpad(a, rows, cols):
        return _pad2(a, rows, cols).astype(bf16)     # weights in bf16 (MXU operand)

    def bpad(a, cols):
        return _pad2(a, 1, cols)                     # biases stay f32 (VPU add)

    whead = jnp.zeros((hp, 2 * lp), jnp.float32)
    whead = whead.at[:hidden_dim, :latent_dim].set(params["wmu"])
    whead = whead.at[:hidden_dim, lp:lp + latent_dim].set(params["wlv"])
    bhead = jnp.zeros((1, 2 * lp), jnp.float32)
    bhead = bhead.at[:, :latent_dim].set(params["bmu"])
    bhead = bhead.at[:, lp:lp + latent_dim].set(params["blv"])

    return dict(
        w1=wpad(params["w1"], d_in, hp),  b1=bpad(params["b1"], hp),
        w2=wpad(params["w2"], hp, hp),    b2=bpad(params["b2"], hp),
        w3=wpad(params["w3"], hp, hp),    b3=bpad(params["b3"], hp),
        whead=whead.astype(bf16),         bhead=bhead,
        d1=wpad(params["d1"], lp, hp),    db1=bpad(params["db1"], hp),
        d2=wpad(params["d2"], hp, hp),    db2=bpad(params["db2"], hp),
        d3=wpad(params["d3"], hp, hp),    db3=bpad(params["db3"], hp),
        d4=wpad(params["d4"], hp, d_out_p), db4=bpad(params["db4"], d_out_p),
    )


# --------------------------------------------------------------------------- #
# Wrapper: pad activations, batch grid, call the kernel
# --------------------------------------------------------------------------- #
def vae_forward(x, eps, padded, num_classes, latent_dim, single_buffer_weights=True):
    """x: (B, H, W) f32, eps: (B, latent_dim) f32, padded = prepare_padded_params(...).
    Returns (logits[B,C,H,W] f32, mu[B,L] f32, logvar[B,L] f32)."""
    B, H, W = x.shape
    input_dim = H * W
    d_in, hp = padded["w1"].shape
    lp = padded["whead"].shape[1] // 2
    d_out_p = padded["d4"].shape[1]
    d_out = num_classes * input_dim

    tb = _choose_batch_tile(B)
    b_pad = _round_up(B, tb)
    grid = (b_pad // tb,)

    # ---- Pad activations (nn.Flatten(start_dim=1) == reshape(B, -1)); x in bf16 ----
    x_p = _pad2(x.reshape(B, input_dim), b_pad, d_in).astype(jnp.bfloat16)
    eps_p = _pad2(eps, b_pad, lp)          # zero-padded lanes => z_pad = 0

    weight_order = ("w1", "b1", "w2", "b2", "w3", "b3", "whead", "bhead",
                    "d1", "db1", "d2", "db2", "d3", "db3", "d4", "db4")
    weights = [padded[k] for k in weight_order]

    def batch_spec(cols):
        return pl.BlockSpec((tb, cols), lambda i: (i, 0))

    def resident_spec(arr):
        # Full-array block + constant index_map => stays VMEM-resident across steps.
        if single_buffer_weights:
            # Constant-index inputs don't need double buffers; halves their VMEM use.
            return pl.BlockSpec(arr.shape, lambda i: (0, 0),
                                pipeline_mode=pl.Buffered(1))
        return pl.BlockSpec(arr.shape, lambda i: (0, 0))

    in_specs = [batch_spec(d_in), batch_spec(lp)] + [resident_spec(w) for w in weights]
    out_specs = (batch_spec(d_out_p), batch_spec(2 * lp))
    out_shapes = (
        jax.ShapeDtypeStruct((b_pad, d_out_p), jnp.float32),   # decoder logits (flat)
        jax.ShapeDtypeStruct((b_pad, 2 * lp), jnp.float32),    # packed [mu | logvar]
    )

    weight_bytes = sum(int(w.size) * w.dtype.itemsize for w in weights)
    flops = 2 * b_pad * (d_in * hp + 2 * hp * hp + hp * 2 * lp
                         + lp * hp + 2 * hp * hp + hp * d_out_p)
    bytes_accessed = (2 * b_pad * d_in            # x (bf16)
                      + 4 * b_pad * lp            # eps (f32)
                      + 4 * b_pad * (d_out_p + 2 * lp)   # outputs (f32)
                      + weight_bytes)
    cost = pl.CostEstimate(flops=flops,
                           transcendentals=b_pad * lp,
                           bytes_accessed=bytes_accessed)

    logits_p, mulv = pl.pallas_call(
        vae_kernel,
        out_shape=out_shapes,
        grid=grid,
        in_specs=in_specs,
        out_specs=out_specs,
        compiler_params=pltpu.CompilerParams(
            dimension_semantics=("parallel",),
            vmem_limit_bytes=32 * 1024 * 1024),
        cost_estimate=cost,
    )(x_p, eps_p, *weights)

    # Strip padding; nn.Unflatten(1, (num_classes, H, W)) -> NCHW logits.
    logits = logits_p[:B, :d_out].reshape(B, num_classes, H, W)
    mu = mulv[:B, :latent_dim]
    logvar = mulv[:B, lp:lp + latent_dim]
    return logits, mu, logvar


# --------------------------------------------------------------------------- #
# Pure-JAX reference (same bf16-operand / f32-accumulate math, unpadded)
# --------------------------------------------------------------------------- #
def vae_reference(x, eps, params, num_classes):
    B, H, W = x.shape
    bf16 = jnp.bfloat16

    def mm(a, w, b):
        return jnp.dot(a.astype(bf16), w.astype(bf16),
                       preferred_element_type=jnp.float32) + b

    relu = lambda a: jnp.maximum(a, 0.0)

    h = relu(mm(x.reshape(B, -1), params["w1"], params["b1"]))
    h = relu(mm(h, params["w2"], params["b2"]))
    h = relu(mm(h, params["w3"], params["b3"]))
    mu = mm(h, params["wmu"], params["bmu"])
    logvar = mm(h, params["wlv"], params["blv"])
    z = mu + eps * jnp.exp(0.5 * logvar)
    d = relu(mm(z, params["d1"], params["db1"]))
    d = relu(mm(d, params["d2"], params["db2"]))
    d = relu(mm(d, params["d3"], params["db3"]))
    logits = relu(mm(d, params["d4"], params["db4"]))
    return logits.reshape(B, num_classes, H, W), mu, logvar


if __name__ == "__main__":
    # Small shapes consistent with the module: input_dim = H*W, hidden_dim = 32.
    B, H, W = 2, 16, 16
    input_dim = H * W
    latent_dim = 20
    num_classes = 4
    hidden_dim = 32

    key = jax.random.PRNGKey(0)
    kx, keps, kp = jax.random.split(key, 3)

    x = jax.random.normal(kx, (B, H, W), jnp.float32)
    # eps ~ N(0,1): same role as torch.randn_like(std), sampled outside the kernel.
    eps = jax.random.normal(keps, (B, latent_dim), jnp.float32)

    params = init_params(kp, input_dim, latent_dim, num_classes, hidden_dim)
    padded = jax.tree_util.tree_map(jax.block_until_ready,
                                    prepare_padded_params(params))  # once per checkpoint

    fwd = jax.jit(vae_forward, static_argnums=(3, 4, 5))
    try:
        logits, mu, logvar = fwd(x, eps, padded, num_classes, latent_dim, True)
        jax.block_until_ready((logits, mu, logvar))
    except Exception:
        # Fallback if this JAX build rejects single-buffered (Buffered(1)) resident
        # weights: retry with default double-buffered BlockSpecs.
        logits, mu, logvar = fwd(x, eps, padded, num_classes, latent_dim, False)
        jax.block_until_ready((logits, mu, logvar))

    assert logits.shape == (B, num_classes, H, W)
    assert mu.shape == (B, latent_dim)
    assert logvar.shape == (B, latent_dim)

    ref_logits, ref_mu, ref_logvar = vae_reference(x, eps, params, num_classes)
    assert jnp.allclose(logits, ref_logits, rtol=2e-3, atol=2e-3)
    assert jnp.allclose(mu, ref_mu, rtol=2e-3, atol=2e-3)
    assert jnp.allclose(logvar, ref_logvar, rtol=2e-3, atol=2e-3)

    print("KERNEL_OK")
</pallas_src>

<mosaic_0001>
module attributes {stable_mosaic.version = 11 : i64} {
  func.func @vae_kernel(%arg0: i32, %arg1: memref<8x256xbf16, #tpu.memory_space<vmem>>, %arg2: memref<8x128xf32, #tpu.memory_space<vmem>>, %arg3: memref<256x128xbf16, #tpu.memory_space<vmem>>, %arg4: memref<1x128xf32, #tpu.memory_space<vmem>>, %arg5: memref<128x128xbf16, #tpu.memory_space<vmem>>, %arg6: memref<1x128xf32, #tpu.memory_space<vmem>>, %arg7: memref<128x128xbf16, #tpu.memory_space<vmem>>, %arg8: memref<1x128xf32, #tpu.memory_space<vmem>>, %arg9: memref<128x256xbf16, #tpu.memory_space<vmem>>, %arg10: memref<1x256xf32, #tpu.memory_space<vmem>>, %arg11: memref<128x128xbf16, #tpu.memory_space<vmem>>, %arg12: memref<1x128xf32, #tpu.memory_space<vmem>>, %arg13: memref<128x128xbf16, #tpu.memory_space<vmem>>, %arg14: memref<1x128xf32, #tpu.memory_space<vmem>>, %arg15: memref<128x128xbf16, #tpu.memory_space<vmem>>, %arg16: memref<1x128xf32, #tpu.memory_space<vmem>>, %arg17: memref<128x1024xbf16, #tpu.memory_space<vmem>>, %arg18: memref<1x1024xf32, #tpu.memory_space<vmem>>, %arg19: memref<8x1024xf32, #tpu.memory_space<vmem>>, %arg20: memref<8x256xf32, #tpu.memory_space<vmem>>) attributes {dimension_semantics = [#tpu.dimension_semantics<parallel>], iteration_bounds = array<i64: 1>, scalar_prefetch = 0 : i64, scratch_operands = 0 : i64, tpu.core_type = #tpu.core_type<tc>, window_params = [{transform_indices = @transform_0, window_bounds = array<i64: 8, 256>}, {transform_indices = @transform_1, window_bounds = array<i64: 8, 128>}, {pipeline_mode = #tpu.pipeline_mode<synchronous>, transform_indices = @transform_2, window_bounds = array<i64: 256, 128>}, {pipeline_mode = #tpu.pipeline_mode<synchronous>, transform_indices = @transform_3, window_bounds = array<i64: 1, 128>}, {pipeline_mode = #tpu.pipeline_mode<synchronous>, transform_indices = @transform_4, window_bounds = array<i64: 128, 128>}, {pipeline_mode = #tpu.pipeline_mode<synchronous>, transform_indices = @transform_5, window_bounds = array<i64: 1, 128>}, {pipeline_mode = #tpu.pipeline_mode<synchronous>, transform_indices = @transform_6, window_bounds = array<i64: 128, 128>}, {pipeline_mode = #tpu.pipeline_mode<synchronous>, transform_indices = @transform_7, window_bounds = array<i64: 1, 128>}, {pipeline_mode = #tpu.pipeline_mode<synchronous>, transform_indices = @transform_8, window_bounds = array<i64: 128, 256>}, {pipeline_mode = #tpu.pipeline_mode<synchronous>, transform_indices = @transform_9, window_bounds = array<i64: 1, 256>}, {pipeline_mode = #tpu.pipeline_mode<synchronous>, transform_indices = @transform_10, window_bounds = array<i64: 128, 128>}, {pipeline_mode = #tpu.pipeline_mode<synchronous>, transform_indices = @transform_11, window_bounds = array<i64: 1, 128>}, {pipeline_mode = #tpu.pipeline_mode<synchronous>, transform_indices = @transform_12, window_bounds = array<i64: 128, 128>}, {pipeline_mode = #tpu.pipeline_mode<synchronous>, transform_indices = @transform_13, window_bounds = array<i64: 1, 128>}, {pipeline_mode = #tpu.pipeline_mode<synchronous>, transform_indices = @transform_14, window_bounds = array<i64: 128, 128>}, {pipeline_mode = #tpu.pipeline_mode<synchronous>, transform_indices = @transform_15, window_bounds = array<i64: 1, 128>}, {pipeline_mode = #tpu.pipeline_mode<synchronous>, transform_indices = @transform_16, window_bounds = array<i64: 128, 1024>}, {pipeline_mode = #tpu.pipeline_mode<synchronous>, transform_indices = @transform_17, window_bounds = array<i64: 1, 1024>}, {transform_indices = @transform_18, window_bounds = array<i64: 8, 1024>}, {transform_indices = @transform_19, window_bounds = array<i64: 8, 256>}]} {
    %c0 = arith.constant 0 : index
    %c0_0 = arith.constant 0 : index
    %0 = vector.load %arg1[%c0, %c0_0] : memref<8x256xbf16, #tpu.memory_space<vmem>>, vector<8x256xbf16>
    %c0_1 = arith.constant 0 : index
    %c0_2 = arith.constant 0 : index
    %1 = vector.load %arg3[%c0_1, %c0_2] : memref<256x128xbf16, #tpu.memory_space<vmem>>, vector<256x128xbf16>
    %cst = arith.constant dense<0.000000e+00> : vector<8x128xf32>
    %2 = tpu.matmul %0, %1, %cst {dimension_numbers = #tpu.dot_dimension_numbers<[1], [0], [0], [1], [0, 0, 1, 1], [], []>} : vector<8x256xbf16>, vector<256x128xbf16>, vector<8x128xf32> -> vector<8x128xf32>
    %c0_3 = arith.constant 0 : index
    %c0_4 = arith.constant 0 : index
    %3 = vector.load %arg4[%c0_3, %c0_4] : memref<1x128xf32, #tpu.memory_space<vmem>>, vector<1x128xf32>
    %4 = vector.broadcast %3 : vector<1x128xf32> to vector<8x128xf32>
    %5 = arith.addf %2, %4 : vector<8x128xf32>
    %cst_5 = arith.constant 0.000000e+00 : f32
    %6 = vector.broadcast %cst_5 : f32 to vector<8x128xf32>
    %7 = arith.maximumf %5, %6 : vector<8x128xf32>
    %8 = arith.truncf %7 : vector<8x128xf32> to vector<8x128xbf16>
    %c0_6 = arith.constant 0 : index
    %c0_7 = arith.constant 0 : index
    %9 = vector.load %arg5[%c0_6, %c0_7] : memref<128x128xbf16, #tpu.memory_space<vmem>>, vector<128x128xbf16>
    %cst_8 = arith.constant dense<0.000000e+00> : vector<8x128xf32>
    %10 = tpu.matmul %8, %9, %cst_8 {dimension_numbers = #tpu.dot_dimension_numbers<[1], [0], [0], [1], [0, 0, 1, 1], [], []>} : vector<8x128xbf16>, vector<128x128xbf16>, vector<8x128xf32> -> vector<8x128xf32>
    %c0_9 = arith.constant 0 : index
    %c0_10 = arith.constant 0 : index
    %11 = vector.load %arg6[%c0_9, %c0_10] : memref<1x128xf32, #tpu.memory_space<vmem>>, vector<1x128xf32>
    %12 = vector.broadcast %11 : vector<1x128xf32> to vector<8x128xf32>
    %13 = arith.addf %10, %12 : vector<8x128xf32>
    %cst_11 = arith.constant 0.000000e+00 : f32
    %14 = vector.broadcast %cst_11 : f32 to vector<8x128xf32>
    %15 = arith.maximumf %13, %14 : vector<8x128xf32>
    %16 = arith.truncf %15 : vector<8x128xf32> to vector<8x128xbf16>
    %c0_12 = arith.constant 0 : index
    %c0_13 = arith.constant 0 : index
    %17 = vector.load %arg7[%c0_12, %c0_13] : memref<128x128xbf16, #tpu.memory_space<vmem>>, vector<128x128xbf16>
    %cst_14 = arith.constant dense<0.000000e+00> : vector<8x128xf32>
    %18 = tpu.matmul %16, %17, %cst_14 {dimension_numbers = #tpu.dot_dimension_numbers<[1], [0], [0], [1], [0, 0, 1, 1], [], []>} : vector<8x128xbf16>, vector<128x128xbf16>, vector<8x128xf32> -> vector<8x128xf32>
    %c0_15 = arith.constant 0 : index
    %c0_16 = arith.constant 0 : index
    %19 = vector.load %arg8[%c0_15, %c0_16] : memref<1x128xf32, #tpu.memory_space<vmem>>, vector<1x128xf32>
    %20 = vector.broadcast %19 : vector<1x128xf32> to vector<8x128xf32>
    %21 = arith.addf %18, %20 : vector<8x128xf32>
    %cst_17 = arith.constant 0.000000e+00 : f32
    %22 = vector.broadcast %cst_17 : f32 to vector<8x128xf32>
    %23 = arith.maximumf %21, %22 : vector<8x128xf32>
    %24 = arith.truncf %23 : vector<8x128xf32> to vector<8x128xbf16>
    %c0_18 = arith.constant 0 : index
    %c0_19 = arith.constant 0 : index
    %25 = vector.load %arg9[%c0_18, %c0_19] : memref<128x256xbf16, #tpu.memory_space<vmem>>, vector<128x256xbf16>
    %cst_20 = arith.constant dense<0.000000e+00> : vector<8x256xf32>
    %26 = tpu.matmul %24, %25, %cst_20 {dimension_numbers = #tpu.dot_dimension_numbers<[1], [0], [0], [1], [0, 0, 1, 1], [], []>} : vector<8x128xbf16>, vector<128x256xbf16>, vector<8x256xf32> -> vector<8x256xf32>
    %c0_21 = arith.constant 0 : index
    %c0_22 = arith.constant 0 : index
    %27 = vector.load %arg10[%c0_21, %c0_22] : memref<1x256xf32, #tpu.memory_space<vmem>>, vector<1x256xf32>
    %28 = vector.broadcast %27 : vector<1x256xf32> to vector<8x256xf32>
    %29 = arith.addf %26, %28 : vector<8x256xf32>
    %c0_23 = arith.constant 0 : index
    %c0_24 = arith.constant 0 : index
    %30 = vector.load %arg20[%c0_23, %c0_24] : memref<8x256xf32, #tpu.memory_space<vmem>>, vector<8x256xf32>
    tpu.vector_store %arg20[%c0_23, %c0_24], %29 {strides = array<i32>} : memref<8x256xf32, #tpu.memory_space<vmem>>, vector<8x256xf32>,
    %31 = vector.extract_strided_slice %29 {offsets = [0, 0], sizes = [8, 128], strides = [1, 1]} : vector<8x256xf32> to vector<8x128xf32>
    %32 = vector.extract_strided_slice %29 {offsets = [0, 128], sizes = [8, 128], strides = [1, 1]} : vector<8x256xf32> to vector<8x128xf32>
    %c0_25 = arith.constant 0 : index
    %c0_26 = arith.constant 0 : index
    %33 = vector.load %arg2[%c0_25, %c0_26] : memref<8x128xf32, #tpu.memory_space<vmem>>, vector<8x128xf32>
    %cst_27 = arith.constant 5.000000e-01 : f32
    %34 = vector.broadcast %cst_27 : f32 to vector<8x128xf32>
    %35 = arith.mulf %34, %32 : vector<8x128xf32>
    %36 = math.exp %35 : vector<8x128xf32>
    %37 = arith.mulf %33, %36 : vector<8x128xf32>
    %38 = arith.addf %31, %37 : vector<8x128xf32>
    %39 = arith.truncf %38 : vector<8x128xf32> to vector<8x128xbf16>
    %c0_28 = arith.constant 0 : index
    %c0_29 = arith.constant 0 : index
    %40 = vector.load %arg11[%c0_28, %c0_29] : memref<128x128xbf16, #tpu.memory_space<vmem>>, vector<128x128xbf16>
    %cst_30 = arith.constant dense<0.000000e+00> : vector<8x128xf32>
    %41 = tpu.matmul %39, %40, %cst_30 {dimension_numbers = #tpu.dot_dimension_numbers<[1], [0], [0], [1], [0, 0, 1, 1], [], []>} : vector<8x128xbf16>, vector<128x128xbf16>, vector<8x128xf32> -> vector<8x128xf32>
    %c0_31 = arith.constant 0 : index
    %c0_32 = arith.constant 0 : index
    %42 = vector.load %arg12[%c0_31, %c0_32] : memref<1x128xf32, #tpu.memory_space<vmem>>, vector<1x128xf32>
    %43 = vector.broadcast %42 : vector<1x128xf32> to vector<8x128xf32>
    %44 = arith.addf %41, %43 : vector<8x128xf32>
    %cst_33 = arith.constant 0.000000e+00 : f32
    %45 = vector.broadcast %cst_33 : f32 to vector<8x128xf32>
    %46 = arith.maximumf %44, %45 : vector<8x128xf32>
    %47 = arith.truncf %46 : vector<8x128xf32> to vector<8x128xbf16>
    %c0_34 = arith.constant 0 : index
    %c0_35 = arith.constant 0 : index
    %48 = vector.load %arg13[%c0_34, %c0_35] : memref<128x128xbf16, #tpu.memory_space<vmem>>, vector<128x128xbf16>
    %cst_36 = arith.constant dense<0.000000e+00> : vector<8x128xf32>
    %49 = tpu.matmul %47, %48, %cst_36 {dimension_numbers = #tpu.dot_dimension_numbers<[1], [0], [0], [1], [0, 0, 1, 1], [], []>} : vector<8x128xbf16>, vector<128x128xbf16>, vector<8x128xf32> -> vector<8x128xf32>
    %c0_37 = arith.constant 0 : index
    %c0_38 = arith.constant 0 : index
    %50 = vector.load %arg14[%c0_37, %c0_38] : memref<1x128xf32, #tpu.memory_space<vmem>>, vector<1x128xf32>
    %51 = vector.broadcast %50 : vector<1x128xf32> to vector<8x128xf32>
    %52 = arith.addf %49, %51 : vector<8x128xf32>
    %cst_39 = arith.constant 0.000000e+00 : f32
    %53 = vector.broadcast %cst_39 : f32 to vector<8x128xf32>
    %54 = arith.maximumf %52, %53 : vector<8x128xf32>
    %55 = arith.truncf %54 : vector<8x128xf32> to vector<8x128xbf16>
    %c0_40 = arith.constant 0 : index
    %c0_41 = arith.constant 0 : index
    %56 = vector.load %arg15[%c0_40, %c0_41] : memref<128x128xbf16, #tpu.memory_space<vmem>>, vector<128x128xbf16>
    %cst_42 = arith.constant dense<0.000000e+00> : vector<8x128xf32>
    %57 = tpu.matmul %55, %56, %cst_42 {dimension_numbers = #tpu.dot_dimension_numbers<[1], [0], [0], [1], [0, 0, 1, 1], [], []>} : vector<8x128xbf16>, vector<128x128xbf16>, vector<8x128xf32> -> vector<8x128xf32>
    %c0_43 = arith.constant 0 : index
    %c0_44 = arith.constant 0 : index
    %58 = vector.load %arg16[%c0_43, %c0_44] : memref<1x128xf32, #tpu.memory_space<vmem>>, vector<1x128xf32>
    %59 = vector.broadcast %58 : vector<1x128xf32> to vector<8x128xf32>
    %60 = arith.addf %57, %59 : vector<8x128xf32>
    %cst_45 = arith.constant 0.000000e+00 : f32
    %61 = vector.broadcast %cst_45 : f32 to vector<8x128xf32>
    %62 = arith.maximumf %60, %61 : vector<8x128xf32>
    %63 = arith.truncf %62 : vector<8x128xf32> to vector<8x128xbf16>
    %c0_46 = arith.constant 0 : index
    %c0_47 = arith.constant 0 : index
    %64 = vector.load %arg17[%c0_46, %c0_47] : memref<128x1024xbf16, #tpu.memory_space<vmem>>, vector<128x1024xbf16>
    %cst_48 = arith.constant dense<0.000000e+00> : vector<8x1024xf32>
    %65 = tpu.matmul %63, %64, %cst_48 {dimension_numbers = #tpu.dot_dimension_numbers<[1], [0], [0], [1], [0, 0, 1, 1], [], []>} : vector<8x128xbf16>, vector<128x1024xbf16>, vector<8x1024xf32> -> vector<8x1024xf32>
    %c0_49 = arith.constant 0 : index
    %c0_50 = arith.constant 0 : index
    %66 = vector.load %arg18[%c0_49, %c0_50] : memref<1x1024xf32, #tpu.memory_space<vmem>>, vector<1x1024xf32>
    %67 = vector.broadcast %66 : vector<1x1024xf32> to vector<8x1024xf32>
    %68 = arith.addf %65, %67 : vector<8x1024xf32>
    %cst_51 = arith.constant 0.000000e+00 : f32
    %69 = vector.broadcast %cst_51 : f32 to vector<8x1024xf32>
    %70 = arith.maximumf %68, %69 : vector<8x1024xf32>
    %c0_52 = arith.constant 0 : index
    %c0_53 = arith.constant 0 : index
    %71 = vector.load %arg19[%c0_52, %c0_53] : memref<8x1024xf32, #tpu.memory_space<vmem>>, vector<8x1024xf32>
    tpu.vector_store %arg19[%c0_52, %c0_53], %70 {strides = array<i32>} : memref<8x1024xf32, #tpu.memory_space<vmem>>, vector<8x1024xf32>,
    return
  }
  func.func @transform_0(%arg0: i32) -> (i32, i32) {
    %c0_i32 = arith.constant 0 : i32
    %c0_i32_0 = arith.constant 0 : i32
    return %arg0, %c0_i32 : i32, i32
  }
  func.func @transform_1(%arg0: i32) -> (i32, i32) {
    %c0_i32 = arith.constant 0 : i32
    %c0_i32_0 = arith.constant 0 : i32
    return %arg0, %c0_i32 : i32, i32
  }
  func.func @transform_2(%arg0: i32) -> (i32, i32) {
    %c0_i32 = arith.constant 0 : i32
    %c0_i32_0 = arith.constant 0 : i32
    %c0_i32_1 = arith.constant 0 : i32
    return %c0_i32, %c0_i32_0 : i32, i32
  }
  func.func @transform_3(%arg0: i32) -> (i32, i32) {
    %c0_i32 = arith.constant 0 : i32
    %c0_i32_0 = arith.constant 0 : i32
    %c0_i32_1 = arith.constant 0 : i32
    return %c0_i32, %c0_i32_0 : i32, i32
  }
  func.func @transform_4(%arg0: i32) -> (i32, i32) {
    %c0_i32 = arith.constant 0 : i32
    %c0_i32_0 = arith.constant 0 : i32
    %c0_i32_1 = arith.constant 0 : i32
    return %c0_i32, %c0_i32_0 : i32, i32
  }
  func.func @transform_5(%arg0: i32) -> (i32, i32) {
    %c0_i32 = arith.constant 0 : i32
    %c0_i32_0 = arith.constant 0 : i32
    %c0_i32_1 = arith.constant 0 : i32
    return %c0_i32, %c0_i32_0 : i32, i32
  }
  func.func @transform_6(%arg0: i32) -> (i32, i32) {
    %c0_i32 = arith.constant 0 : i32
    %c0_i32_0 = arith.constant 0 : i32
    %c0_i32_1 = arith.constant 0 : i32
    return %c0_i32, %c0_i32_0 : i32, i32
  }
  func.func @transform_7(%arg0: i32) -> (i32, i32) {
    %c0_i32 = arith.constant 0 : i32
    %c0_i32_0 = arith.constant 0 : i32
    %c0_i32_1 = arith.constant 0 : i32
    return %c0_i32, %c0_i32_0 : i32, i32
  }
  func.func @transform_8(%arg0: i32) -> (i32, i32) {
    %c0_i32 = arith.constant 0 : i32
    %c0_i32_0 = arith.constant 0 : i32
    %c0_i32_1 = arith.constant 0 : i32
    return %c0_i32, %c0_i32_0 : i32, i32
  }
  func.func @transform_9(%arg0: i32) -> (i32, i32) {
    %c0_i32 = arith.constant 0 : i32
    %c0_i32_0 = arith.constant 0 : i32
    %c0_i32_1 = arith.constant 0 : i32
    return %c0_i32, %c0_i32_0 : i32, i32
  }
  func.func @transform_10(%arg0: i32) -> (i32, i32) {
    %c0_i32 = arith.constant 0 : i32
    %c0_i32_0 = arith.constant 0 : i32
    %c0_i32_1 = arith.constant 0 : i32
    return %c0_i32, %c0_i32_0 : i32, i32
  }
  func.func @transform_11(%arg0: i32) -> (i32, i32) {
    %c0_i32 = arith.constant 0 : i32
    %c0_i32_0 = arith.constant 0 : i32
    %c0_i32_1 = arith.constant 0 : i32
    return %c0_i32, %c0_i32_0 : i32, i32
  }
  func.func @transform_12(%arg0: i32) -> (i32, i32) {
    %c0_i32 = arith.constant 0 : i32
    %c0_i32_0 = arith.constant 0 : i32
    %c0_i32_1 = arith.constant 0 : i32
    return %c0_i32, %c0_i32_0 : i32, i32
  }
  func.func @transform_13(%arg0: i32) -> (i32, i32) {
    %c0_i32 = arith.constant 0 : i32
    %c0_i32_0 = arith.constant 0 : i32
    %c0_i32_1 = arith.constant 0 : i32
    return %c0_i32, %c0_i32_0 : i32, i32
  }
  func.func @transform_14(%arg0: i32) -> (i32, i32) {
    %c0_i32 = arith.constant 0 : i32
    %c0_i32_0 = arith.constant 0 : i32
    %c0_i32_1 = arith.constant 0 : i32
    return %c0_i32, %c0_i32_0 : i32, i32
  }
  func.func @transform_15(%arg0: i32) -> (i32, i32) {
    %c0_i32 = arith.constant 0 : i32
    %c0_i32_0 = arith.constant 0 : i32
    %c0_i32_1 = arith.constant 0 : i32
    return %c0_i32, %c0_i32_0 : i32, i32
  }
  func.func @transform_16(%arg0: i32) -> (i32, i32) {
    %c0_i32 = arith.constant 0 : i32
    %c0_i32_0 = arith.constant 0 : i32
    %c0_i32_1 = arith.constant 0 : i32
    return %c0_i32, %c0_i32_0 : i32, i32
  }
  func.func @transform_17(%arg0: i32) -> (i32, i32) {
    %c0_i32 = arith.constant 0 : i32
    %c0_i32_0 = arith.constant 0 : i32
    %c0_i32_1 = arith.constant 0 : i32
    return %c0_i32, %c0_i32_0 : i32, i32
  }
  func.func @transform_18(%arg0: i32) -> (i32, i32) {
    %c0_i32 = arith.constant 0 : i32
    %c0_i32_0 = arith.constant 0 : i32
    return %arg0, %c0_i32 : i32, i32
  }
  func.func @transform_19(%arg0: i32) -> (i32, i32) {
    %c0_i32 = arith.constant 0 : i32
    %c0_i32_0 = arith.constant 0 : i32
    return %arg0, %c0_i32 : i32, i32
  }
}

module attributes {stable_mosaic.version = 11 : i64} {
  func.func @vae_kernel(%arg0: i32, %arg1: memref<8x256xbf16, #tpu.memory_space<vmem>>, %arg2: memref<8x128xf32, #tpu.memory_space<vmem>>, %arg3: memref<256x128xbf16, #tpu.memory_space<vmem>>, %arg4: memref<1x128xf32, #tpu.memory_space<vmem>>, %arg5: memref<128x128xbf16, #tpu.memory_space<vmem>>, %arg6: memref<1x128xf32, #tpu.memory_space<vmem>>, %arg7: memref<128x128xbf16, #tpu.memory_space<vmem>>, %arg8: memref<1x128xf32, #tpu.memory_space<vmem>>, %arg9: memref<128x256xbf16, #tpu.memory_space<vmem>>, %arg10: memref<1x256xf32, #tpu.memory_space<vmem>>, %arg11: memref<128x128xbf16, #tpu.memory_space<vmem>>, %arg12: memref<1x128xf32, #tpu.memory_space<vmem>>, %arg13: memref<128x128xbf16, #tpu.memory_space<vmem>>, %arg14: memref<1x128xf32, #tpu.memory_space<vmem>>, %arg15: memref<128x128xbf16, #tpu.memory_space<vmem>>, %arg16: memref<1x128xf32, #tpu.memory_space<vmem>>, %arg17: memref<128x1024xbf16, #tpu.memory_space<vmem>>, %arg18: memref<1x1024xf32, #tpu.memory_space<vmem>>, %arg19: memref<8x1024xf32, #tpu.memory_space<vmem>>, %arg20: memref<8x256xf32, #tpu.memory_space<vmem>>) attributes {dimension_semantics = [#tpu.dimension_semantics<parallel>], iteration_bounds = array<i64: 1>, scalar_prefetch = 0 : i64, scratch_operands = 0 : i64, tpu.core_type = #tpu.core_type<tc>, window_params = [{transform_indices = @transform_0, window_bounds = array<i64: 8, 256>}, {transform_indices = @transform_1, window_bounds = array<i64: 8, 128>}, {pipeline_mode = #tpu.pipeline_mode<synchronous>, transform_indices = @transform_2, window_bounds = array<i64: 256, 128>}, {pipeline_mode = #tpu.pipeline_mode<synchronous>, transform_indices = @transform_3, window_bounds = array<i64: 1, 128>}, {pipeline_mode = #tpu.pipeline_mode<synchronous>, transform_indices = @transform_4, window_bounds = array<i64: 128, 128>}, {pipeline_mode = #tpu.pipeline_mode<synchronous>, transform_indices = @transform_5, window_bounds = array<i64: 1, 128>}, {pipeline_mode = #tpu.pipeline_mode<synchronous>, transform_indices = @transform_6, window_bounds = array<i64: 128, 128>}, {pipeline_mode = #tpu.pipeline_mode<synchronous>, transform_indices = @transform_7, window_bounds = array<i64: 1, 128>}, {pipeline_mode = #tpu.pipeline_mode<synchronous>, transform_indices = @transform_8, window_bounds = array<i64: 128, 256>}, {pipeline_mode = #tpu.pipeline_mode<synchronous>, transform_indices = @transform_9, window_bounds = array<i64: 1, 256>}, {pipeline_mode = #tpu.pipeline_mode<synchronous>, transform_indices = @transform_10, window_bounds = array<i64: 128, 128>}, {pipeline_mode = #tpu.pipeline_mode<synchronous>, transform_indices = @transform_11, window_bounds = array<i64: 1, 128>}, {pipeline_mode = #tpu.pipeline_mode<synchronous>, transform_indices = @transform_12, window_bounds = array<i64: 128, 128>}, {pipeline_mode = #tpu.pipeline_mode<synchronous>, transform_indices = @transform_13, window_bounds = array<i64: 1, 128>}, {pipeline_mode = #tpu.pipeline_mode<synchronous>, transform_indices = @transform_14, window_bounds = array<i64: 128, 128>}, {pipeline_mode = #tpu.pipeline_mode<synchronous>, transform_indices = @transform_15, window_bounds = array<i64: 1, 128>}, {pipeline_mode = #tpu.pipeline_mode<synchronous>, transform_indices = @transform_16, window_bounds = array<i64: 128, 1024>}, {pipeline_mode = #tpu.pipeline_mode<synchronous>, transform_indices = @transform_17, window_bounds = array<i64: 1, 1024>}, {transform_indices = @transform_18, window_bounds = array<i64: 8, 1024>}, {transform_indices = @transform_19, window_bounds = array<i64: 8, 256>}]} {
    %c0 = arith.constant 0 : index
    %c0_0 = arith.constant 0 : index
    %0 = vector.load %arg1[%c0, %c0_0] : memref<8x256xbf16, #tpu.memory_space<vmem>>, vector<8x256xbf16>
    %c0_1 = arith.constant 0 : index
    %c0_2 = arith.constant 0 : index
    %1 = vector.load %arg3[%c0_1, %c0_2] : memref<256x128xbf16, #tpu.memory_space<vmem>>, vector<256x128xbf16>
    %cst = arith.constant dense<0.000000e+00> : vector<8x128xf32>
    %2 = tpu.matmul %0, %1, %cst {dimension_numbers = #tpu.dot_dimension_numbers<[1], [0], [0], [1], [0, 0, 1, 1], [], []>} : vector<8x256xbf16>, vector<256x128xbf16>, vector<8x128xf32> -> vector<8x128xf32>
    %c0_3 = arith.constant 0 : index
    %c0_4 = arith.constant 0 : index
    %3 = vector.load %arg4[%c0_3, %c0_4] : memref<1x128xf32, #tpu.memory_space<vmem>>, vector<1x128xf32>
    %4 = vector.broadcast %3 : vector<1x128xf32> to vector<8x128xf32>
    %5 = arith.addf %2, %4 : vector<8x128xf32>
    %cst_5 = arith.constant 0.000000e+00 : f32
    %6 = vector.broadcast %cst_5 : f32 to vector<8x128xf32>
    %7 = arith.maximumf %5, %6 : vector<8x128xf32>
    %8 = arith.truncf %7 : vector<8x128xf32> to vector<8x128xbf16>
    %c0_6 = arith.constant 0 : index
    %c0_7 = arith.constant 0 : index
    %9 = vector.load %arg5[%c0_6, %c0_7] : memref<128x128xbf16, #tpu.memory_space<vmem>>, vector<128x128xbf16>
    %cst_8 = arith.constant dense<0.000000e+00> : vector<8x128xf32>
    %10 = tpu.matmul %8, %9, %cst_8 {dimension_numbers = #tpu.dot_dimension_numbers<[1], [0], [0], [1], [0, 0, 1, 1], [], []>} : vector<8x128xbf16>, vector<128x128xbf16>, vector<8x128xf32> -> vector<8x128xf32>
    %c0_9 = arith.constant 0 : index
    %c0_10 = arith.constant 0 : index
    %11 = vector.load %arg6[%c0_9, %c0_10] : memref<1x128xf32, #tpu.memory_space<vmem>>, vector<1x128xf32>
    %12 = vector.broadcast %11 : vector<1x128xf32> to vector<8x128xf32>
    %13 = arith.addf %10, %12 : vector<8x128xf32>
    %cst_11 = arith.constant 0.000000e+00 : f32
    %14 = vector.broadcast %cst_11 : f32 to vector<8x128xf32>
    %15 = arith.maximumf %13, %14 : vector<8x128xf32>
    %16 = arith.truncf %15 : vector<8x128xf32> to vector<8x128xbf16>
    %c0_12 = arith.constant 0 : index
    %c0_13 = arith.constant 0 : index
    %17 = vector.load %arg7[%c0_12, %c0_13] : memref<128x128xbf16, #tpu.memory_space<vmem>>, vector<128x128xbf16>
    %cst_14 = arith.constant dense<0.000000e+00> : vector<8x128xf32>
    %18 = tpu.matmul %16, %17, %cst_14 {dimension_numbers = #tpu.dot_dimension_numbers<[1], [0], [0], [1], [0, 0, 1, 1], [], []>} : vector<8x128xbf16>, vector<128x128xbf16>, vector<8x128xf32> -> vector<8x128xf32>
    %c0_15 = arith.constant 0 : index
    %c0_16 = arith.constant 0 : index
    %19 = vector.load %arg8[%c0_15, %c0_16] : memref<1x128xf32, #tpu.memory_space<vmem>>, vector<1x128xf32>
    %20 = vector.broadcast %19 : vector<1x128xf32> to vector<8x128xf32>
    %21 = arith.addf %18, %20 : vector<8x128xf32>
    %cst_17 = arith.constant 0.000000e+00 : f32
    %22 = vector.broadcast %cst_17 : f32 to vector<8x128xf32>
    %23 = arith.maximumf %21, %22 : vector<8x128xf32>
    %24 = arith.truncf %23 : vector<8x128xf32> to vector<8x128xbf16>
    %c0_18 = arith.constant 0 : index
    %c0_19 = arith.constant 0 : index
    %25 = vector.load %arg9[%c0_18, %c0_19] : memref<128x256xbf16, #tpu.memory_space<vmem>>, vector<128x256xbf16>
    %cst_20 = arith.constant dense<0.000000e+00> : vector<8x256xf32>
    %26 = tpu.matmul %24, %25, %cst_20 {dimension_numbers = #tpu.dot_dimension_numbers<[1], [0], [0], [1], [0, 0, 1, 1], [], []>} : vector<8x128xbf16>, vector<128x256xbf16>, vector<8x256xf32> -> vector<8x256xf32>
    %c0_21 = arith.constant 0 : index
    %c0_22 = arith.constant 0 : index
    %27 = vector.load %arg10[%c0_21, %c0_22] : memref<1x256xf32, #tpu.memory_space<vmem>>, vector<1x256xf32>
    %28 = vector.broadcast %27 : vector<1x256xf32> to vector<8x256xf32>
    %29 = arith.addf %26, %28 : vector<8x256xf32>
    %c0_23 = arith.constant 0 : index
    %c0_24 = arith.constant 0 : index
    %30 = vector.load %arg20[%c0_23, %c0_24] : memref<8x256xf32, #tpu.memory_space<vmem>>, vector<8x256xf32>
    tpu.vector_store %arg20[%c0_23, %c0_24], %29 {strides = array<i32>} : memref<8x256xf32, #tpu.memory_space<vmem>>, vector<8x256xf32>,
    %31 = vector.extract_strided_slice %29 {offsets = [0, 0], sizes = [8, 128], strides = [1, 1]} : vector<8x256xf32> to vector<8x128xf32>
    %32 = vector.extract_strided_slice %29 {offsets = [0, 128], sizes = [8, 128], strides = [1, 1]} : vector<8x256xf32> to vector<8x128xf32>
    %c0_25 = arith.constant 0 : index
    %c0_26 = arith.constant 0 : index
    %33 = vector.load %arg2[%c0_25, %c0_26] : memref<8x128xf32, #tpu.memory_space<vmem>>, vector<8x128xf32>
    %cst_27 = arith.constant 5.000000e-01 : f32
    %34 = vector.broadcast %cst_27 : f32 to vector<8x128xf32>
    %35 = arith.mulf %34, %32 : vector<8x128xf32>
    %36 = math.exp %35 : vector<8x128xf32>
    %37 = arith.mulf %33, %36 : vector<8x128xf32>
    %38 = arith.addf %31, %37 : vector<8x128xf32>
    %39 = arith.truncf %38 : vector<8x128xf32> to vector<8x128xbf16>
    %c0_28 = arith.constant 0 : index
    %c0_29 = arith.constant 0 : index
    %40 = vector.load %arg11[%c0_28, %c0_29] : memref<128x128xbf16, #tpu.memory_space<vmem>>, vector<128x128xbf16>
    %cst_30 = arith.constant dense<0.000000e+00> : vector<8x128xf32>
    %41 = tpu.matmul %39, %40, %cst_30 {dimension_numbers = #tpu.dot_dimension_numbers<[1], [0], [0], [1], [0, 0, 1, 1], [], []>} : vector<8x128xbf16>, vector<128x128xbf16>, vector<8x128xf32> -> vector<8x128xf32>
    %c0_31 = arith.constant 0 : index
    %c0_32 = arith.constant 0 : index
    %42 = vector.load %arg12[%c0_31, %c0_32] : memref<1x128xf32, #tpu.memory_space<vmem>>, vector<1x128xf32>
    %43 = vector.broadcast %42 : vector<1x128xf32> to vector<8x128xf32>
    %44 = arith.addf %41, %43 : vector<8x128xf32>
    %cst_33 = arith.constant 0.000000e+00 : f32
    %45 = vector.broadcast %cst_33 : f32 to vector<8x128xf32>
    %46 = arith.maximumf %44, %45 : vector<8x128xf32>
    %47 = arith.truncf %46 : vector<8x128xf32> to vector<8x128xbf16>
    %c0_34 = arith.constant 0 : index
    %c0_35 = arith.constant 0 : index
    %48 = vector.load %arg13[%c0_34, %c0_35] : memref<128x128xbf16, #tpu.memory_space<vmem>>, vector<128x128xbf16>
    %cst_36 = arith.constant dense<0.000000e+00> : vector<8x128xf32>
    %49 = tpu.matmul %47, %48, %cst_36 {dimension_numbers = #tpu.dot_dimension_numbers<[1], [0], [0], [1], [0, 0, 1, 1], [], []>} : vector<8x128xbf16>, vector<128x128xbf16>, vector<8x128xf32> -> vector<8x128xf32>
    %c0_37 = arith.constant 0 : index
    %c0_38 = arith.constant 0 : index
    %50 = vector.load %arg14[%c0_37, %c0_38] : memref<1x128xf32, #tpu.memory_space<vmem>>, vector<1x128xf32>
    %51 = vector.broadcast %50 : vector<1x128xf32> to vector<8x128xf32>
    %52 = arith.addf %49, %51 : vector<8x128xf32>
    %cst_39 = arith.constant 0.000000e+00 : f32
    %53 = vector.broadcast %cst_39 : f32 to vector<8x128xf32>
    %54 = arith.maximumf %52, %53 : vector<8x128xf32>
    %55 = arith.truncf %54 : vector<8x128xf32> to vector<8x128xbf16>
    %c0_40 = arith.constant 0 : index
    %c0_41 = arith.constant 0 : index
    %56 = vector.load %arg15[%c0_40, %c0_41] : memref<128x128xbf16, #tpu.memory_space<vmem>>, vector<128x128xbf16>
    %cst_42 = arith.constant dense<0.000000e+00> : vector<8x128xf32>
    %57 = tpu.matmul %55, %56, %cst_42 {dimension_numbers = #tpu.dot_dimension_numbers<[1], [0], [0], [1], [0, 0, 1, 1], [], []>} : vector<8x128xbf16>, vector<128x128xbf16>, vector<8x128xf32> -> vector<8x128xf32>
    %c0_43 = arith.constant 0 : index
    %c0_44 = arith.constant 0 : index
    %58 = vector.load %arg16[%c0_43, %c0_44] : memref<1x128xf32, #tpu.memory_space<vmem>>, vector<1x128xf32>
    %59 = vector.broadcast %58 : vector<1x128xf32> to vector<8x128xf32>
    %60 = arith.addf %57, %59 : vector<8x128xf32>
    %cst_45 = arith.constant 0.000000e+00 : f32
    %61 = vector.broadcast %cst_45 : f32 to vector<8x128xf32>
    %62 = arith.maximumf %60, %61 : vector<8x128xf32>
    %63 = arith.truncf %62 : vector<8x128xf32> to vector<8x128xbf16>
    %c0_46 = arith.constant 0 : index
    %c0_47 = arith.constant 0 : index
    %64 = vector.load %arg17[%c0_46, %c0_47] : memref<128x1024xbf16, #tpu.memory_space<vmem>>, vector<128x1024xbf16>
    %cst_48 = arith.constant dense<0.000000e+00> : vector<8x1024xf32>
    %65 = tpu.matmul %63, %64, %cst_48 {dimension_numbers = #tpu.dot_dimension_numbers<[1], [0], [0], [1], [0, 0, 1, 1], [], []>} : vector<8x128xbf16>, vector<128x1024xbf16>, vector<8x1024xf32> -> vector<8x1024xf32>
    %c0_49 = arith.constant 0 : index
    %c0_50 = arith.constant 0 : index
    %66 = vector.load %arg18[%c0_49, %c0_50] : memref<1x1024xf32, #tpu.memory_space<vmem>>, vector<1x1024xf32>
    %67 = vector.broadcast %66 : vector<1x1024xf32> to vector<8x1024xf32>
    %68 = arith.addf %65, %67 : vector<8x1024xf32>
    %cst_51 = arith.constant 0.000000e+00 : f32
    %69 = vector.broadcast %cst_51 : f32 to vector<8x1024xf32>
    %70 = arith.maximumf %68, %69 : vector<8x1024xf32>
    %c0_52 = arith.constant 0 : index
    %c0_53 = arith.constant 0 : index
    %71 = vector.load %arg19[%c0_52, %c0_53] : memref<8x1024xf32, #tpu.memory_space<vmem>>, vector<8x1024xf32>
    tpu.vector_store %arg19[%c0_52, %c0_53], %70 {strides = array<i32>} : memref<8x1024xf32, #tpu.memory_space<vmem>>, vector<8x1024xf32>,
    return
  }
  func.func @transform_0(%arg0: i32) -> (i32, i32) {
    %c0_i32 = arith.constant 0 : i32
    %c0_i32_0 = arith.constant 0 : i32
    return %arg0, %c0_i32 : i32, i32
  }
  func.func @transform_1(%arg0: i32) -> (i32, i32) {
    %c0_i32 = arith.constant 0 : i32
    %c0_i32_0 = arith.constant 0 : i32
    return %arg0, %c0_i32 : i32, i32
  }
  func.func @transform_2(%arg0: i32) -> (i32, i32) {
    %c0_i32 = arith.constant 0 : i32
    %c0_i32_0 = arith.constant 0 : i32
    %c0_i32_1 = arith.constant 0 : i32
    return %c0_i32, %c0_i32_0 : i32, i32
  }
  func.func @transform_3(%arg0: i32) -> (i32, i32) {
    %c0_i32 = arith.constant 0 : i32
    %c0_i32_0 = arith.constant 0 : i32
    %c0_i32_1 = arith.constant 0 : i32
    return %c0_i32, %c0_i32_0 : i32, i32
  }
  func.func @transform_4(%arg0: i32) -> (i32, i32) {
    %c0_i32 = arith.constant 0 : i32
    %c0_i32_0 = arith.constant 0 : i32
    %c0_i32_1 = arith.constant 0 : i32
    return %c0_i32, %c0_i32_0 : i32, i32
  }
  func.func @transform_5(%arg0: i32) -> (i32, i32) {
    %c0_i32 = arith.constant 0 : i32
    %c0_i32_0 = arith.constant 0 : i32
    %c0_i32_1 = arith.constant 0 : i32
    return %c0_i32, %c0_i32_0 : i32, i32
  }
  func.func @transform_6(%arg0: i32) -> (i32, i32) {
    %c0_i32 = arith.constant 0 : i32
    %c0_i32_0 = arith.constant 0 : i32
    %c0_i32_1 = arith.constant 0 : i32
    return %c0_i32, %c0_i32_0 : i32, i32
  }
  func.func @transform_7(%arg0: i32) -> (i32, i32) {
    %c0_i32 = arith.constant 0 : i32
    %c0_i32_0 = arith.constant 0 : i32
    %c0_i32_1 = arith.constant 0 : i32
    return %c0_i32, %c0_i32_0 : i32, i32
  }
  func.func @transform_8(%arg0: i32) -> (i32, i32) {
    %c0_i32 = arith.constant 0 : i32
    %c0_i32_0 = arith.constant 0 : i32
    %c0_i32_1 = arith.constant 0 : i32
    return %c0_i32, %c0_i32_0 : i32, i32
  }
  func.func @transform_9(%arg0: i32) -> (i32, i32) {
    %c0_i32 = arith.constant 0 : i32
    %c0_i32_0 = arith.constant 0 : i32
    %c0_i32_1 = arith.constant 0 : i32
    return %c0_i32, %c0_i32_0 : i32, i32
  }
  func.func @transform_10(%arg0: i32) -> (i32, i32) {
    %c0_i32 = arith.constant 0 : i32
    %c0_i32_0 = arith.constant 0 : i32
    %c0_i32_1 = arith.constant 0 : i32
    return %c0_i32, %c0_i32_0 : i32, i32
  }
  func.func @transform_11(%arg0: i32) -> (i32, i32) {
    %c0_i32 = arith.constant 0 : i32
    %c0_i32_0 = arith.constant 0 : i32
    %c0_i32_1 = arith.constant 0 : i32
    return %c0_i32, %c0_i32_0 : i32, i32
  }
  func.func @transform_12(%arg0: i32) -> (i32, i32) {
    %c0_i32 = arith.constant 0 : i32
    %c0_i32_0 = arith.constant 0 : i32
    %c0_i32_1 = arith.constant 0 : i32
    return %c0_i32, %c0_i32_0 : i32, i32
  }
  func.func @transform_13(%arg0: i32) -> (i32, i32) {
    %c0_i32 = arith.constant 0 : i32
    %c0_i32_0 = arith.constant 0 : i32
    %c0_i32_1 = arith.constant 0 : i32
    return %c0_i32, %c0_i32_0 : i32, i32
  }
  func.func @transform_14(%arg0: i32) -> (i32, i32) {
    %c0_i32 = arith.constant 0 : i32
    %c0_i32_0 = arith.constant 0 : i32
    %c0_i32_1 = arith.constant 0 : i32
    return %c0_i32, %c0_i32_0 : i32, i32
  }
  func.func @transform_15(%arg0: i32) -> (i32, i32) {
    %c0_i32 = arith.constant 0 : i32
    %c0_i32_0 = arith.constant 0 : i32
    %c0_i32_1 = arith.constant 0 : i32
    return %c0_i32, %c0_i32_0 : i32, i32
  }
  func.func @transform_16(%arg0: i32) -> (i32, i32) {
    %c0_i32 = arith.constant 0 : i32
    %c0_i32_0 = arith.constant 0 : i32
    %c0_i32_1 = arith.constant 0 : i32
    return %c0_i32, %c0_i32_0 : i32, i32
  }
  func.func @transform_17(%arg0: i32) -> (i32, i32) {
    %c0_i32 = arith.constant 0 : i32
    %c0_i32_0 = arith.constant 0 : i32
    %c0_i32_1 = arith.constant 0 : i32
    return %c0_i32, %c0_i32_0 : i32, i32
  }
  func.func @transform_18(%arg0: i32) -> (i32, i32) {
    %c0_i32 = arith.constant 0 : i32
    %c0_i32_0 = arith.constant 0 : i32
    return %arg0, %c0_i32 : i32, i32
  }
  func.func @transform_19(%arg0: i32) -> (i32, i32) {
    %c0_i32 = arith.constant 0 : i32
    %c0_i32_0 = arith.constant 0 : i32
    return %arg0, %c0_i32 : i32, i32
  }
}

</mosaic_0001>

<bundles_post_ra>
// kernel: vae_forward.1
= control target key start
LH: loop header
LB: loop body
LE: loop exit
PB: predicated region body
PF: predicated region fallthrough
CT: control target
= control target key end

     0   :  { %s2870_s0 = inlined_call_operand.vmem [shape: bf16[8,256], index: 0, kind: input, shape index: {}]   ;;  %s2871_s1 = inlined_call_operand.vmem [shape: f32[8,128], index: 1, kind: input, shape index: {}]   ;;  %s2872_s2 = inlined_call_operand.vmem [shape: bf16[256,128], index: 2, kind: input, shape index: {}]   ;;  %s2873_s3 = inlined_call_operand.vmem [shape: f32[1,128], index: 3, kind: input, shape index: {}]   ;;  %s2874_s4 = inlined_call_operand.hbm [shape: bf16[128,128], index: 4, kind: input, shape index: {}]   ;;  %s2875_s5 = inlined_call_operand.vmem [shape: f32[1,128], index: 5, kind: input, shape index: {}]   ;;  %s2876_s6 = inlined_call_operand.hbm [shape: bf16[128,128], index: 6, kind: input, shape index: {}]   ;;  %s2877_s7 = inlined_call_operand.hbm [shape: f32[1,128], index: 7, kind: input, shape index: {}]   ;;  %s2878_s8 = inlined_call_operand.hbm [shape: bf16[128,256], index: 8, kind: input, shape index: {}]   ;;  %s2879_s9 = inlined_call_operand.vmem [shape: f32[1,256], index: 9, kind: input, shape index: {}]   ;;  %s2880_s10 = inlined_call_operand.hbm [shape: bf16[128,128], index: 10, kind: input, shape index: {}]   ;;  %s2881_s11 = inlined_call_operand.hbm [shape: f32[1,128], index: 11, kind: input, shape index: {}]   ;;  %s2882_s12 = inlined_call_operand.hbm [shape: bf16[128,128], index: 12, kind: input, shape index: {}]   ;;  %s2883_s13 = inlined_call_operand.hbm [shape: f32[1,128], index: 13, kind: input, shape index: {}]   ;;  %s2884_s14 = inlined_call_operand.hbm [shape: bf16[128,128], index: 14, kind: input, shape index: {}]   ;;  %s2885_s15 = inlined_call_operand.hbm [shape: f32[1,128], index: 15, kind: input, shape index: {}]   ;;  %s2886_s16 = inlined_call_operand.hbm [shape: bf16[128,1024], index: 16, kind: input, shape index: {}]   ;;  %s2887_s17 = inlined_call_operand.vmem [shape: f32[1,1024], index: 17, kind: input, shape index: {}]   ;;  %s2888_s18 = inlined_call_operand.vmem [shape: f32[8,1024], index: 18, kind: output, shape index: {0}]   ;;  %s2889_s19 = inlined_call_operand.vmem [shape: f32[8,256], index: 19, kind: output, shape index: {1}]  }
   0x1   :  { %2895 = sst [smem:[#allocation25_spill]] %s2870_s0 }
   0x2   :  { %2896 = sst [smem:[#allocation26_spill]] %s2871_s1 }
   0x3   :  { %2897 = sst [smem:[#allocation27_spill]] %s2872_s2 }
   0x4   :  { %2898 = sst [smem:[#allocation28_spill]] %s2873_s3 }
   0x5   :  { %25 = vsyncpa [#allocation3], 0 }
   0x6   :  { %26 = vsyncpa [#allocation5], 0 }
   0x7   :  { %27 = vsyncpa [#allocation8], 0 }
   0x8   :  { %28 = vsyncpa [#allocation11], 0 }
   0x9   :  { %29 = vsyncpa [#allocation14], 0 }
   0xa   :  { %30 = vsyncpa [#allocation17], 0  ;;  %s2400_s0 = smov [#allocation4]   ;;  %s2401_s20 = smov [#allocation7]  }
   0xb   :  { %s58_s30 = sshll.u32 %s2400_s0, 4  ;;  %s80_s21 = sshll.u32 %s2401_s20, 4  ;;  %s59_s30 = int_to_ptr.vmem [resolvable:$true] %s58_s30  ;;  %s2520_s21 = int_to_ptr.vmem [resolvable:$true] %s80_s21 }
   0xc   :  { %s2146_s2 = scalar_lea.hbm %s2876_s6, 1024 }
   0xd   :  { %p2147_p0 = scmp.ne.s32.totalorder %s2876_s6, %s2146_s2  ;;  %p2150_p1 = scmp.lt.u32.totalorder %s2146_s2, %s2876_s6 }
   0xf   :  { %p2152_p2 = pnand %p2150_p1, %p2147_p0 }
  0x11   :  { %2155 = shalt.err (!%p2152_p2)
}
  0x12   :  { %s2156_s26 = scalar_lea.vmem %s59_s30, 1024  ;;  %p2161_p4 = scmp.lt.s32.totalorder %s59_s30, %s59_s30 }
  0x13   :  { %p2157_p3 = scmp.ne.s32.totalorder %s59_s30, %s2156_s26  ;;  %p2162_p5 = scmp.lt.s32.totalorder %s2156_s26, %s2156_s26 }
  0x15   :  { %p2163_p6 = por %p2162_p5, %p2161_p4 }
  0x17   :  { %p2164_p7 = pnand %p2163_p6, %p2157_p3 }
  0x19   :  { %2167 = shalt.err (!%p2164_p7)
}
  0x1a   :  { %s2891_s27 = smov 64   ;;  %s2893_s28 = smov 4  }
  0x1b   :  { %64 = dma.hbm_to_vmem [thread:$0]  %s2876_s6, 1024, %s59_s30, [#allocation5], %s2891_s27, %s2891_s27, %s2893_s28  }
  0x1c   :  { %s2168_s22 = scalar_lea.hbm %s2878_s8, 2048 }
  0x1d   :  { %p2169_p8 = scmp.ne.s32.totalorder %s2878_s8, %s2168_s22  ;;  %p2172_p9 = scmp.lt.u32.totalorder %s2168_s22, %s2878_s8 }
  0x1f   :  { %p2174_p10 = pnand %p2172_p9, %p2169_p8 }
  0x21   :  { %2177 = shalt.err (!%p2174_p10)
}
  0x22   :  { %s2178_s3 = scalar_lea.vmem %s2520_s21, 2048  ;;  %p2183_p12 = scmp.lt.s32.totalorder %s2520_s21, %s2520_s21 }
  0x23   :  { %p2179_p11 = scmp.ne.s32.totalorder %s2520_s21, %s2178_s3  ;;  %p2184_p13 = scmp.lt.s32.totalorder %s2178_s3, %s2178_s3 }
  0x25   :  { %p2185_p0 = por %p2184_p13, %p2183_p12 }
  0x27   :  { %p2186_p1 = pnand %p2185_p0, %p2179_p11 }
  0x29   :  { %2189 = shalt.err (!%p2186_p1)
}
  0x2a   :  { %s2404_s6 = smov 128   ;;  %s2405_s30 = smov 8  }
  0x2b   :  { %86 = dma.hbm_to_vmem [thread:$0]  %s2878_s8, 2048, %s2520_s21, [#allocation8], %s2404_s6, %s2404_s6, %s2405_s30  }
  0x2c   :  { %s2406_s0 = smov [#allocation10]   ;;  %s2407_s1 = smov [#allocation13]  }
  0x2d   :  { %s107_s20 = sshll.u32 %s2406_s0, 4  ;;  %s129_s22 = sshll.u32 %s2407_s1, 4  ;;  %s108_s20 = int_to_ptr.vmem [resolvable:$true] %s107_s20  ;;  %s130_s22 = int_to_ptr.vmem [resolvable:$true] %s129_s22 }
  0x2e   :  { %s2190_s24 = scalar_lea.hbm %s2881_s11, 16 }
  0x2f   :  { %p2191_p2 = scmp.ne.s32.totalorder %s2881_s11, %s2190_s24  ;;  %p2194_p3 = scmp.lt.u32.totalorder %s2190_s24, %s2881_s11 }
  0x31   :  { %p2196_p4 = pnand %p2194_p3, %p2191_p2 }
  0x33   :  { %2199 = shalt.err (!%p2196_p4)
}
  0x34   :  { %s2200_s8 = scalar_lea.vmem %s108_s20, 16  ;;  %s2204_s21 = scalar_lea.vmem %s108_s20, 32 }
  0x35   :  { %p2201_p5 = scmp.ne.s32.totalorder %s108_s20, %s2200_s8  ;;  %p2205_p6 = scmp.lt.s32.totalorder %s108_s20, %s108_s20 }
  0x36   :  { %p2206_p7 = scmp.lt.s32.totalorder %s2204_s21, %s2200_s8 }
  0x38   :  { %p2207_p8 = por %p2206_p7, %p2205_p6 }
  0x3a   :  { %p2208_p9 = pnand %p2207_p8, %p2201_p5 }
  0x3c   :  { %2211 = shalt.err (!%p2208_p9)
}
  0x3d   :  { %110 = dma.hbm_to_vmem [thread:$0]  %s2881_s11, 16, %s108_s20, [#allocation11]  }
  0x3e   :  { %s2212_s0 = scalar_lea.hbm %s2883_s13, 16 }
  0x3f   :  { %p2213_p10 = scmp.ne.s32.totalorder %s2883_s13, %s2212_s0  ;;  %p2216_p11 = scmp.lt.u32.totalorder %s2212_s0, %s2883_s13 }
  0x41   :  { %p2218_p12 = pnand %p2216_p11, %p2213_p10 }
  0x43   :  { %2221 = shalt.err (!%p2218_p12)
}
  0x44   :  { %s2222_s23 = scalar_lea.vmem %s130_s22, 16  ;;  %s2226_s24 = scalar_lea.vmem %s130_s22, 32 }
  0x45   :  { %p2223_p13 = scmp.ne.s32.totalorder %s130_s22, %s2222_s23  ;;  %p2227_p0 = scmp.lt.s32.totalorder %s130_s22, %s130_s22 }
  0x46   :  { %p2228_p1 = scmp.lt.s32.totalorder %s2226_s24, %s2222_s23 }
  0x48   :  { %p2229_p2 = por %p2228_p1, %p2227_p0 }
  0x4a   :  { %p2230_p3 = pnand %p2229_p2, %p2223_p13 }
  0x4c   :  { %2233 = shalt.err (!%p2230_p3)
}
  0x4d   :  { %132 = dma.hbm_to_vmem [thread:$0]  %s2883_s13, 16, %s130_s22, [#allocation14]  }
  0x4e   :  { %s2408_s25 = smov [#allocation16]   ;;  %s2409_s8 = smov [#allocation2]  }
  0x4f   :  { %s151_s3 = sshll.u32 %s2408_s25, 4  ;;  %s44_s21 = sshll.u32 %s2409_s8, 4  ;;  %s152_s3 = int_to_ptr.vmem [resolvable:$true] %s151_s3  ;;  %s2578_s21 = int_to_ptr.vmem [resolvable:$true] %s44_s21 }
  0x50   :  { %s2234_s26 = scalar_lea.hbm %s2885_s15, 16 }
  0x51   :  { %p2235_p4 = scmp.ne.s32.totalorder %s2885_s15, %s2234_s26  ;;  %p2238_p5 = scmp.lt.u32.totalorder %s2234_s26, %s2885_s15 }
  0x53   :  { %p2240_p6 = pnand %p2238_p5, %p2235_p4 }
  0x55   :  { %2243 = shalt.err (!%p2240_p6)
}
  0x56   :  { %s2244_s13 = scalar_lea.vmem %s152_s3, 16  ;;  %s2248_s22 = scalar_lea.vmem %s152_s3, 32 }
  0x57   :  { %p2245_p7 = scmp.ne.s32.totalorder %s152_s3, %s2244_s13  ;;  %p2249_p8 = scmp.lt.s32.totalorder %s152_s3, %s152_s3 }
  0x58   :  { %p2250_p9 = scmp.lt.s32.totalorder %s2248_s22, %s2244_s13 }
  0x5a   :  { %p2251_p10 = por %p2250_p9, %p2249_p8 }
  0x5c   :  { %p2252_p11 = pnand %p2251_p10, %p2245_p7 }
  0x5e   :  { %2255 = shalt.err (!%p2252_p11)
}
  0x5f   :  { %154 = dma.hbm_to_vmem [thread:$0]  %s2885_s15, 16, %s152_s3, [#allocation17]  }
  0x60   :  { %s2256_s11 = scalar_lea.hbm %s2874_s4, 1024 }
  0x61   :  { %p2257_p12 = scmp.ne.s32.totalorder %s2874_s4, %s2256_s11  ;;  %p2260_p13 = scmp.lt.u32.totalorder %s2256_s11, %s2874_s4 }
  0x63   :  { %p2262_p0 = pnand %p2260_p13, %p2257_p12 }
  0x65   :  { %2265 = shalt.err (!%p2262_p0)
}
  0x66   :  { %s2266_s30 = scalar_lea.vmem %s2578_s21, 1024  ;;  %p2271_p2 = scmp.lt.s32.totalorder %s2578_s21, %s2578_s21 }
  0x67   :  { %p2267_p1 = scmp.ne.s32.totalorder %s2578_s21, %s2266_s30  ;;  %p2272_p3 = scmp.lt.s32.totalorder %s2266_s30, %s2266_s30 }
  0x69   :  { %p2273_p4 = por %p2272_p3, %p2271_p2 }
  0x6b   :  { %p2274_p5 = pnand %p2273_p4, %p2267_p1 }
  0x6d   :  { %2277 = shalt.err (!%p2274_p5)
}
  0x6e   :  { %s2899_s15 = smov 4   ;;  %s2900_s3 = smov 64  }
  0x6f   :  { %50 = dma.hbm_to_vmem [thread:$0]  %s2874_s4, 1024, %s2578_s21, [#allocation3], %s2900_s3, %s2900_s3, %s2899_s15  }
  0x70   :  { %s2410_s0 = smov [#allocation6]   ;;  %s2411_s28 = smov [#allocation9]  }
  0x71   :  { %s71_s27 = sshll.u32 %s2410_s0, 4  ;;  %s94_s13 = sshll.u32 %s2411_s28, 4  ;;  %s72_s27 = int_to_ptr.vmem [resolvable:$true] %s71_s27  ;;  %s2612_s13 = int_to_ptr.vmem [resolvable:$true] %s94_s13 }
  0x72   :  { %s2278_s2 = scalar_lea.hbm %s2877_s7, 16 }
  0x73   :  { %p2279_p6 = scmp.ne.s32.totalorder %s2877_s7, %s2278_s2  ;;  %p2282_p7 = scmp.lt.u32.totalorder %s2278_s2, %s2877_s7 }
  0x75   :  { %p2284_p8 = pnand %p2282_p7, %p2279_p6 }
  0x77   :  { %2287 = shalt.err (!%p2284_p8)
}
  0x78   :  { %s2288_s4 = scalar_lea.vmem %s72_s27, 16  ;;  %s2292_s21 = scalar_lea.vmem %s72_s27, 32 }
  0x79   :  { %p2289_p9 = scmp.ne.s32.totalorder %s72_s27, %s2288_s4  ;;  %p2293_p10 = scmp.lt.s32.totalorder %s72_s27, %s72_s27 }
  0x7a   :  { %p2294_p11 = scmp.lt.s32.totalorder %s2292_s21, %s2288_s4 }
  0x7c   :  { %p2295_p12 = por %p2294_p11, %p2293_p10 }
  0x7e   :  { %p2296_p13 = pnand %p2295_p12, %p2289_p9 }
  0x80   :  { %2299 = shalt.err (!%p2296_p13)
}
  0x81   :  { %74 = dma.hbm_to_vmem [thread:$0]  %s2877_s7, 16, %s72_s27, [#allocation5]  }
  0x82   :  { %s2300_s26 = scalar_lea.hbm %s2880_s10, 1024 }
  0x83   :  { %p2301_p0 = scmp.ne.s32.totalorder %s2880_s10, %s2300_s26  ;;  %p2304_p1 = scmp.lt.u32.totalorder %s2300_s26, %s2880_s10 }
  0x85   :  { %p2306_p2 = pnand %p2304_p1, %p2301_p0 }
  0x87   :  { %2309 = shalt.err (!%p2306_p2)
}
  0x88   :  { %s2310_s1 = scalar_lea.vmem %s2612_s13, 1024  ;;  %p2315_p4 = scmp.lt.s32.totalorder %s2612_s13, %s2612_s13 }
  0x89   :  { %p2311_p3 = scmp.ne.s32.totalorder %s2612_s13, %s2310_s1  ;;  %p2316_p5 = scmp.lt.s32.totalorder %s2310_s1, %s2310_s1 }
  0x8b   :  { %p2317_p6 = por %p2316_p5, %p2315_p4 }
  0x8d   :  { %p2318_p7 = pnand %p2317_p6, %p2311_p3 }
  0x8f   :  { %2321 = shalt.err (!%p2318_p7)
}
  0x90   :  { %100 = dma.hbm_to_vmem [thread:$0]  %s2880_s10, 1024, %s2612_s13, [#allocation8], %s2900_s3, %s2900_s3, %s2899_s15  }
  0x91   :  { %s2412_s2 = smov [#allocation12]   ;;  %s2413_s24 = smov [#allocation15]  }
  0x92   :  { %s116_s23 = sshll.u32 %s2412_s2, 4  ;;  %s138_s11 = sshll.u32 %s2413_s24, 4  ;;  %s117_s23 = int_to_ptr.vmem [resolvable:$true] %s116_s23  ;;  %s2646_s11 = int_to_ptr.vmem [resolvable:$true] %s138_s11 }
  0x93   :  { %s2322_s21 = scalar_lea.hbm %s2882_s12, 1024 }
  0x94   :  { %p2323_p8 = scmp.ne.s32.totalorder %s2882_s12, %s2322_s21  ;;  %p2326_p9 = scmp.lt.u32.totalorder %s2322_s21, %s2882_s12 }
  0x96   :  { %p2328_p10 = pnand %p2326_p9, %p2323_p8 }
  0x98   :  { %2331 = shalt.err (!%p2328_p10)
}
  0x99   :  { %s2332_s10 = scalar_lea.vmem %s117_s23, 1024  ;;  %p2337_p12 = scmp.lt.s32.totalorder %s117_s23, %s117_s23 }
  0x9a   :  { %p2333_p11 = scmp.ne.s32.totalorder %s117_s23, %s2332_s10  ;;  %p2338_p13 = scmp.lt.s32.totalorder %s2332_s10, %s2332_s10 }
  0x9c   :  { %p2339_p0 = por %p2338_p13, %p2337_p12 }
  0x9e   :  { %p2340_p1 = pnand %p2339_p0, %p2333_p11 }
  0xa0   :  { %2343 = shalt.err (!%p2340_p1)
}
  0xa1   :  { %122 = dma.hbm_to_vmem [thread:$0]  %s2882_s12, 1024, %s117_s23, [#allocation11], %s2900_s3, %s2900_s3, %s2899_s15  }
  0xa2   :  { %s2344_s28 = scalar_lea.hbm %s2884_s14, 1024 }
  0xa3   :  { %p2345_p2 = scmp.ne.s32.totalorder %s2884_s14, %s2344_s28  ;;  %p2348_p3 = scmp.lt.u32.totalorder %s2344_s28, %s2884_s14 }
  0xa5   :  { %p2350_p4 = pnand %p2348_p3, %p2345_p2 }
  0xa7   :  { %2353 = shalt.err (!%p2350_p4)
}
  0xa8   :  { %s2354_s2 = scalar_lea.vmem %s2646_s11, 1024  ;;  %p2359_p6 = scmp.lt.s32.totalorder %s2646_s11, %s2646_s11 }
  0xa9   :  { %p2355_p5 = scmp.ne.s32.totalorder %s2646_s11, %s2354_s2  ;;  %p2360_p7 = scmp.lt.s32.totalorder %s2354_s2, %s2354_s2 }
  0xab   :  { %p2361_p8 = por %p2360_p7, %p2359_p6 }
  0xad   :  { %p2362_p9 = pnand %p2361_p8, %p2355_p5 }
  0xaf   :  { %2365 = shalt.err (!%p2362_p9)
}
  0xb0   :  { %144 = dma.hbm_to_vmem [thread:$0]  %s2884_s14, 1024, %s2646_s11, [#allocation14], %s2900_s3, %s2900_s3, %s2899_s15  }
  0xb1   :  { %s2414_s24 = smov [#allocation18]   ;;  %s2366_s25 = scalar_lea.hbm %s2886_s16, 8192 }
  0xb2   :  { %s160_s20 = sshll.u32 %s2414_s24, 4  ;;  %p2367_p10 = scmp.ne.s32.totalorder %s2886_s16, %s2366_s25  ;;  %s161_s20 = int_to_ptr.vmem [resolvable:$true] %s160_s20 }
  0xb3   :  { %p2370_p11 = scmp.lt.u32.totalorder %s2366_s25, %s2886_s16 }
  0xb5   :  { %p2372_p12 = pnand %p2370_p11, %p2367_p10 }
  0xb7   :  { %2375 = shalt.err (!%p2372_p12)
}
  0xb8   :  { %s2376_s13 = scalar_lea.vmem %s161_s20, 8192  ;;  %p2381_p0 = scmp.lt.s32.totalorder %s161_s20, %s161_s20 }
  0xb9   :  { %p2377_p13 = scmp.ne.s32.totalorder %s161_s20, %s2376_s13  ;;  %p2382_p1 = scmp.lt.s32.totalorder %s2376_s13, %s2376_s13 }
  0xbb   :  { %p2383_p2 = por %p2382_p1, %p2381_p0 }
  0xbd   :  { %p2384_p3 = pnand %p2383_p2, %p2377_p13 }
  0xbf   :  { %2387 = shalt.err (!%p2384_p3)
}
  0xc0   :  { %s2415_s14 = smov 512   ;;  %s2416_s15 = smov 32  }
  0xc1   :  { %166 = dma.hbm_to_vmem [thread:$0]  %s2886_s16, 8192, %s161_s20, [#allocation17], %s2415_s14, %s2415_s14, %s2416_s15  }
  0xc2   :  { %2388 = dma.done.wait [#allocation3], 1024  }
  0xc3   :  { %2389 = vsyncadd [#allocation3], 4294966272 }
  0xc4   :  { %2390 = dma.done.wait [#allocation5], 1040  }
  0xc5   :  { %2391 = vsyncadd [#allocation5], 4294966256 }
  0xc6   :  { %2392 = dma.done.wait [#allocation8], 3072  }
  0xc7   :  { %2393 = vsyncadd [#allocation8], 4294964224 }
  0xc8   :  { %2394 = dma.done.wait [#allocation11], 1040  }
  0xc9   :  { %2395 = vsyncadd [#allocation11], 4294966256 }
  0xca   :  { %2396 = dma.done.wait [#allocation14], 1040  }
  0xcb   :  { %2397 = vsyncadd [#allocation14], 4294966256 }
  0xcc   :  { %2398 = dma.done.wait [#allocation17], 8208  }
  0xcd   :  { %2399 = vsyncadd [#allocation17], 4294959088  ;;  %v2417_v0 = vmov 0.0   ;;  %s2901_s0 = sld [smem:[#allocation27_spill]]  ;;  %s2902_s11 = sld [smem:[#allocation25_spill]]  ;;  %v2080_v14 = vld [vmem:[#allocation2] sm:$0xff]  }
  0xce   :  { %1942 = vmatprep.subr.bf16.mxu1 %v2417_v0  ;;  %v2081_v17 = vld [vmem:[#allocation2 + $0x8] sm:$0xff]   ;;  %v2082_v20 = vld [vmem:[#allocation2 + $0x10] sm:$0xff]   ;;  %v2083_v22 = vld [vmem:[#allocation2 + $0x18] sm:$0xff]   ;;  %vm2418_vm0 = vmmov 0   ;;  %s2903_s24 = sld [smem:[#allocation28_spill]]  ;;  %s2904_s13 = sld [smem:[#allocation26_spill]] }
  0xcf   :  { %1943 = vmatpush3.bf16.msra.mxu1 %v2080_v14  ;;  %v2084_v24 = vld [vmem:[#allocation2 + $0x20] sm:$0xff]   ;;  %v2085_v25 = vld [vmem:[#allocation2 + $0x28] sm:$0xff]   ;;  %v2086_v26 = vld [vmem:[#allocation2 + $0x30] sm:$0xff]   ;;  %1958 = vmatprep.mubr.msk.bf16.mxu1 %vm2418_vm0, %v2417_v0 }
  0xd0   :  { %1944 = vmatprep.subr.bf16.mxu1 %v2417_v0  ;;  %v2087_v27 = vld [vmem:[#allocation2 + $0x38] sm:$0xff]   ;;  %v2088_v28 = vld [vmem:[#allocation4] sm:$0xff]   ;;  %v2089_v29 = vld [vmem:[#allocation4 + $0x8] sm:$0xff]  }
  0xd1   :  { %v2090_v30 = vld [vmem:[#allocation4 + $0x10] sm:$0xff]   ;;  %v2091_v31 = vld [vmem:[#allocation4 + $0x18] sm:$0xff]   ;;  %v2092_v32 = vld [vmem:[#allocation4 + $0x20] sm:$0xff]  }
  0xd2   :  { %v2093_v33 = vld [vmem:[#allocation4 + $0x28] sm:$0xff]   ;;  %v2094_v43 = vld [vmem:[#allocation4 + $0x30] sm:$0xff]   ;;  %v2095_v44 = vld [vmem:[#allocation4 + $0x38] sm:$0xff]  }
  0xd3   :  { %v2062_v1 = vld [vmem:[%s2901_s0 + $0x40] sm:$0xff]   ;;  %v2064_v3 = vld [vmem:[%s2901_s0 + $0x48] sm:$0xff]   ;;  %v2066_v5 = vld [vmem:[%s2901_s0 + $0x50] sm:$0xff]   ;;  %1945 = vmatpush3.bf16.msra.mxu1 %v2081_v17 }
  0xd4   :  { %v2063_v2 = vld [vmem:[%s2901_s0] sm:$0xff]   ;;  %1875 = vmatprep.subr.bf16.mxu0 %v2062_v1  ;;  %v2065_v4 = vld [vmem:[%s2901_s0 + $0x8] sm:$0xff]   ;;  %v2067_v6 = vld [vmem:[%s2901_s0 + $0x10] sm:$0xff]   ;;  %1946 = vmatprep.subr.bf16.mxu1 %v2417_v0 }
  0xd5   :  { %1876 = vmatpush3.bf16.msra.mxu0 %v2063_v2  ;;  %v2068_v7 = vld [vmem:[%s2901_s0 + $0x58] sm:$0xff]   ;;  %v2070_v9 = vld [vmem:[%s2901_s0 + $0x60] sm:$0xff]   ;;  %v2072_v11 = vld [vmem:[%s2901_s0 + $0x68] sm:$0xff]  }
  0xd6   :  { %1877 = vmatprep.subr.bf16.mxu0 %v2064_v3  ;;  %v2069_v8 = vld [vmem:[%s2901_s0 + $0x18] sm:$0xff]   ;;  %v2071_v10 = vld [vmem:[%s2901_s0 + $0x20] sm:$0xff]   ;;  %v2073_v15 = vld [vmem:[%s2901_s0 + $0x28] sm:$0xff]  }
  0xd7   :  { %v203_v12 = vld [vmem:[%s2902_s11] sm:$0xff]  ;;  %v2074_v16 = vld [vmem:[%s2901_s0 + $0x70] sm:$0xff]   ;;  %v2076_v19 = vld [vmem:[%s2901_s0 + $0x78] sm:$0xff]   ;;  %1947 = vmatpush3.bf16.msra.mxu1 %v2082_v20 }
  0xd8   :  { %v1733_v13 = vcombine.high %v203_v12, %v203_v12  ;;  %v2075_v18 = vld [vmem:[%s2901_s0 + $0x30] sm:$0xff]   ;;  %v2077_v21 = vld [vmem:[%s2901_s0 + $0x38] sm:$0xff]   ;;  %1948 = vmatprep.subr.bf16.mxu1 %v2417_v0  ;;  %v1732_v23 = vcombine.low %v203_v12, %v203_v12  ;;  %v1731_v35 = vld [vmem:[%s2903_s24] ss:$0 sm:$0xff] }
  0xd9   :  { %1878 = vmatpush3.bf16.msra.mxu0 %v2065_v4  ;;  %v2096_v45 = vld [vmem:[#allocation7] ss:$8 sps:$4 sm:$0xff]   ;;  %v2098_v46 = vld [vmem:[#allocation7 + $0x4] ss:$8 sps:$4 sm:$0xff]   ;;  %v2101_v47 = vld [vmem:[#allocation7 + $0x14] ss:$8 sps:$4 sm:$0xff]  }
  0xda   :  { %1879 = vmatprep.subr.bf16.mxu0 %v2066_v5  ;;  %378 = vmatprep.mubr.bf16.mxu0 %v1733_v13  ;;  %v2099_v48 = vld [vmem:[#allocation7 + $0x10] ss:$8 sps:$4 sm:$0xff]   ;;  %v2104_v49 = vld [vmem:[#allocation7 + $0x24] ss:$8 sps:$4 sm:$0xff]   ;;  %v2102_v50 = vld [vmem:[#allocation7 + $0x20] ss:$8 sps:$4 sm:$0xff]  }
  0xdb   :  { %1949 = vmatpush3.bf16.msra.mxu1 %v2083_v22  ;;  %v2107_v51 = vld [vmem:[#allocation7 + $0x34] ss:$8 sps:$4 sm:$0xff]   ;;  %v2105_v52 = vld [vmem:[#allocation7 + $0x30] ss:$8 sps:$4 sm:$0xff]   ;;  %v2110_v53 = vld [vmem:[#allocation7 + $0x44] ss:$8 sps:$4 sm:$0xff]  }
  0xdc   :  { %1950 = vmatprep.subr.bf16.mxu1 %v2417_v0  ;;  %v2108_v54 = vld [vmem:[#allocation7 + $0x40] ss:$8 sps:$4 sm:$0xff]   ;;  %v2113_v55 = vld [vmem:[#allocation7 + $0x54] ss:$8 sps:$4 sm:$0xff]   ;;  %v2111_v56 = vld [vmem:[#allocation7 + $0x50] ss:$8 sps:$4 sm:$0xff]  }
  0xdd   :  { %1880 = vmatpush3.bf16.msra.mxu0 %v2067_v6  ;;  %v2116_v57 = vld [vmem:[#allocation7 + $0x64] ss:$8 sps:$4 sm:$0xff]   ;;  %v2114_v58 = vld [vmem:[#allocation7 + $0x60] ss:$8 sps:$4 sm:$0xff]   ;;  %v1750_v59 = vld [vmem:[%s2875_s5] ss:$0 sm:$0xff] }
  0xde   :  { %1881 = vmatprep.subr.bf16.mxu0 %v2068_v7  ;;  %v2119_v4 = vld [vmem:[#allocation7 + $0x74] ss:$8 sps:$4 sm:$0xff]   ;;  %v2117_v5 = vld [vmem:[#allocation7 + $0x70] ss:$8 sps:$4 sm:$0xff]   ;;  %v2419_v6 = vmov 0   ;;  %v2120_v7 = vld [vmem:[#allocation9] sm:$0xff]  }
  0xdf   :  { %1951 = vmatpush3.bf16.msra.mxu1 %v2084_v24  ;;  %v2122_v17 = vld [vmem:[#allocation9 + $0x10] sm:$0xff]   ;;  %v2125_v20 = vld [vmem:[#allocation9 + $0x28] sm:$0xff]   ;;  %v2127_v22 = vld [vmem:[#allocation9 + $0x38] sm:$0xff]  }
  0xe0   :  { %1952 = vmatprep.subr.bf16.mxu1 %v2417_v0  ;;  %v2129_v24 = vld [vmem:[#allocation12 + $0x8] sm:$0xff]  }
  0xe1   :  { %1882 = vmatpush3.bf16.msra.mxu0 %v2069_v8  ;;  %v2121_v8 = vld [vmem:[#allocation9 + $0x8] sm:$0xff]  }
  0xe2   :  { %1883 = vmatprep.subr.bf16.mxu0 %v2070_v9  ;;  %v1759_v9 = vld [vmem:[#allocation6] ss:$0 sm:$0xff] }
  0xe3   :  { %1953 = vmatpush3.bf16.msra.mxu1 %v2085_v25  ;;  %v2130_v25 = vld [vmem:[#allocation12 + $0x10] sm:$0xff]  }
  0xe4   :  { %1954 = vmatprep.subr.bf16.mxu1 %v2417_v0 }
  0xe5   :  { %1884 = vmatpush3.bf16.msra.mxu0 %v2071_v10 }
  0xe6   :  { %1885 = vmatprep.subr.bf16.mxu0 %v2072_v11 }
  0xe7   :  { %1955 = vmatpush3.bf16.msra.mxu1 %v2086_v26  ;;  %v2131_v26 = vld [vmem:[#allocation12 + $0x18] sm:$0xff]  }
  0xe8   :  { %1956 = vmatprep.subr.bf16.mxu1 %v2417_v0 }
  0xe9   :  { %1886 = vmatpush3.bf16.msra.mxu0 %v2073_v15 }
  0xea   :  { %1887 = vmatprep.subr.bf16.mxu0 %v2074_v16 }
  0xeb   :  { %1957 = vmatpush3.bf16.msra.mxu1 %v2087_v27  ;;  %v2132_v27 = vld [vmem:[#allocation12 + $0x20] sm:$0xff]  }
  0xec   :  { %722 = vmatprep.subr.bf16.mxu1 %v2098_v46 }
  0xed   :  { %1888 = vmatpush3.bf16.msra.mxu0 %v2075_v18  ;;  %v2123_v18 = vld [vmem:[#allocation9 + $0x18] sm:$0xff]  }
  0xee   :  { %1889 = vmatprep.subr.bf16.mxu0 %v2076_v19  ;;  %v2124_v19 = vld [vmem:[#allocation9 + $0x20] sm:$0xff]  }
  0xf1   :  { %1890 = vmatpush3.bf16.msra.mxu0 %v2077_v21  ;;  %v2126_v21 = vld [vmem:[#allocation9 + $0x30] sm:$0xff]  }
  0xf2   :  { %1962 = vmatprep.subr.bf16.mxu0 %v2417_v0 }
  0xf4   :  { %379 = vmatmul.mubr.bf16.vlgmr.msra.gmra.mrb[0].mxu0 %v1732_v23  ;;  %v2128_v23 = vld [vmem:[#allocation12] sm:$0xff]  }
  0xf5   :  { %1978 = vmatprep.mubr.msk.bf16.mxu0 %vm2418_vm0, %v2417_v0  ;;  %1963 = vmatpush3.bf16.msra.mxu0 %v2088_v28  ;;  %v2133_v28 = vld [vmem:[#allocation12 + $0x28] sm:$0xff]  }
  0xf6   :  { %1964 = vmatprep.subr.bf16.mxu0 %v2417_v0 }
  0xf9   :  { %1965 = vmatpush3.bf16.msra.mxu0 %v2089_v29  ;;  %v632_v29 = vlaneseq }
  0xfa   :  { %1966 = vmatprep.subr.bf16.mxu0 %v2417_v0 }
  0xfd   :  { %1967 = vmatpush3.bf16.msra.mxu0 %v2090_v30  ;;  %v2793_v30 = vshrl.u32 %v632_v29, 7  ;;  %v1155_v29 = vld [vmem:[#allocation18 + $0x160] sm:$0xff] }
  0xfe   :  { %1968 = vmatprep.subr.bf16.mxu0 %v2417_v0 }
 0x101   :  { %1969 = vmatpush3.bf16.msra.mxu0 %v2091_v31  ;;  %v634_v31 = vsub.s32 0, %v2793_v30 }
 0x102   :  { %1970 = vmatprep.subr.bf16.mxu0 %v2417_v0 }
 0x105   :  { %1971 = vmatpush3.bf16.msra.mxu0 %v2092_v32  ;;  %v630_v32 = vld [vmem:[%s2879_s9] sm:$0x3] }
 0x106   :  { %1972 = vmatprep.subr.bf16.mxu0 %v2417_v0 }
 0x109   :  { %1973 = vmatpush3.bf16.msra.mxu0 %v2093_v33  ;;  %v638_v33 = vsub.s32 1, %v2793_v30 }
 0x10a   :  { %1974 = vmatprep.subr.bf16.mxu0 %v2417_v0 }
 0x10d   :  { %1975 = vmatpush3.bf16.msra.mxu0 %v2094_v43 }
 0x10e   :  { %1976 = vmatprep.subr.bf16.mxu0 %v2417_v0 }
 0x111   :  { %1977 = vmatpush3.bf16.msra.mxu0 %v2095_v44  ;;  %v765_v44 = vld [vmem:[%s2904_s13] sm:$0xff] }
 0x112   :  { %1982 = vmatprep.subr.bf16.mxu0 %v2417_v0 }
 0x1c7   :  { %v1891_v34 = vpop.f32.mrb[0].mxu0 }
 0x1c8   :  { %v1892_v36 = vpop.f32.mrb[1].mxu0 }
 0x1c9   :  { %v1893_v37 = vadd.f32 %v1892_v36, %v1891_v34  ;;  %v1894_v38 = vpop.f32.mrb[2].mxu0  ;;  %v635_v34 = vrot.slane %v630_v32, %v634_v31 }
 0x1ca   :  { %v1895_v39 = vpop.f32.mrb[3].mxu0 }
 0x1cb   :  { %v381_v40 = vadd.f32 %v1893_v37, %v1731_v35  ;;  %v639_v35 = vrot.slane %v630_v32, %v638_v33 }
 0x1cd   :  { %v386_v41 = vmax.f32 %v381_v40, 0.0 }
 0x1cf   :  { %v387_v42 = vpack.c.bf16 %v386_v41, %v386_v41 }
 0x1d1   :  { %1959 = vmatmul.mubr.bf16.vlgmr.msra.gmra.mrb[0].mxu1 %v387_v42 }
 0x1d2   :  { %723 = vmatpush1.bf16.msra.mxu1 %v2096_v45  ;;  %754 = vmatprep.mubr.bf16.mxu1 %v2419_v6 }
 0x1d3   :  { %724 = vmatprep.subr.bf16.mxu1 %v2101_v47 }
 0x1d6   :  { %725 = vmatpush1.bf16.msra.mxu1 %v2099_v48 }
 0x1d7   :  { %726 = vmatprep.subr.bf16.mxu1 %v2104_v49  ;;  %v2134_v49 = vld [vmem:[#allocation12 + $0x30] sm:$0xff]  }
 0x1da   :  { %727 = vmatpush1.bf16.msra.mxu1 %v2102_v50  ;;  %v2135_v50 = vld [vmem:[#allocation12 + $0x38] sm:$0xff]  }
 0x1db   :  { %728 = vmatprep.subr.bf16.mxu1 %v2107_v51  ;;  %v2136_v51 = vld [vmem:[#allocation15] sm:$0xff]  }
 0x1de   :  { %729 = vmatpush1.bf16.msra.mxu1 %v2105_v52  ;;  %v2137_v52 = vld [vmem:[#allocation15 + $0x8] sm:$0xff]  }
 0x1df   :  { %730 = vmatprep.subr.bf16.mxu1 %v2110_v53  ;;  %v2138_v53 = vld [vmem:[#allocation15 + $0x10] sm:$0xff]  }
 0x1e2   :  { %731 = vmatpush1.bf16.msra.mxu1 %v2108_v54  ;;  %v2139_v54 = vld [vmem:[#allocation15 + $0x18] sm:$0xff]  }
 0x1e3   :  { %732 = vmatprep.subr.bf16.mxu1 %v2113_v55  ;;  %v2140_v55 = vld [vmem:[#allocation15 + $0x20] sm:$0xff]  }
 0x1e6   :  { %733 = vmatpush1.bf16.msra.mxu1 %v2111_v56  ;;  %v2141_v56 = vld [vmem:[#allocation15 + $0x28] sm:$0xff]  }
 0x1e7   :  { %734 = vmatprep.subr.bf16.mxu1 %v2116_v57  ;;  %v1784_v57 = vld [vmem:[#allocation10] ss:$0 sm:$0xff] }
 0x1ea   :  { %735 = vmatpush1.bf16.msra.mxu1 %v2114_v58 }
 0x1eb   :  { %736 = vmatprep.subr.bf16.mxu1 %v2119_v4  ;;  %v1111_v4 = vld [vmem:[#allocation18] sm:$0xff] }
 0x1ee   :  { %737 = vmatpush1.bf16.msra.mxu1 %v2117_v5  ;;  %v1115_v5 = vld [vmem:[#allocation18 + $0x20] sm:$0xff] }
 0x1ef   :  { %2002 = vmatprep.subr.bf16.mxu1 %v2417_v0 }
 0x2a4   :  { %v493_v60 = vpop.f32.mrb[0].mxu1 }
 0x2a5   :  { %v494_v61 = vadd.f32 %v1750_v59, %v493_v60  ;;  %v1960_v62 = vpop.f32.mrb[1].mxu1 }
 0x2a6   :  { %v496_v63 = vpop.f32.mrb[2].mxu1 }
 0x2a7   :  { %v499_v1 = vmax.f32 %v494_v61, 0.0  ;;  %v1961_v2 = vpop.f32.mrb[3].mxu1 }
 0x2a8   :  { %v2142_v2 = vld [vmem:[#allocation15 + $0x30] sm:$0xff]  }
 0x2a9   :  { %v500_v3 = vpack.c.bf16 %v499_v1, %v499_v1 }
 0x2ab   :  { %1979 = vmatmul.mubr.bf16.vlgmr.msra.gmra.mrb[4].mxu0 %v500_v3  ;;  %v2143_v3 = vld [vmem:[#allocation15 + $0x38] sm:$0xff]  }
 0x2ac   :  { %1998 = vmatprep.mubr.msk.bf16.mxu0 %vm2418_vm0, %v2417_v0  ;;  %1983 = vmatpush3.bf16.msra.mxu0 %v2120_v7  ;;  %v1112_v7 = vld [vmem:[#allocation18 + $0x8] sm:$0xff] }
 0x2ad   :  { %1984 = vmatprep.subr.bf16.mxu0 %v2417_v0 }
 0x2b0   :  { %1985 = vmatpush3.bf16.msra.mxu0 %v2121_v8  ;;  %v1811_v8 = vcombine.low %v1111_v4, %v1115_v5 }
 0x2b1   :  { %1986 = vmatprep.subr.bf16.mxu0 %v2417_v0 }
 0x2b4   :  { %1987 = vmatpush3.bf16.msra.mxu0 %v2122_v17  ;;  %v1127_v17 = vld [vmem:[#allocation18 + $0x80] sm:$0xff] }
 0x2b5   :  { %1988 = vmatprep.subr.bf16.mxu0 %v2417_v0 }
 0x2b8   :  { %1989 = vmatpush3.bf16.msra.mxu0 %v2123_v18 }
 0x2b9   :  { %1990 = vmatprep.subr.bf16.mxu0 %v2417_v0 }
 0x2bc   :  { %1991 = vmatpush3.bf16.msra.mxu0 %v2124_v19 }
 0x2bd   :  { %1992 = vmatprep.subr.bf16.mxu0 %v2417_v0 }
 0x2c0   :  { %1993 = vmatpush3.bf16.msra.mxu0 %v2125_v20  ;;  %v1135_v20 = vld [vmem:[#allocation18 + $0xc0] sm:$0xff] }
 0x2c1   :  { %1994 = vmatprep.subr.bf16.mxu0 %v2417_v0 }
 0x2c4   :  { %1995 = vmatpush3.bf16.msra.mxu0 %v2126_v21  ;;  %v1139_v21 = vld [vmem:[#allocation18 + $0xe0] sm:$0xff] }
 0x2c5   :  { %1996 = vmatprep.subr.bf16.mxu0 %v2417_v0 }
 0x2c8   :  { %1997 = vmatpush3.bf16.msra.mxu0 %v2127_v22  ;;  %v1836_v22 = vcombine.high %v1135_v20, %v1139_v21 }
 0x2c9   :  { %2022 = vmatprep.subr.bf16.mxu0 %v2417_v0 }
 0x37e   :  { %v606_v10 = vpop.f32.mrb[4].mxu0 }
 0x37f   :  { %v607_v11 = vadd.f32 %v1759_v9, %v606_v10  ;;  %v1980_v12 = vpop.f32.mrb[5].mxu0  ;;  %v1812_v9 = vcombine.high %v1111_v4, %v1115_v5  ;;  %v1116_v10 = vld [vmem:[#allocation18 + $0x28] sm:$0xff] }
 0x380   :  { %v609_v13 = vpop.f32.mrb[6].mxu0  ;;  %v1123_v12 = vld [vmem:[#allocation18 + $0x60] sm:$0xff]  ;;  %v1164_v4 = vld [vmem:[#allocation18 + $0x1a8] sm:$0xff] }
 0x381   :  { %v612_v14 = vmax.f32 %v607_v11, 0.0  ;;  %v1981_v15 = vpop.f32.mrb[7].mxu0  ;;  %v1119_v11 = vld [vmem:[#allocation18 + $0x40] sm:$0xff]  ;;  %v1813_v13 = vcombine.low %v1112_v7, %v1116_v10 }
 0x382   :  { %v1820_v15 = vcombine.high %v1119_v11, %v1123_v12 }
 0x383   :  { %v613_v16 = vpack.c.bf16 %v612_v14, %v612_v14  ;;  %v1814_v14 = vcombine.high %v1112_v7, %v1116_v10  ;;  %v1171_v10 = vld [vmem:[#allocation18 + $0x1e0] sm:$0xff] }
 0x385   :  { %755 = vmatmul.mubr.bf16.vlgmr.msra.gmra.mrb[4].mxu1 %v613_v16  ;;  %v1819_v16 = vcombine.low %v1119_v11, %v1123_v12  ;;  %v1168_v11 = vld [vmem:[#allocation18 + $0x1c8] sm:$0xff] }
 0x386   :  { %2018 = vmatprep.mubr.msk.bf16.mxu1 %vm2418_vm0, %v2417_v0  ;;  %2003 = vmatpush3.bf16.msra.mxu1 %v2128_v23  ;;  %v1835_v23 = vcombine.low %v1135_v20, %v1139_v21  ;;  %v1118_v20 = vld [vmem:[#allocation18 + $0x38] sm:$0xff] }
 0x387   :  { %2004 = vmatprep.subr.bf16.mxu1 %v2417_v0 }
 0x38a   :  { %2005 = vmatpush3.bf16.msra.mxu1 %v2129_v24  ;;  %v1143_v24 = vld [vmem:[#allocation18 + $0x100] sm:$0xff] }
 0x38b   :  { %2006 = vmatprep.subr.bf16.mxu1 %v2417_v0 }
 0x38e   :  { %2007 = vmatpush3.bf16.msra.mxu1 %v2130_v25  ;;  %v1147_v25 = vld [vmem:[#allocation18 + $0x120] sm:$0xff] }
 0x38f   :  { %2008 = vmatprep.subr.bf16.mxu1 %v2417_v0 }
 0x392   :  { %2009 = vmatpush3.bf16.msra.mxu1 %v2131_v26  ;;  %v1844_v26 = vcombine.high %v1143_v24, %v1147_v25 }
 0x393   :  { %2010 = vmatprep.subr.bf16.mxu1 %v2417_v0 }
 0x396   :  { %2011 = vmatpush3.bf16.msra.mxu1 %v2132_v27  ;;  %v1843_v27 = vcombine.low %v1143_v24, %v1147_v25  ;;  %v1802_v24 = vld [vmem:[#allocation16] ss:$0 sm:$0xff] }
 0x397   :  { %2012 = vmatprep.subr.bf16.mxu1 %v2417_v0 }
 0x39a   :  { %2013 = vmatpush3.bf16.msra.mxu1 %v2133_v28  ;;  %v1151_v28 = vld [vmem:[#allocation18 + $0x140] sm:$0xff] }
 0x39b   :  { %2014 = vmatprep.subr.bf16.mxu1 %v2417_v0  ;;  %v1852_v32 = vcombine.high %v1151_v28, %v1155_v29 }
 0x39e   :  { %2015 = vmatpush3.bf16.msra.mxu1 %v2134_v49 }
 0x39f   :  { %2016 = vmatprep.subr.bf16.mxu1 %v2417_v0 }
 0x3a2   :  { %2017 = vmatpush3.bf16.msra.mxu1 %v2135_v50  ;;  %v1128_v50 = vld [vmem:[#allocation18 + $0x88] sm:$0xff] }
 0x3a3   :  { %1537 = vmatprep.subr.bf16.mxu1 %v1812_v9  ;;  %v1167_v9 = vld [vmem:[#allocation18 + $0x1c0] sm:$0xff] }
 0x3a4   :  { %v1868_v12 = vcombine.high %v1167_v9, %v1171_v10 }
 0x458   :  { %v756_v36 = vpop.f32.mrb[4].mxu1 }
 0x459   :  { %v757_v37 = vadd.f32 %v756_v36, %v635_v34  ;;  %v758_v38 = vpop.f32.mrb[5].mxu1  ;;  %v1851_v34 = vcombine.low %v1151_v28, %v1155_v29  ;;  %v1163_v36 = vld [vmem:[#allocation18 + $0x1a0] sm:$0xff]  ;;  %v1121_v28 = vld [vmem:[#allocation18 + $0x50] sm:$0xff] }
 0x45a   :  { %v759_v39 = vadd.f32 %v758_v38, %v639_v35  ;;  %v760_v40 = vpop.f32.mrb[6].mxu1  ;;  %v1159_v35 = vld [vmem:[#allocation18 + $0x180] sm:$0xff] }
 0x45b   :  { %763 = vst [vmem:[%s2889_s19] sm:$0xff] %v757_v37  ;;  %v761_v41 = vpop.f32.mrb[7].mxu1  ;;  %v1859_v38 = vcombine.low %v1159_v35, %v1163_v36 }
 0x45c   :  { %764 = vst [vmem:[%s2889_s19 + $0x8] sm:$0xff] %v759_v39  ;;  %v766_v42 = vmul.f32 0.5, %v759_v39  ;;  %v1793_v39 = vld [vmem:[#allocation13] ss:$0 sm:$0xff] }
 0x45e   :  { %v767_v43 = vmul.f32 1.442695, %v766_v42 }
 0x460   :  { %2144 = vpow2.f32 %v767_v43 }
 0x46a   :  { %v2145_v45 = vpop.eup %2144 }
 0x46b   :  { %v769_v46 = vmul.f32 %v2145_v45, %v765_v44  ;;  %v1120_v44 = vld [vmem:[#allocation18 + $0x48] sm:$0xff] }
 0x46c   :  { %v1124_v45 = vld [vmem:[#allocation18 + $0x68] sm:$0xff] }
 0x46d   :  { %v770_v47 = vadd.f32 %v769_v46, %v757_v37  ;;  %v1860_v37 = vcombine.high %v1159_v35, %v1163_v36  ;;  %v1822_v49 = vcombine.high %v1120_v44, %v1124_v45  ;;  %v1126_v35 = vld [vmem:[#allocation18 + $0x78] sm:$0xff] }
 0x46f   :  { %v771_v48 = vpack.c.bf16 %v770_v47, %v770_v47 }
 0x471   :  { %1999 = vmatmul.mubr.bf16.vlgmr.msra.gmra.mrb[8].mxu0 %v771_v48 }
 0x472   :  { %2038 = vmatprep.mubr.msk.bf16.mxu0 %vm2418_vm0, %v2417_v0  ;;  %2023 = vmatpush3.bf16.msra.mxu0 %v2136_v51  ;;  %v1132_v51 = vld [vmem:[#allocation18 + $0xa8] sm:$0xff] }
 0x473   :  { %2024 = vmatprep.subr.bf16.mxu0 %v2417_v0 }
 0x476   :  { %2025 = vmatpush3.bf16.msra.mxu0 %v2137_v52  ;;  %v1821_v52 = vcombine.low %v1120_v44, %v1124_v45  ;;  %v1134_v44 = vld [vmem:[#allocation18 + $0xb8] sm:$0xff] }
 0x477   :  { %2026 = vmatprep.subr.bf16.mxu0 %v2417_v0 }
 0x47a   :  { %2027 = vmatpush3.bf16.msra.mxu0 %v2138_v53  ;;  %v1830_v53 = vcombine.high %v1128_v50, %v1132_v51 }
 0x47b   :  { %2028 = vmatprep.subr.bf16.mxu0 %v2417_v0 }
 0x47e   :  { %2029 = vmatpush3.bf16.msra.mxu0 %v2139_v54  ;;  %v1136_v54 = vld [vmem:[#allocation18 + $0xc8] sm:$0xff] }
 0x47f   :  { %2030 = vmatprep.subr.bf16.mxu0 %v2417_v0 }
 0x482   :  { %2031 = vmatpush3.bf16.msra.mxu0 %v2140_v55  ;;  %v1140_v55 = vld [vmem:[#allocation18 + $0xe8] sm:$0xff] }
 0x483   :  { %2032 = vmatprep.subr.bf16.mxu0 %v2417_v0 }
 0x486   :  { %2033 = vmatpush3.bf16.msra.mxu0 %v2141_v56  ;;  %v1829_v56 = vcombine.low %v1128_v50, %v1132_v51  ;;  %v1141_v50 = vld [vmem:[#allocation18 + $0xf0] sm:$0xff]  ;;  %v1138_v51 = vld [vmem:[#allocation18 + $0xd8] sm:$0xff] }
 0x487   :  { %2034 = vmatprep.subr.bf16.mxu0 %v2417_v0 }
 0x48a   :  { %2035 = vmatpush3.bf16.msra.mxu0 %v2142_v2 }
 0x48b   :  { %2036 = vmatprep.subr.bf16.mxu0 %v2417_v0  ;;  %v1131_v0 = vld [vmem:[#allocation18 + $0xa0] sm:$0xff] }
 0x48c   :  { %v1828_v18 = vcombine.high %v1127_v17, %v1131_v0  ;;  %v1827_v19 = vcombine.low %v1127_v17, %v1131_v0  ;;  %v1113_v17 = vld [vmem:[#allocation18 + $0x10] sm:$0xff] }
 0x48d   :  { %v1117_v0 = vld [vmem:[#allocation18 + $0x30] sm:$0xff] }
 0x48e   :  { %2037 = vmatpush3.bf16.msra.mxu0 %v2143_v3  ;;  %v1160_v3 = vld [vmem:[#allocation18 + $0x188] sm:$0xff]  ;;  %v1815_v21 = vcombine.low %v1113_v17, %v1117_v0 }
 0x48f   :  { %1578 = vmatprep.subr.bf16.mxu0 %v1814_v14  ;;  %v1862_v7 = vcombine.high %v1160_v3, %v1164_v4  ;;  %v1867_v14 = vcombine.low %v1167_v9, %v1171_v10  ;;  %v1161_v10 = vld [vmem:[#allocation18 + $0x190] sm:$0xff] }
 0x544   :  { %v877_v58 = vpop.f32.mrb[8].mxu0 }
 0x545   :  { %v878_v59 = vadd.f32 %v1784_v57, %v877_v58  ;;  %v2000_v60 = vpop.f32.mrb[9].mxu0  ;;  %v1838_v57 = vcombine.high %v1136_v54, %v1140_v55  ;;  %v1144_v58 = vld [vmem:[#allocation18 + $0x108] sm:$0xff] }
 0x546   :  { %v880_v61 = vpop.f32.mrb[10].mxu0  ;;  %v1837_v60 = vcombine.low %v1136_v54, %v1140_v55 }
 0x547   :  { %v883_v62 = vmax.f32 %v878_v59, 0.0  ;;  %v2001_v63 = vpop.f32.mrb[11].mxu0  ;;  %v1148_v59 = vld [vmem:[#allocation18 + $0x128] sm:$0xff] }
 0x548   :  { %v1846_v61 = vcombine.high %v1144_v58, %v1148_v59  ;;  %v1156_v63 = vld [vmem:[#allocation18 + $0x168] sm:$0xff] }
 0x549   :  { %v884_v1 = vpack.c.bf16 %v883_v62, %v883_v62  ;;  %v1152_v62 = vld [vmem:[#allocation18 + $0x148] sm:$0xff] }
 0x54a   :  { %v1854_v2 = vcombine.high %v1152_v62, %v1156_v63  ;;  %v1853_v5 = vcombine.low %v1152_v62, %v1156_v63 }
 0x54b   :  { %2019 = vmatmul.mubr.bf16.vlgmr.msra.gmra.mrb[8].mxu1 %v884_v1  ;;  %v1845_v1 = vcombine.low %v1144_v58, %v1148_v59  ;;  %v1149_v58 = vld [vmem:[#allocation18 + $0x130] sm:$0xff]  ;;  %v1146_v59 = vld [vmem:[#allocation18 + $0x118] sm:$0xff] }
 0x54c   :  { %1569 = vmatprep.mubr.bf16.mxu1 %v2419_v6  ;;  %1538 = vmatpush1.bf16.msra.mxu1 %v1811_v8  ;;  %v1861_v8 = vcombine.low %v1160_v3, %v1164_v4  ;;  %v1154_v3 = vld [vmem:[#allocation18 + $0x158] sm:$0xff] }
 0x54d   :  { %1539 = vmatprep.subr.bf16.mxu1 %v1820_v15  ;;  %v1158_v4 = vld [vmem:[#allocation18 + $0x178] sm:$0xff] }
 0x54e   :  { %v1858_v9 = vcombine.high %v1154_v3, %v1158_v4 }
 0x550   :  { %1540 = vmatpush1.bf16.msra.mxu1 %v1819_v16 }
 0x551   :  { %1541 = vmatprep.subr.bf16.mxu1 %v1828_v18  ;;  %v1114_v18 = vld [vmem:[#allocation18 + $0x18] sm:$0xff] }
 0x554   :  { %1542 = vmatpush1.bf16.msra.mxu1 %v1827_v19  ;;  %v1816_v19 = vcombine.high %v1113_v17, %v1117_v0  ;;  %v1169_v0 = vld [vmem:[#allocation18 + $0x1d0] sm:$0xff] }
 0x555   :  { %1543 = vmatprep.subr.bf16.mxu1 %v1836_v22  ;;  %v1817_v22 = vcombine.low %v1114_v18, %v1118_v20 }
 0x558   :  { %1544 = vmatpush1.bf16.msra.mxu1 %v1835_v23  ;;  %v1818_v23 = vcombine.high %v1114_v18, %v1118_v20  ;;  %v1173_v18 = vld [vmem:[#allocation18 + $0x1f0] sm:$0xff]  ;;  %v1174_v20 = vld [vmem:[#allocation18 + $0x1f8] sm:$0xff] }
 0x559   :  { %1545 = vmatprep.subr.bf16.mxu1 %v1844_v26 }
 0x55c   :  { %1546 = vmatpush1.bf16.msra.mxu1 %v1843_v27 }
 0x55d   :  { %1547 = vmatprep.subr.bf16.mxu1 %v1852_v32  ;;  %v1125_v32 = vld [vmem:[#allocation18 + $0x70] sm:$0xff] }
 0x55e   :  { %v1823_v45 = vcombine.low %v1121_v28, %v1125_v32 }
 0x560   :  { %1548 = vmatpush1.bf16.msra.mxu1 %v1851_v34  ;;  %v1122_v34 = vld [vmem:[#allocation18 + $0x58] sm:$0xff] }
 0x561   :  { %1549 = vmatprep.subr.bf16.mxu1 %v1860_v37 }
 0x564   :  { %1550 = vmatpush1.bf16.msra.mxu1 %v1859_v38 }
 0x565   :  { %1551 = vmatprep.subr.bf16.mxu1 %v1868_v12  ;;  %v1162_v12 = vld [vmem:[#allocation18 + $0x198] sm:$0xff] }
 0x568   :  { %1552 = vmatpush1.bf16.msra.mxu1 %v1867_v14 }
 0x569   :  { %1619 = vmatprep.subr.bf16.mxu1 %v1816_v19  ;;  %v1170_v19 = vld [vmem:[#allocation18 + $0x1d8] sm:$0xff] }
 0x61e   :  { %v990_v40 = vpop.f32.mrb[8].mxu1 }
 0x61f   :  { %v991_v41 = vadd.f32 %v1793_v39, %v990_v40  ;;  %v2020_v42 = vpop.f32.mrb[9].mxu1  ;;  %v1824_v39 = vcombine.high %v1121_v28, %v1125_v32  ;;  %v1826_v40 = vcombine.high %v1122_v34, %v1126_v35  ;;  %v1175_v28 = vld [vmem:[%s2887_s17] sm:$0xff] }
 0x620   :  { %v993_v43 = vpop.f32.mrb[10].mxu1  ;;  %v1133_v42 = vld [vmem:[#allocation18 + $0xb0] sm:$0xff]  ;;  %v1180_v32 = vrot.slane %v1175_v28, %v634_v31 }
 0x621   :  { %v996_v46 = vmax.f32 %v991_v41, 0.0  ;;  %v2021_v47 = vpop.f32.mrb[11].mxu1  ;;  %v1129_v41 = vld [vmem:[#allocation18 + $0x90] sm:$0xff]  ;;  %v1130_v43 = vld [vmem:[#allocation18 + $0x98] sm:$0xff] }
 0x622   :  { %v1832_v47 = vcombine.high %v1129_v41, %v1133_v42  ;;  %v1833_v54 = vcombine.low %v1130_v43, %v1134_v44 }
 0x623   :  { %v997_v48 = vpack.c.bf16 %v996_v46, %v996_v46  ;;  %v1825_v46 = vcombine.low %v1122_v34, %v1126_v35  ;;  %v1184_v35 = vrot.slane %v1175_v28, %v638_v33  ;;  %v1195_v33 = vsub.s32 4, %v2793_v30 }
 0x625   :  { %2039 = vmatmul.mubr.bf16.vlgmr.msra.gmra.mrb[12].mxu0 %v997_v48  ;;  %v1834_v48 = vcombine.high %v1130_v43, %v1134_v44 }
 0x626   :  { %1579 = vmatpush1.bf16.msra.mxu0 %v1813_v13  ;;  %1610 = vmatprep.mubr.bf16.mxu0 %v2419_v6  ;;  %v1172_v13 = vld [vmem:[#allocation18 + $0x1e8] sm:$0xff] }
 0x627   :  { %1580 = vmatprep.subr.bf16.mxu0 %v1822_v49  ;;  %v1869_v15 = vcombine.low %v1168_v11, %v1172_v13  ;;  %v1870_v16 = vcombine.high %v1168_v11, %v1172_v13  ;;  %v1137_v49 = vld [vmem:[#allocation18 + $0xd0] sm:$0xff]  ;;  %v1166_v13 = vld [vmem:[#allocation18 + $0x1b8] sm:$0xff] }
 0x628   :  { %v1840_v55 = vcombine.high %v1137_v49, %v1141_v50  ;;  %v1165_v11 = vld [vmem:[#allocation18 + $0x1b0] sm:$0xff]  ;;  %v1866_v17 = vcombine.high %v1162_v12, %v1166_v13 }
 0x62a   :  { %1581 = vmatpush1.bf16.msra.mxu0 %v1821_v52  ;;  %v1142_v52 = vld [vmem:[#allocation18 + $0xf8] sm:$0xff] }
 0x62b   :  { %1582 = vmatprep.subr.bf16.mxu0 %v1830_v53  ;;  %v1831_v53 = vcombine.low %v1129_v41, %v1133_v42  ;;  %v1841_v62 = vcombine.low %v1138_v51, %v1142_v52 }
 0x62e   :  { %1583 = vmatpush1.bf16.msra.mxu0 %v1829_v56  ;;  %v1842_v56 = vcombine.high %v1138_v51, %v1142_v52  ;;  %v1203_v52 = vsub.s32 6, %v2793_v30 }
 0x62f   :  { %1584 = vmatprep.subr.bf16.mxu0 %v1838_v57  ;;  %v1145_v57 = vld [vmem:[#allocation18 + $0x110] sm:$0xff] }
 0x630   :  { %v1848_v63 = vcombine.high %v1145_v57, %v1149_v58 }
 0x632   :  { %1585 = vmatpush1.bf16.msra.mxu0 %v1837_v60  ;;  %v1150_v60 = vld [vmem:[#allocation18 + $0x138] sm:$0xff] }
 0x633   :  { %1586 = vmatprep.subr.bf16.mxu0 %v1846_v61  ;;  %v1839_v61 = vcombine.low %v1137_v49, %v1141_v50 }
 0x636   :  { %1587 = vmatpush1.bf16.msra.mxu0 %v1845_v1  ;;  %v1153_v1 = vld [vmem:[#allocation18 + $0x150] sm:$0xff] }
 0x637   :  { %1588 = vmatprep.subr.bf16.mxu0 %v1854_v2  ;;  %v1157_v2 = vld [vmem:[#allocation18 + $0x170] sm:$0xff] }
 0x638   :  { %v1855_v14 = vcombine.low %v1153_v1, %v1157_v2 }
 0x63a   :  { %1589 = vmatpush1.bf16.msra.mxu0 %v1853_v5  ;;  %v1847_v5 = vcombine.low %v1145_v57, %v1149_v58 }
 0x63b   :  { %1590 = vmatprep.subr.bf16.mxu0 %v1862_v7  ;;  %v1849_v7 = vcombine.low %v1146_v59, %v1150_v60 }
 0x63e   :  { %1591 = vmatpush1.bf16.msra.mxu0 %v1861_v8  ;;  %v1856_v8 = vcombine.high %v1153_v1, %v1157_v2 }
 0x63f   :  { %1592 = vmatprep.subr.bf16.mxu0 %v1870_v16  ;;  %v1864_v16 = vcombine.high %v1161_v10, %v1165_v11 }
 0x642   :  { %1593 = vmatpush1.bf16.msra.mxu0 %v1869_v15  ;;  %v1857_v15 = vcombine.low %v1154_v3, %v1158_v4 }
 0x643   :  { %1660 = vmatprep.subr.bf16.mxu0 %v1818_v23  ;;  %v1872_v23 = vcombine.high %v1169_v0, %v1173_v18 }
 0x6f8   :  { %v1103_v25 = vpop.f32.mrb[12].mxu0 }
 0x6f9   :  { %v1104_v26 = vadd.f32 %v1802_v24, %v1103_v25  ;;  %v2040_v27 = vpop.f32.mrb[13].mxu0  ;;  %v1874_v24 = vcombine.high %v1170_v19, %v1174_v20  ;;  %v1871_v25 = vcombine.low %v1169_v0, %v1173_v18 }
 0x6fa   :  { %v1106_v29 = vpop.f32.mrb[14].mxu0  ;;  %v1187_v27 = vsub.s32 2, %v2793_v30 }
 0x6fb   :  { %v1109_v36 = vmax.f32 %v1104_v26, 0.0  ;;  %v2041_v37 = vpop.f32.mrb[15].mxu0  ;;  %v1873_v26 = vcombine.low %v1170_v19, %v1174_v20  ;;  %v1191_v29 = vsub.s32 3, %v2793_v30 }
 0x6fc   :  { %v1188_v34 = vrot.slane %v1175_v28, %v1187_v27 }
 0x6fd   :  { %v2825_v38 = vpack.c.bf16 %v1109_v36, %v1109_v36  ;;  %v1192_v36 = vrot.slane %v1175_v28, %v1191_v29 }
 0x6ff   :  { %1570 = vmatmul.mubr.bf16.vlgmr.msra.gmra.mrb[12].mxu1 %v2825_v38  ;;  %1611 = vmatmul.mubr.bf16.vlgmr.msra.gmra.mrb[16].mxu0 %v2825_v38 }
 0x700   :  { %1620 = vmatpush1.bf16.msra.mxu1 %v1815_v21  ;;  %1661 = vmatpush1.bf16.msra.mxu0 %v1817_v22  ;;  %v1863_v21 = vcombine.low %v1161_v10, %v1165_v11  ;;  %v1865_v22 = vcombine.low %v1162_v12, %v1166_v13 }
 0x701   :  { %1621 = vmatprep.subr.bf16.mxu1 %v1824_v39  ;;  %1662 = vmatprep.subr.bf16.mxu0 %v1826_v40 }
 0x702   :  { %1651 = vmatprep.mubr.bf16.mxu1 %v2419_v6  ;;  %1692 = vmatprep.mubr.bf16.mxu0 %v2419_v6  ;;  %v1850_v6 = vcombine.high %v1146_v59, %v1150_v60 }
 0x704   :  { %1622 = vmatpush1.bf16.msra.mxu1 %v1823_v45  ;;  %1663 = vmatpush1.bf16.msra.mxu0 %v1825_v46 }
 0x705   :  { %1623 = vmatprep.subr.bf16.mxu1 %v1832_v47  ;;  %1664 = vmatprep.subr.bf16.mxu0 %v1834_v48 }
 0x708   :  { %1624 = vmatpush1.bf16.msra.mxu1 %v1831_v53  ;;  %1665 = vmatpush1.bf16.msra.mxu0 %v1833_v54  ;;  %v1199_v53 = vsub.s32 5, %v2793_v30  ;;  %v1207_v54 = vsub.s32 7, %v2793_v30 }
 0x709   :  { %1625 = vmatprep.subr.bf16.mxu1 %v1840_v55  ;;  %1666 = vmatprep.subr.bf16.mxu0 %v1842_v56  ;;  %v1196_v55 = vrot.slane %v1175_v28, %v1195_v33  ;;  %v1204_v56 = vrot.slane %v1175_v28, %v1203_v52 }
 0x70a   :  { %v1200_v57 = vrot.slane %v1175_v28, %v1199_v53  ;;  %v1208_v58 = vrot.slane %v1175_v28, %v1207_v54 }
 0x70c   :  { %1626 = vmatpush1.bf16.msra.mxu1 %v1839_v61  ;;  %1667 = vmatpush1.bf16.msra.mxu0 %v1841_v62 }
 0x70d   :  { %1627 = vmatprep.subr.bf16.mxu1 %v1848_v63  ;;  %1668 = vmatprep.subr.bf16.mxu0 %v1850_v6 }
 0x710   :  { %1628 = vmatpush1.bf16.msra.mxu1 %v1847_v5  ;;  %1669 = vmatpush1.bf16.msra.mxu0 %v1849_v7 }
 0x711   :  { %1629 = vmatprep.subr.bf16.mxu1 %v1856_v8  ;;  %1670 = vmatprep.subr.bf16.mxu0 %v1858_v9 }
 0x714   :  { %1630 = vmatpush1.bf16.msra.mxu1 %v1855_v14  ;;  %1671 = vmatpush1.bf16.msra.mxu0 %v1857_v15 }
 0x715   :  { %1631 = vmatprep.subr.bf16.mxu1 %v1864_v16  ;;  %1672 = vmatprep.subr.bf16.mxu0 %v1866_v17 }
 0x718   :  { %1632 = vmatpush1.bf16.msra.mxu1 %v1863_v21  ;;  %1673 = vmatpush1.bf16.msra.mxu0 %v1865_v22 }
 0x719   :  { %1633 = vmatprep.subr.bf16.mxu1 %v1872_v23  ;;  %1674 = vmatprep.subr.bf16.mxu0 %v1874_v24 }
 0x71c   :  { %1634 = vmatpush1.bf16.msra.mxu1 %v1871_v25  ;;  %1675 = vmatpush1.bf16.msra.mxu0 %v1873_v26 }
 0x71f   :  { %1652 = vmatmul.mubr.bf16.vlgmr.msra.gmra.mrb[16].mxu1 %v2825_v38  ;;  %1693 = vmatmul.mubr.bf16.vlgmr.msra.gmra.mrb[20].mxu0 %v2825_v38 }
 0x7d2   :  { %v1571_v37 = vpop.f32.mrb[12].mxu1  ;;  %v1612_v39 = vpop.f32.mrb[16].mxu0 }
 0x7d3   :  { %v1572_v40 = vadd.f32 %v1571_v37, %v1180_v32  ;;  %v1613_v38 = vadd.f32 %v1612_v39, %v1188_v34  ;;  %v1573_v41 = vpop.f32.mrb[13].mxu1  ;;  %v1614_v42 = vpop.f32.mrb[17].mxu0 }
 0x7d4   :  { %v1574_v43 = vadd.f32 %v1573_v41, %v1184_v35  ;;  %v1615_v44 = vadd.f32 %v1614_v42, %v1192_v36  ;;  %v1575_v45 = vpop.f32.mrb[14].mxu1  ;;  %v1616_v46 = vpop.f32.mrb[18].mxu0 }
 0x7d5   :  { %v1701_v47 = vmax.f32 %v1572_v40, 0.0  ;;  %v1703_v48 = vmax.f32 %v1613_v38, 0.0  ;;  %v1576_v49 = vpop.f32.mrb[15].mxu1  ;;  %v1617_v50 = vpop.f32.mrb[19].mxu0 }
 0x7d6   :  { %v1702_v31 = vmax.f32 %v1574_v43, 0.0  ;;  %v1704_v51 = vmax.f32 %v1615_v44, 0.0 }
 0x7d7   :  { %1709 = vst [vmem:[%s2888_s18] sm:$0xff] %v1701_v47  ;;  %1711 = vst [vmem:[%s2888_s18 + $0x10] sm:$0xff] %v1703_v48 }
 0x7d8   :  { %1710 = vst [vmem:[%s2888_s18 + $0x8] sm:$0xff] %v1702_v31  ;;  %1712 = vst [vmem:[%s2888_s18 + $0x18] sm:$0xff] %v1704_v51 }
 0x7f2   :  { %v1653_v59 = vpop.f32.mrb[16].mxu1  ;;  %v1694_v60 = vpop.f32.mrb[20].mxu0 }
 0x7f3   :  { %v1654_v61 = vadd.f32 %v1653_v59, %v1196_v55  ;;  %v1695_v62 = vadd.f32 %v1694_v60, %v1204_v56  ;;  %v1655_v63 = vpop.f32.mrb[17].mxu1  ;;  %v1696_v6 = vpop.f32.mrb[21].mxu0 }
 0x7f4   :  { %v1656_v1 = vadd.f32 %v1655_v63, %v1200_v57  ;;  %v1697_v2 = vadd.f32 %v1696_v6, %v1208_v58  ;;  %v1657_v3 = vpop.f32.mrb[18].mxu1  ;;  %v1698_v4 = vpop.f32.mrb[22].mxu0 }
 0x7f5   :  { %v1705_v5 = vmax.f32 %v1654_v61, 0.0  ;;  %v1707_v7 = vmax.f32 %v1695_v62, 0.0  ;;  %v1658_v8 = vpop.f32.mrb[19].mxu1  ;;  %v1699_v9 = vpop.f32.mrb[23].mxu0 }
 0x7f6   :  { %v1706_v10 = vmax.f32 %v1656_v1, 0.0  ;;  %v1708_v30 = vmax.f32 %v1697_v2, 0.0 }
 0x7f7   :  { %1713 = vst [vmem:[%s2888_s18 + $0x20] sm:$0xff] %v1705_v5  ;;  %1715 = vst [vmem:[%s2888_s18 + $0x30] sm:$0xff] %v1707_v7 }
 0x7f8   :  { %1714 = vst [vmem:[%s2888_s18 + $0x28] sm:$0xff] %v1706_v10  ;;  %1716 = vst [vmem:[%s2888_s18 + $0x38] sm:$0xff] %v1708_v30 }
 0x7f9   :  { %1725 = vsyncpa [#allocation3], 1 }
 0x7fa   :  { %1726 = vsyncpa [#allocation5], 1 }
 0x7fb   :  { %1727 = vsyncpa [#allocation8], 1 }
 0x7fc   :  { %1728 = vsyncpa [#allocation11], 1 }
 0x7fd   :  { %1729 = vsyncpa [#allocation14], 1 }
 0x7fe   :  { %1730 = vsyncpa [#allocation17], 1 }

// kernel: vae_forward.1
= control target key start
LH: loop header
LB: loop body
LE: loop exit
PB: predicated region body
PF: predicated region fallthrough
CT: control target
= control target key end

     0   :  { %s2870_s0 = inlined_call_operand.vmem [shape: bf16[8,256], index: 0, kind: input, shape index: {}]   ;;  %s2871_s1 = inlined_call_operand.vmem [shape: f32[8,128], index: 1, kind: input, shape index: {}]   ;;  %s2872_s2 = inlined_call_operand.vmem [shape: bf16[256,128], index: 2, kind: input, shape index: {}]   ;;  %s2873_s3 = inlined_call_operand.vmem [shape: f32[1,128], index: 3, kind: input, shape index: {}]   ;;  %s2874_s4 = inlined_call_operand.hbm [shape: bf16[128,128], index: 4, kind: input, shape index: {}]   ;;  %s2875_s5 = inlined_call_operand.vmem [shape: f32[1,128], index: 5, kind: input, shape index: {}]   ;;  %s2876_s6 = inlined_call_operand.hbm [shape: bf16[128,128], index: 6, kind: input, shape index: {}]   ;;  %s2877_s7 = inlined_call_operand.hbm [shape: f32[1,128], index: 7, kind: input, shape index: {}]   ;;  %s2878_s8 = inlined_call_operand.hbm [shape: bf16[128,256], index: 8, kind: input, shape index: {}]   ;;  %s2879_s9 = inlined_call_operand.vmem [shape: f32[1,256], index: 9, kind: input, shape index: {}]   ;;  %s2880_s10 = inlined_call_operand.hbm [shape: bf16[128,128], index: 10, kind: input, shape index: {}]   ;;  %s2881_s11 = inlined_call_operand.hbm [shape: f32[1,128], index: 11, kind: input, shape index: {}]   ;;  %s2882_s12 = inlined_call_operand.hbm [shape: bf16[128,128], index: 12, kind: input, shape index: {}]   ;;  %s2883_s13 = inlined_call_operand.hbm [shape: f32[1,128], index: 13, kind: input, shape index: {}]   ;;  %s2884_s14 = inlined_call_operand.hbm [shape: bf16[128,128], index: 14, kind: input, shape index: {}]   ;;  %s2885_s15 = inlined_call_operand.hbm [shape: f32[1,128], index: 15, kind: input, shape index: {}]   ;;  %s2886_s16 = inlined_call_operand.hbm [shape: bf16[128,1024], index: 16, kind: input, shape index: {}]   ;;  %s2887_s17 = inlined_call_operand.vmem [shape: f32[1,1024], index: 17, kind: input, shape index: {}]   ;;  %s2888_s18 = inlined_call_operand.vmem [shape: f32[8,1024], index: 18, kind: output, shape index: {0}]   ;;  %s2889_s19 = inlined_call_operand.vmem [shape: f32[8,256], index: 19, kind: output, shape index: {1}]  }
   0x1   :  { %2895 = sst [smem:[#allocation25_spill]] %s2870_s0 }
   0x2   :  { %2896 = sst [smem:[#allocation26_spill]] %s2871_s1 }
   0x3   :  { %2897 = sst [smem:[#allocation27_spill]] %s2872_s2 }
   0x4   :  { %2898 = sst [smem:[#allocation28_spill]] %s2873_s3 }
   0x5   :  { %25 = vsyncpa [#allocation3], 0 }
   0x6   :  { %26 = vsyncpa [#allocation5], 0 }
   0x7   :  { %27 = vsyncpa [#allocation8], 0 }
   0x8   :  { %28 = vsyncpa [#allocation11], 0 }
   0x9   :  { %29 = vsyncpa [#allocation14], 0 }
   0xa   :  { %30 = vsyncpa [#allocation17], 0  ;;  %s2400_s0 = smov [#allocation4]   ;;  %s2401_s20 = smov [#allocation7]  }
   0xb   :  { %s58_s30 = sshll.u32 %s2400_s0, 4  ;;  %s80_s21 = sshll.u32 %s2401_s20, 4  ;;  %s59_s30 = int_to_ptr.vmem [resolvable:$true] %s58_s30  ;;  %s2520_s21 = int_to_ptr.vmem [resolvable:$true] %s80_s21 }
   0xc   :  { %s2146_s2 = scalar_lea.hbm %s2876_s6, 1024 }
   0xd   :  { %p2147_p0 = scmp.ne.s32.totalorder %s2876_s6, %s2146_s2  ;;  %p2150_p1 = scmp.lt.u32.totalorder %s2146_s2, %s2876_s6 }
   0xf   :  { %p2152_p2 = pnand %p2150_p1, %p2147_p0 }
  0x11   :  { %2155 = shalt.err (!%p2152_p2)
}
  0x12   :  { %s2156_s26 = scalar_lea.vmem %s59_s30, 1024  ;;  %p2161_p4 = scmp.lt.s32.totalorder %s59_s30, %s59_s30 }
  0x13   :  { %p2157_p3 = scmp.ne.s32.totalorder %s59_s30, %s2156_s26  ;;  %p2162_p5 = scmp.lt.s32.totalorder %s2156_s26, %s2156_s26 }
  0x15   :  { %p2163_p6 = por %p2162_p5, %p2161_p4 }
  0x17   :  { %p2164_p7 = pnand %p2163_p6, %p2157_p3 }
  0x19   :  { %2167 = shalt.err (!%p2164_p7)
}
  0x1a   :  { %s2891_s27 = smov 64   ;;  %s2893_s28 = smov 4  }
  0x1b   :  { %64 = dma.hbm_to_vmem [thread:$0]  %s2876_s6, 1024, %s59_s30, [#allocation5], %s2891_s27, %s2891_s27, %s2893_s28  }
  0x1c   :  { %s2168_s22 = scalar_lea.hbm %s2878_s8, 2048 }
  0x1d   :  { %p2169_p8 = scmp.ne.s32.totalorder %s2878_s8, %s2168_s22  ;;  %p2172_p9 = scmp.lt.u32.totalorder %s2168_s22, %s2878_s8 }
  0x1f   :  { %p2174_p10 = pnand %p2172_p9, %p2169_p8 }
  0x21   :  { %2177 = shalt.err (!%p2174_p10)
}
  0x22   :  { %s2178_s3 = scalar_lea.vmem %s2520_s21, 2048  ;;  %p2183_p12 = scmp.lt.s32.totalorder %s2520_s21, %s2520_s21 }
  0x23   :  { %p2179_p11 = scmp.ne.s32.totalorder %s2520_s21, %s2178_s3  ;;  %p2184_p13 = scmp.lt.s32.totalorder %s2178_s3, %s2178_s3 }
  0x25   :  { %p2185_p0 = por %p2184_p13, %p2183_p12 }
  0x27   :  { %p2186_p1 = pnand %p2185_p0, %p2179_p11 }
  0x29   :  { %2189 = shalt.err (!%p2186_p1)
}
  0x2a   :  { %s2404_s6 = smov 128   ;;  %s2405_s30 = smov 8  }
  0x2b   :  { %86 = dma.hbm_to_vmem [thread:$0]  %s2878_s8, 2048, %s2520_s21, [#allocation8], %s2404_s6, %s2404_s6, %s2405_s30  }
  0x2c   :  { %s2406_s0 = smov [#allocation10]   ;;  %s2407_s1 = smov [#allocation13]  }
  0x2d   :  { %s107_s20 = sshll.u32 %s2406_s0, 4  ;;  %s129_s22 = sshll.u32 %s2407_s1, 4  ;;  %s108_s20 = int_to_ptr.vmem [resolvable:$true] %s107_s20  ;;  %s130_s22 = int_to_ptr.vmem [resolvable:$true] %s129_s22 }
  0x2e   :  { %s2190_s24 = scalar_lea.hbm %s2881_s11, 16 }
  0x2f   :  { %p2191_p2 = scmp.ne.s32.totalorder %s2881_s11, %s2190_s24  ;;  %p2194_p3 = scmp.lt.u32.totalorder %s2190_s24, %s2881_s11 }
  0x31   :  { %p2196_p4 = pnand %p2194_p3, %p2191_p2 }
  0x33   :  { %2199 = shalt.err (!%p2196_p4)
}
  0x34   :  { %s2200_s8 = scalar_lea.vmem %s108_s20, 16  ;;  %s2204_s21 = scalar_lea.vmem %s108_s20, 32 }
  0x35   :  { %p2201_p5 = scmp.ne.s32.totalorder %s108_s20, %s2200_s8  ;;  %p2205_p6 = scmp.lt.s32.totalorder %s108_s20, %s108_s20 }
  0x36   :  { %p2206_p7 = scmp.lt.s32.totalorder %s2204_s21, %s2200_s8 }
  0x38   :  { %p2207_p8 = por %p2206_p7, %p2205_p6 }
  0x3a   :  { %p2208_p9 = pnand %p2207_p8, %p2201_p5 }
  0x3c   :  { %2211 = shalt.err (!%p2208_p9)
}
  0x3d   :  { %110 = dma.hbm_to_vmem [thread:$0]  %s2881_s11, 16, %s108_s20, [#allocation11]  }
  0x3e   :  { %s2212_s0 = scalar_lea.hbm %s2883_s13, 16 }
  0x3f   :  { %p2213_p10 = scmp.ne.s32.totalorder %s2883_s13, %s2212_s0  ;;  %p2216_p11 = scmp.lt.u32.totalorder %s2212_s0, %s2883_s13 }
  0x41   :  { %p2218_p12 = pnand %p2216_p11, %p2213_p10 }
  0x43   :  { %2221 = shalt.err (!%p2218_p12)
}
  0x44   :  { %s2222_s23 = scalar_lea.vmem %s130_s22, 16  ;;  %s2226_s24 = scalar_lea.vmem %s130_s22, 32 }
  0x45   :  { %p2223_p13 = scmp.ne.s32.totalorder %s130_s22, %s2222_s23  ;;  %p2227_p0 = scmp.lt.s32.totalorder %s130_s22, %s130_s22 }
  0x46   :  { %p2228_p1 = scmp.lt.s32.totalorder %s2226_s24, %s2222_s23 }
  0x48   :  { %p2229_p2 = por %p2228_p1, %p2227_p0 }
  0x4a   :  { %p2230_p3 = pnand %p2229_p2, %p2223_p13 }
  0x4c   :  { %2233 = shalt.err (!%p2230_p3)
}
  0x4d   :  { %132 = dma.hbm_to_vmem [thread:$0]  %s2883_s13, 16, %s130_s22, [#allocation14]  }
  0x4e   :  { %s2408_s25 = smov [#allocation16]   ;;  %s2409_s8 = smov [#allocation2]  }
  0x4f   :  { %s151_s3 = sshll.u32 %s2408_s25, 4  ;;  %s44_s21 = sshll.u32 %s2409_s8, 4  ;;  %s152_s3 = int_to_ptr.vmem [resolvable:$true] %s151_s3  ;;  %s2578_s21 = int_to_ptr.vmem [resolvable:$true] %s44_s21 }
  0x50   :  { %s2234_s26 = scalar_lea.hbm %s2885_s15, 16 }
  0x51   :  { %p2235_p4 = scmp.ne.s32.totalorder %s2885_s15, %s2234_s26  ;;  %p2238_p5 = scmp.lt.u32.totalorder %s2234_s26, %s2885_s15 }
  0x53   :  { %p2240_p6 = pnand %p2238_p5, %p2235_p4 }
  0x55   :  { %2243 = shalt.err (!%p2240_p6)
}
  0x56   :  { %s2244_s13 = scalar_lea.vmem %s152_s3, 16  ;;  %s2248_s22 = scalar_lea.vmem %s152_s3, 32 }
  0x57   :  { %p2245_p7 = scmp.ne.s32.totalorder %s152_s3, %s2244_s13  ;;  %p2249_p8 = scmp.lt.s32.totalorder %s152_s3, %s152_s3 }
  0x58   :  { %p2250_p9 = scmp.lt.s32.totalorder %s2248_s22, %s2244_s13 }
  0x5a   :  { %p2251_p10 = por %p2250_p9, %p2249_p8 }
  0x5c   :  { %p2252_p11 = pnand %p2251_p10, %p2245_p7 }
  0x5e   :  { %2255 = shalt.err (!%p2252_p11)
}
  0x5f   :  { %154 = dma.hbm_to_vmem [thread:$0]  %s2885_s15, 16, %s152_s3, [#allocation17]  }
  0x60   :  { %s2256_s11 = scalar_lea.hbm %s2874_s4, 1024 }
  0x61   :  { %p2257_p12 = scmp.ne.s32.totalorder %s2874_s4, %s2256_s11  ;;  %p2260_p13 = scmp.lt.u32.totalorder %s2256_s11, %s2874_s4 }
  0x63   :  { %p2262_p0 = pnand %p2260_p13, %p2257_p12 }
  0x65   :  { %2265 = shalt.err (!%p2262_p0)
}
  0x66   :  { %s2266_s30 = scalar_lea.vmem %s2578_s21, 1024  ;;  %p2271_p2 = scmp.lt.s32.totalorder %s2578_s21, %s2578_s21 }
  0x67   :  { %p2267_p1 = scmp.ne.s32.totalorder %s2578_s21, %s2266_s30  ;;  %p2272_p3 = scmp.lt.s32.totalorder %s2266_s30, %s2266_s30 }
  0x69   :  { %p2273_p4 = por %p2272_p3, %p2271_p2 }
  0x6b   :  { %p2274_p5 = pnand %p2273_p4, %p2267_p1 }
  0x6d   :  { %2277 = shalt.err (!%p2274_p5)
}
  0x6e   :  { %s2899_s15 = smov 4   ;;  %s2900_s3 = smov 64  }
  0x6f   :  { %50 = dma.hbm_to_vmem [thread:$0]  %s2874_s4, 1024, %s2578_s21, [#allocation3], %s2900_s3, %s2900_s3, %s2899_s15  }
  0x70   :  { %s2410_s0 = smov [#allocation6]   ;;  %s2411_s28 = smov [#allocation9]  }
  0x71   :  { %s71_s27 = sshll.u32 %s2410_s0, 4  ;;  %s94_s13 = sshll.u32 %s2411_s28, 4  ;;  %s72_s27 = int_to_ptr.vmem [resolvable:$true] %s71_s27  ;;  %s2612_s13 = int_to_ptr.vmem [resolvable:$true] %s94_s13 }
  0x72   :  { %s2278_s2 = scalar_lea.hbm %s2877_s7, 16 }
  0x73   :  { %p2279_p6 = scmp.ne.s32.totalorder %s2877_s7, %s2278_s2  ;;  %p2282_p7 = scmp.lt.u32.totalorder %s2278_s2, %s2877_s7 }
  0x75   :  { %p2284_p8 = pnand %p2282_p7, %p2279_p6 }
  0x77   :  { %2287 = shalt.err (!%p2284_p8)
}
  0x78   :  { %s2288_s4 = scalar_lea.vmem %s72_s27, 16  ;;  %s2292_s21 = scalar_lea.vmem %s72_s27, 32 }
  0x79   :  { %p2289_p9 = scmp.ne.s32.totalorder %s72_s27, %s2288_s4  ;;  %p2293_p10 = scmp.lt.s32.totalorder %s72_s27, %s72_s27 }
  0x7a   :  { %p2294_p11 = scmp.lt.s32.totalorder %s2292_s21, %s2288_s4 }
  0x7c   :  { %p2295_p12 = por %p2294_p11, %p2293_p10 }
  0x7e   :  { %p2296_p13 = pnand %p2295_p12, %p2289_p9 }
  0x80   :  { %2299 = shalt.err (!%p2296_p13)
}
  0x81   :  { %74 = dma.hbm_to_vmem [thread:$0]  %s2877_s7, 16, %s72_s27, [#allocation5]  }
  0x82   :  { %s2300_s26 = scalar_lea.hbm %s2880_s10, 1024 }
  0x83   :  { %p2301_p0 = scmp.ne.s32.totalorder %s2880_s10, %s2300_s26  ;;  %p2304_p1 = scmp.lt.u32.totalorder %s2300_s26, %s2880_s10 }
  0x85   :  { %p2306_p2 = pnand %p2304_p1, %p2301_p0 }
  0x87   :  { %2309 = shalt.err (!%p2306_p2)
}
  0x88   :  { %s2310_s1 = scalar_lea.vmem %s2612_s13, 1024  ;;  %p2315_p4 = scmp.lt.s32.totalorder %s2612_s13, %s2612_s13 }
  0x89   :  { %p2311_p3 = scmp.ne.s32.totalorder %s2612_s13, %s2310_s1  ;;  %p2316_p5 = scmp.lt.s32.totalorder %s2310_s1, %s2310_s1 }
  0x8b   :  { %p2317_p6 = por %p2316_p5, %p2315_p4 }
  0x8d   :  { %p2318_p7 = pnand %p2317_p6, %p2311_p3 }
  0x8f   :  { %2321 = shalt.err (!%p2318_p7)
}
  0x90   :  { %100 = dma.hbm_to_vmem [thread:$0]  %s2880_s10, 1024, %s2612_s13, [#allocation8], %s2900_s3, %s2900_s3, %s2899_s15  }
  0x91   :  { %s2412_s2 = smov [#allocation12]   ;;  %s2413_s24 = smov [#allocation15]  }
  0x92   :  { %s116_s23 = sshll.u32 %s2412_s2, 4  ;;  %s138_s11 = sshll.u32 %s2413_s24, 4  ;;  %s117_s23 = int_to_ptr.vmem [resolvable:$true] %s116_s23  ;;  %s2646_s11 = int_to_ptr.vmem [resolvable:$true] %s138_s11 }
  0x93   :  { %s2322_s21 = scalar_lea.hbm %s2882_s12, 1024 }
  0x94   :  { %p2323_p8 = scmp.ne.s32.totalorder %s2882_s12, %s2322_s21  ;;  %p2326_p9 = scmp.lt.u32.totalorder %s2322_s21, %s2882_s12 }
  0x96   :  { %p2328_p10 = pnand %p2326_p9, %p2323_p8 }
  0x98   :  { %2331 = shalt.err (!%p2328_p10)
}
  0x99   :  { %s2332_s10 = scalar_lea.vmem %s117_s23, 1024  ;;  %p2337_p12 = scmp.lt.s32.totalorder %s117_s23, %s117_s23 }
  0x9a   :  { %p2333_p11 = scmp.ne.s32.totalorder %s117_s23, %s2332_s10  ;;  %p2338_p13 = scmp.lt.s32.totalorder %s2332_s10, %s2332_s10 }
  0x9c   :  { %p2339_p0 = por %p2338_p13, %p2337_p12 }
  0x9e   :  { %p2340_p1 = pnand %p2339_p0, %p2333_p11 }
  0xa0   :  { %2343 = shalt.err (!%p2340_p1)
}
  0xa1   :  { %122 = dma.hbm_to_vmem [thread:$0]  %s2882_s12, 1024, %s117_s23, [#allocation11], %s2900_s3, %s2900_s3, %s2899_s15  }
  0xa2   :  { %s2344_s28 = scalar_lea.hbm %s2884_s14, 1024 }
  0xa3   :  { %p2345_p2 = scmp.ne.s32.totalorder %s2884_s14, %s2344_s28  ;;  %p2348_p3 = scmp.lt.u32.totalorder %s2344_s28, %s2884_s14 }
  0xa5   :  { %p2350_p4 = pnand %p2348_p3, %p2345_p2 }
  0xa7   :  { %2353 = shalt.err (!%p2350_p4)
}
  0xa8   :  { %s2354_s2 = scalar_lea.vmem %s2646_s11, 1024  ;;  %p2359_p6 = scmp.lt.s32.totalorder %s2646_s11, %s2646_s11 }
  0xa9   :  { %p2355_p5 = scmp.ne.s32.totalorder %s2646_s11, %s2354_s2  ;;  %p2360_p7 = scmp.lt.s32.totalorder %s2354_s2, %s2354_s2 }
  0xab   :  { %p2361_p8 = por %p2360_p7, %p2359_p6 }
  0xad   :  { %p2362_p9 = pnand %p2361_p8, %p2355_p5 }
  0xaf   :  { %2365 = shalt.err (!%p2362_p9)
}
  0xb0   :  { %144 = dma.hbm_to_vmem [thread:$0]  %s2884_s14, 1024, %s2646_s11, [#allocation14], %s2900_s3, %s2900_s3, %s2899_s15  }
  0xb1   :  { %s2414_s24 = smov [#allocation18]   ;;  %s2366_s25 = scalar_lea.hbm %s2886_s16, 8192 }
  0xb2   :  { %s160_s20 = sshll.u32 %s2414_s24, 4  ;;  %p2367_p10 = scmp.ne.s32.totalorder %s2886_s16, %s2366_s25  ;;  %s161_s20 = int_to_ptr.vmem [resolvable:$true] %s160_s20 }
  0xb3   :  { %p2370_p11 = scmp.lt.u32.totalorder %s2366_s25, %s2886_s16 }
  0xb5   :  { %p2372_p12 = pnand %p2370_p11, %p2367_p10 }
  0xb7   :  { %2375 = shalt.err (!%p2372_p12)
}
  0xb8   :  { %s2376_s13 = scalar_lea.vmem %s161_s20, 8192  ;;  %p2381_p0 = scmp.lt.s32.totalorder %s161_s20, %s161_s20 }
  0xb9   :  { %p2377_p13 = scmp.ne.s32.totalorder %s161_s20, %s2376_s13  ;;  %p2382_p1 = scmp.lt.s32.totalorder %s2376_s13, %s2376_s13 }
  0xbb   :  { %p2383_p2 = por %p2382_p1, %p2381_p0 }
  0xbd   :  { %p2384_p3 = pnand %p2383_p2, %p2377_p13 }
  0xbf   :  { %2387 = shalt.err (!%p2384_p3)
}
  0xc0   :  { %s2415_s14 = smov 512   ;;  %s2416_s15 = smov 32  }
  0xc1   :  { %166 = dma.hbm_to_vmem [thread:$0]  %s2886_s16, 8192, %s161_s20, [#allocation17], %s2415_s14, %s2415_s14, %s2416_s15  }
  0xc2   :  { %2388 = dma.done.wait [#allocation3], 1024  }
  0xc3   :  { %2389 = vsyncadd [#allocation3], 4294966272 }
  0xc4   :  { %2390 = dma.done.wait [#allocation5], 1040  }
  0xc5   :  { %2391 = vsyncadd [#allocation5], 4294966256 }
  0xc6   :  { %2392 = dma.done.wait [#allocation8], 3072  }
  0xc7   :  { %2393 = vsyncadd [#allocation8], 4294964224 }
  0xc8   :  { %2394 = dma.done.wait [#allocation11], 1040  }
  0xc9   :  { %2395 = vsyncadd [#allocation11], 4294966256 }
  0xca   :  { %2396 = dma.done.wait [#allocation14], 1040  }
  0xcb   :  { %2397 = vsyncadd [#allocation14], 4294966256 }
  0xcc   :  { %2398 = dma.done.wait [#allocation17], 8208  }
  0xcd   :  { %2399 = vsyncadd [#allocation17], 4294959088  ;;  %v2417_v0 = vmov 0.0   ;;  %s2901_s0 = sld [smem:[#allocation27_spill]]  ;;  %s2902_s11 = sld [smem:[#allocation25_spill]]  ;;  %v2080_v14 = vld [vmem:[#allocation2] sm:$0xff]  }
  0xce   :  { %1942 = vmatprep.subr.bf16.mxu1 %v2417_v0  ;;  %v2081_v17 = vld [vmem:[#allocation2 + $0x8] sm:$0xff]   ;;  %v2082_v20 = vld [vmem:[#allocation2 + $0x10] sm:$0xff]   ;;  %v2083_v22 = vld [vmem:[#allocation2 + $0x18] sm:$0xff]   ;;  %vm2418_vm0 = vmmov 0   ;;  %s2903_s24 = sld [smem:[#allocation28_spill]]  ;;  %s2904_s13 = sld [smem:[#allocation26_spill]] }
  0xcf   :  { %1943 = vmatpush3.bf16.msra.mxu1 %v2080_v14  ;;  %v2084_v24 = vld [vmem:[#allocation2 + $0x20] sm:$0xff]   ;;  %v2085_v25 = vld [vmem:[#allocation2 + $0x28] sm:$0xff]   ;;  %v2086_v26 = vld [vmem:[#allocation2 + $0x30] sm:$0xff]   ;;  %1958 = vmatprep.mubr.msk.bf16.mxu1 %vm2418_vm0, %v2417_v0 }
  0xd0   :  { %1944 = vmatprep.subr.bf16.mxu1 %v2417_v0  ;;  %v2087_v27 = vld [vmem:[#allocation2 + $0x38] sm:$0xff]   ;;  %v2088_v28 = vld [vmem:[#allocation4] sm:$0xff]   ;;  %v2089_v29 = vld [vmem:[#allocation4 + $0x8] sm:$0xff]  }
  0xd1   :  { %v2090_v30 = vld [vmem:[#allocation4 + $0x10] sm:$0xff]   ;;  %v2091_v31 = vld [vmem:[#allocation4 + $0x18] sm:$0xff]   ;;  %v2092_v32 = vld [vmem:[#allocation4 + $0x20] sm:$0xff]  }
  0xd2   :  { %v2093_v33 = vld [vmem:[#allocation4 + $0x28] sm:$0xff]   ;;  %v2094_v43 = vld [vmem:[#allocation4 + $0x30] sm:$0xff]   ;;  %v2095_v44 = vld [vmem:[#allocation4 + $0x38] sm:$0xff]  }
  0xd3   :  { %v2062_v1 = vld [vmem:[%s2901_s0 + $0x40] sm:$0xff]   ;;  %v2064_v3 = vld [vmem:[%s2901_s0 + $0x48] sm:$0xff]   ;;  %v2066_v5 = vld [vmem:[%s2901_s0 + $0x50] sm:$0xff]   ;;  %1945 = vmatpush3.bf16.msra.mxu1 %v2081_v17 }
  0xd4   :  { %v2063_v2 = vld [vmem:[%s2901_s0] sm:$0xff]   ;;  %1875 = vmatprep.subr.bf16.mxu0 %v2062_v1  ;;  %v2065_v4 = vld [vmem:[%s2901_s0 + $0x8] sm:$0xff]   ;;  %v2067_v6 = vld [vmem:[%s2901_s0 + $0x10] sm:$0xff]   ;;  %1946 = vmatprep.subr.bf16.mxu1 %v2417_v0 }
  0xd5   :  { %1876 = vmatpush3.bf16.msra.mxu0 %v2063_v2  ;;  %v2068_v7 = vld [vmem:[%s2901_s0 + $0x58] sm:$0xff]   ;;  %v2070_v9 = vld [vmem:[%s2901_s0 + $0x60] sm:$0xff]   ;;  %v2072_v11 = vld [vmem:[%s2901_s0 + $0x68] sm:$0xff]  }
  0xd6   :  { %1877 = vmatprep.subr.bf16.mxu0 %v2064_v3  ;;  %v2069_v8 = vld [vmem:[%s2901_s0 + $0x18] sm:$0xff]   ;;  %v2071_v10 = vld [vmem:[%s2901_s0 + $0x20] sm:$0xff]   ;;  %v2073_v15 = vld [vmem:[%s2901_s0 + $0x28] sm:$0xff]  }
  0xd7   :  { %v203_v12 = vld [vmem:[%s2902_s11] sm:$0xff]  ;;  %v2074_v16 = vld [vmem:[%s2901_s0 + $0x70] sm:$0xff]   ;;  %v2076_v19 = vld [vmem:[%s2901_s0 + $0x78] sm:$0xff]   ;;  %1947 = vmatpush3.bf16.msra.mxu1 %v2082_v20 }
  0xd8   :  { %v1733_v13 = vcombine.high %v203_v12, %v203_v12  ;;  %v2075_v18 = vld [vmem:[%s2901_s0 + $0x30] sm:$0xff]   ;;  %v2077_v21 = vld [vmem:[%s2901_s0 + $0x38] sm:$0xff]   ;;  %1948 = vmatprep.subr.bf16.mxu1 %v2417_v0  ;;  %v1732_v23 = vcombine.low %v203_v12, %v203_v12  ;;  %v1731_v35 = vld [vmem:[%s2903_s24] ss:$0 sm:$0xff] }
  0xd9   :  { %1878 = vmatpush3.bf16.msra.mxu0 %v2065_v4  ;;  %v2096_v45 = vld [vmem:[#allocation7] ss:$8 sps:$4 sm:$0xff]   ;;  %v2098_v46 = vld [vmem:[#allocation7 + $0x4] ss:$8 sps:$4 sm:$0xff]   ;;  %v2101_v47 = vld [vmem:[#allocation7 + $0x14] ss:$8 sps:$4 sm:$0xff]  }
  0xda   :  { %1879 = vmatprep.subr.bf16.mxu0 %v2066_v5  ;;  %378 = vmatprep.mubr.bf16.mxu0 %v1733_v13  ;;  %v2099_v48 = vld [vmem:[#allocation7 + $0x10] ss:$8 sps:$4 sm:$0xff]   ;;  %v2104_v49 = vld [vmem:[#allocation7 + $0x24] ss:$8 sps:$4 sm:$0xff]   ;;  %v2102_v50 = vld [vmem:[#allocation7 + $0x20] ss:$8 sps:$4 sm:$0xff]  }
  0xdb   :  { %1949 = vmatpush3.bf16.msra.mxu1 %v2083_v22  ;;  %v2107_v51 = vld [vmem:[#allocation7 + $0x34] ss:$8 sps:$4 sm:$0xff]   ;;  %v2105_v52 = vld [vmem:[#allocation7 + $0x30] ss:$8 sps:$4 sm:$0xff]   ;;  %v2110_v53 = vld [vmem:[#allocation7 + $0x44] ss:$8 sps:$4 sm:$0xff]  }
  0xdc   :  { %1950 = vmatprep.subr.bf16.mxu1 %v2417_v0  ;;  %v2108_v54 = vld [vmem:[#allocation7 + $0x40] ss:$8 sps:$4 sm:$0xff]   ;;  %v2113_v55 = vld [vmem:[#allocation7 + $0x54] ss:$8 sps:$4 sm:$0xff]   ;;  %v2111_v56 = vld [vmem:[#allocation7 + $0x50] ss:$8 sps:$4 sm:$0xff]  }
  0xdd   :  { %1880 = vmatpush3.bf16.msra.mxu0 %v2067_v6  ;;  %v2116_v57 = vld [vmem:[#allocation7 + $0x64] ss:$8 sps:$4 sm:$0xff]   ;;  %v2114_v58 = vld [vmem:[#allocation7 + $0x60] ss:$8 sps:$4 sm:$0xff]   ;;  %v1750_v59 = vld [vmem:[%s2875_s5] ss:$0 sm:$0xff] }
  0xde   :  { %1881 = vmatprep.subr.bf16.mxu0 %v2068_v7  ;;  %v2119_v4 = vld [vmem:[#allocation7 + $0x74] ss:$8 sps:$4 sm:$0xff]   ;;  %v2117_v5 = vld [vmem:[#allocation7 + $0x70] ss:$8 sps:$4 sm:$0xff]   ;;  %v2419_v6 = vmov 0   ;;  %v2120_v7 = vld [vmem:[#allocation9] sm:$0xff]  }
  0xdf   :  { %1951 = vmatpush3.bf16.msra.mxu1 %v2084_v24  ;;  %v2122_v17 = vld [vmem:[#allocation9 + $0x10] sm:$0xff]   ;;  %v2125_v20 = vld [vmem:[#allocation9 + $0x28] sm:$0xff]   ;;  %v2127_v22 = vld [vmem:[#allocation9 + $0x38] sm:$0xff]  }
  0xe0   :  { %1952 = vmatprep.subr.bf16.mxu1 %v2417_v0  ;;  %v2129_v24 = vld [vmem:[#allocation12 + $0x8] sm:$0xff]  }
  0xe1   :  { %1882 = vmatpush3.bf16.msra.mxu0 %v2069_v8  ;;  %v2121_v8 = vld [vmem:[#allocation9 + $0x8] sm:$0xff]  }
  0xe2   :  { %1883 = vmatprep.subr.bf16.mxu0 %v2070_v9  ;;  %v1759_v9 = vld [vmem:[#allocation6] ss:$0 sm:$0xff] }
  0xe3   :  { %1953 = vmatpush3.bf16.msra.mxu1 %v2085_v25  ;;  %v2130_v25 = vld [vmem:[#allocation12 + $0x10] sm:$0xff]  }
  0xe4   :  { %1954 = vmatprep.subr.bf16.mxu1 %v2417_v0 }
  0xe5   :  { %1884 = vmatpush3.bf16.msra.mxu0 %v2071_v10 }
  0xe6   :  { %1885 = vmatprep.subr.bf16.mxu0 %v2072_v11 }
  0xe7   :  { %1955 = vmatpush3.bf16.msra.mxu1 %v2086_v26  ;;  %v2131_v26 = vld [vmem:[#allocation12 + $0x18] sm:$0xff]  }
  0xe8   :  { %1956 = vmatprep.subr.bf16.mxu1 %v2417_v0 }
  0xe9   :  { %1886 = vmatpush3.bf16.msra.mxu0 %v2073_v15 }
  0xea   :  { %1887 = vmatprep.subr.bf16.mxu0 %v2074_v16 }
  0xeb   :  { %1957 = vmatpush3.bf16.msra.mxu1 %v2087_v27  ;;  %v2132_v27 = vld [vmem:[#allocation12 + $0x20] sm:$0xff]  }
  0xec   :  { %722 = vmatprep.subr.bf16.mxu1 %v2098_v46 }
  0xed   :  { %1888 = vmatpush3.bf16.msra.mxu0 %v2075_v18  ;;  %v2123_v18 = vld [vmem:[#allocation9 + $0x18] sm:$0xff]  }
  0xee   :  { %1889 = vmatprep.subr.bf16.mxu0 %v2076_v19  ;;  %v2124_v19 = vld [vmem:[#allocation9 + $0x20] sm:$0xff]  }
  0xf1   :  { %1890 = vmatpush3.bf16.msra.mxu0 %v2077_v21  ;;  %v2126_v21 = vld [vmem:[#allocation9 + $0x30] sm:$0xff]  }
  0xf2   :  { %1962 = vmatprep.subr.bf16.mxu0 %v2417_v0 }
  0xf4   :  { %379 = vmatmul.mubr.bf16.vlgmr.msra.gmra.mrb[0].mxu0 %v1732_v23  ;;  %v2128_v23 = vld [vmem:[#allocation12] sm:$0xff]  }
  0xf5   :  { %1978 = vmatprep.mubr.msk.bf16.mxu0 %vm2418_vm0, %v2417_v0  ;;  %1963 = vmatpush3.bf16.msra.mxu0 %v2088_v28  ;;  %v2133_v28 = vld [vmem:[#allocation12 + $0x28] sm:$0xff]  }
  0xf6   :  { %1964 = vmatprep.subr.bf16.mxu0 %v2417_v0 }
  0xf9   :  { %1965 = vmatpush3.bf16.msra.mxu0 %v2089_v29  ;;  %v632_v29 = vlaneseq }
  0xfa   :  { %1966 = vmatprep.subr.bf16.mxu0 %v2417_v0 }
  0xfd   :  { %1967 = vmatpush3.bf16.msra.mxu0 %v2090_v30  ;;  %v2793_v30 = vshrl.u32 %v632_v29, 7  ;;  %v1155_v29 = vld [vmem:[#allocation18 + $0x160] sm:$0xff] }
  0xfe   :  { %1968 = vmatprep.subr.bf16.mxu0 %v2417_v0 }
 0x101   :  { %1969 = vmatpush3.bf16.msra.mxu0 %v2091_v31  ;;  %v634_v31 = vsub.s32 0, %v2793_v30 }
 0x102   :  { %1970 = vmatprep.subr.bf16.mxu0 %v2417_v0 }
 0x105   :  { %1971 = vmatpush3.bf16.msra.mxu0 %v2092_v32  ;;  %v630_v32 = vld [vmem:[%s2879_s9] sm:$0x3] }
 0x106   :  { %1972 = vmatprep.subr.bf16.mxu0 %v2417_v0 }
 0x109   :  { %1973 = vmatpush3.bf16.msra.mxu0 %v2093_v33  ;;  %v638_v33 = vsub.s32 1, %v2793_v30 }
 0x10a   :  { %1974 = vmatprep.subr.bf16.mxu0 %v2417_v0 }
 0x10d   :  { %1975 = vmatpush3.bf16.msra.mxu0 %v2094_v43 }
 0x10e   :  { %1976 = vmatprep.subr.bf16.mxu0 %v2417_v0 }
 0x111   :  { %1977 = vmatpush3.bf16.msra.mxu0 %v2095_v44  ;;  %v765_v44 = vld [vmem:[%s2904_s13] sm:$0xff] }
 0x112   :  { %1982 = vmatprep.subr.bf16.mxu0 %v2417_v0 }
 0x1c7   :  { %v1891_v34 = vpop.f32.mrb[0].mxu0 }
 0x1c8   :  { %v1892_v36 = vpop.f32.mrb[1].mxu0 }
 0x1c9   :  { %v1893_v37 = vadd.f32 %v1892_v36, %v1891_v34  ;;  %v1894_v38 = vpop.f32.mrb[2].mxu0  ;;  %v635_v34 = vrot.slane %v630_v32, %v634_v31 }
 0x1ca   :  { %v1895_v39 = vpop.f32.mrb[3].mxu0 }
 0x1cb   :  { %v381_v40 = vadd.f32 %v1893_v37, %v1731_v35  ;;  %v639_v35 = vrot.slane %v630_v32, %v638_v33 }
 0x1cd   :  { %v386_v41 = vmax.f32 %v381_v40, 0.0 }
 0x1cf   :  { %v387_v42 = vpack.c.bf16 %v386_v41, %v386_v41 }
 0x1d1   :  { %1959 = vmatmul.mubr.bf16.vlgmr.msra.gmra.mrb[0].mxu1 %v387_v42 }
 0x1d2   :  { %723 = vmatpush1.bf16.msra.mxu1 %v2096_v45  ;;  %754 = vmatprep.mubr.bf16.mxu1 %v2419_v6 }
 0x1d3   :  { %724 = vmatprep.subr.bf16.mxu1 %v2101_v47 }
 0x1d6   :  { %725 = vmatpush1.bf16.msra.mxu1 %v2099_v48 }
 0x1d7   :  { %726 = vmatprep.subr.bf16.mxu1 %v2104_v49  ;;  %v2134_v49 = vld [vmem:[#allocation12 + $0x30] sm:$0xff]  }
 0x1da   :  { %727 = vmatpush1.bf16.msra.mxu1 %v2102_v50  ;;  %v2135_v50 = vld [vmem:[#allocation12 + $0x38] sm:$0xff]  }
 0x1db   :  { %728 = vmatprep.subr.bf16.mxu1 %v2107_v51  ;;  %v2136_v51 = vld [vmem:[#allocation15] sm:$0xff]  }
 0x1de   :  { %729 = vmatpush1.bf16.msra.mxu1 %v2105_v52  ;;  %v2137_v52 = vld [vmem:[#allocation15 + $0x8] sm:$0xff]  }
 0x1df   :  { %730 = vmatprep.subr.bf16.mxu1 %v2110_v53  ;;  %v2138_v53 = vld [vmem:[#allocation15 + $0x10] sm:$0xff]  }
 0x1e2   :  { %731 = vmatpush1.bf16.msra.mxu1 %v2108_v54  ;;  %v2139_v54 = vld [vmem:[#allocation15 + $0x18] sm:$0xff]  }
 0x1e3   :  { %732 = vmatprep.subr.bf16.mxu1 %v2113_v55  ;;  %v2140_v55 = vld [vmem:[#allocation15 + $0x20] sm:$0xff]  }
 0x1e6   :  { %733 = vmatpush1.bf16.msra.mxu1 %v2111_v56  ;;  %v2141_v56 = vld [vmem:[#allocation15 + $0x28] sm:$0xff]  }
 0x1e7   :  { %734 = vmatprep.subr.bf16.mxu1 %v2116_v57  ;;  %v1784_v57 = vld [vmem:[#allocation10] ss:$0 sm:$0xff] }
 0x1ea   :  { %735 = vmatpush1.bf16.msra.mxu1 %v2114_v58 }
 0x1eb   :  { %736 = vmatprep.subr.bf16.mxu1 %v2119_v4  ;;  %v1111_v4 = vld [vmem:[#allocation18] sm:$0xff] }
 0x1ee   :  { %737 = vmatpush1.bf16.msra.mxu1 %v2117_v5  ;;  %v1115_v5 = vld [vmem:[#allocation18 + $0x20] sm:$0xff] }
 0x1ef   :  { %2002 = vmatprep.subr.bf16.mxu1 %v2417_v0 }
 0x2a4   :  { %v493_v60 = vpop.f32.mrb[0].mxu1 }
 0x2a5   :  { %v494_v61 = vadd.f32 %v1750_v59, %v493_v60  ;;  %v1960_v62 = vpop.f32.mrb[1].mxu1 }
 0x2a6   :  { %v496_v63 = vpop.f32.mrb[2].mxu1 }
 0x2a7   :  { %v499_v1 = vmax.f32 %v494_v61, 0.0  ;;  %v1961_v2 = vpop.f32.mrb[3].mxu1 }
 0x2a8   :  { %v2142_v2 = vld [vmem:[#allocation15 + $0x30] sm:$0xff]  }
 0x2a9   :  { %v500_v3 = vpack.c.bf16 %v499_v1, %v499_v1 }
 0x2ab   :  { %1979 = vmatmul.mubr.bf16.vlgmr.msra.gmra.mrb[4].mxu0 %v500_v3  ;;  %v2143_v3 = vld [vmem:[#allocation15 + $0x38] sm:$0xff]  }
 0x2ac   :  { %1998 = vmatprep.mubr.msk.bf16.mxu0 %vm2418_vm0, %v2417_v0  ;;  %1983 = vmatpush3.bf16.msra.mxu0 %v2120_v7  ;;  %v1112_v7 = vld [vmem:[#allocation18 + $0x8] sm:$0xff] }
 0x2ad   :  { %1984 = vmatprep.subr.bf16.mxu0 %v2417_v0 }
 0x2b0   :  { %1985 = vmatpush3.bf16.msra.mxu0 %v2121_v8  ;;  %v1811_v8 = vcombine.low %v1111_v4, %v1115_v5 }
 0x2b1   :  { %1986 = vmatprep.subr.bf16.mxu0 %v2417_v0 }
 0x2b4   :  { %1987 = vmatpush3.bf16.msra.mxu0 %v2122_v17  ;;  %v1127_v17 = vld [vmem:[#allocation18 + $0x80] sm:$0xff] }
 0x2b5   :  { %1988 = vmatprep.subr.bf16.mxu0 %v2417_v0 }
 0x2b8   :  { %1989 = vmatpush3.bf16.msra.mxu0 %v2123_v18 }
 0x2b9   :  { %1990 = vmatprep.subr.bf16.mxu0 %v2417_v0 }
 0x2bc   :  { %1991 = vmatpush3.bf16.msra.mxu0 %v2124_v19 }
 0x2bd   :  { %1992 = vmatprep.subr.bf16.mxu0 %v2417_v0 }
 0x2c0   :  { %1993 = vmatpush3.bf16.msra.mxu0 %v2125_v20  ;;  %v1135_v20 = vld [vmem:[#allocation18 + $0xc0] sm:$0xff] }
 0x2c1   :  { %1994 = vmatprep.subr.bf16.mxu0 %v2417_v0 }
 0x2c4   :  { %1995 = vmatpush3.bf16.msra.mxu0 %v2126_v21  ;;  %v1139_v21 = vld [vmem:[#allocation18 + $0xe0] sm:$0xff] }
 0x2c5   :  { %1996 = vmatprep.subr.bf16.mxu0 %v2417_v0 }
 0x2c8   :  { %1997 = vmatpush3.bf16.msra.mxu0 %v2127_v22  ;;  %v1836_v22 = vcombine.high %v1135_v20, %v1139_v21 }
 0x2c9   :  { %2022 = vmatprep.subr.bf16.mxu0 %v2417_v0 }
 0x37e   :  { %v606_v10 = vpop.f32.mrb[4].mxu0 }
 0x37f   :  { %v607_v11 = vadd.f32 %v1759_v9, %v606_v10  ;;  %v1980_v12 = vpop.f32.mrb[5].mxu0  ;;  %v1812_v9 = vcombine.high %v1111_v4, %v1115_v5  ;;  %v1116_v10 = vld [vmem:[#allocation18 + $0x28] sm:$0xff] }
 0x380   :  { %v609_v13 = vpop.f32.mrb[6].mxu0  ;;  %v1123_v12 = vld [vmem:[#allocation18 + $0x60] sm:$0xff]  ;;  %v1164_v4 = vld [vmem:[#allocation18 + $0x1a8] sm:$0xff] }
 0x381   :  { %v612_v14 = vmax.f32 %v607_v11, 0.0  ;;  %v1981_v15 = vpop.f32.mrb[7].mxu0  ;;  %v1119_v11 = vld [vmem:[#allocation18 + $0x40] sm:$0xff]  ;;  %v1813_v13 = vcombine.low %v1112_v7, %v1116_v10 }
 0x382   :  { %v1820_v15 = vcombine.high %v1119_v11, %v1123_v12 }
 0x383   :  { %v613_v16 = vpack.c.bf16 %v612_v14, %v612_v14  ;;  %v1814_v14 = vcombine.high %v1112_v7, %v1116_v10  ;;  %v1171_v10 = vld [vmem:[#allocation18 + $0x1e0] sm:$0xff] }
 0x385   :  { %755 = vmatmul.mubr.bf16.vlgmr.msra.gmra.mrb[4].mxu1 %v613_v16  ;;  %v1819_v16 = vcombine.low %v1119_v11, %v1123_v12  ;;  %v1168_v11 = vld [vmem:[#allocation18 + $0x1c8] sm:$0xff] }
 0x386   :  { %2018 = vmatprep.mubr.msk.bf16.mxu1 %vm2418_vm0, %v2417_v0  ;;  %2003 = vmatpush3.bf16.msra.mxu1 %v2128_v23  ;;  %v1835_v23 = vcombine.low %v1135_v20, %v1139_v21  ;;  %v1118_v20 = vld [vmem:[#allocation18 + $0x38] sm:$0xff] }
 0x387   :  { %2004 = vmatprep.subr.bf16.mxu1 %v2417_v0 }
 0x38a   :  { %2005 = vmatpush3.bf16.msra.mxu1 %v2129_v24  ;;  %v1143_v24 = vld [vmem:[#allocation18 + $0x100] sm:$0xff] }
 0x38b   :  { %2006 = vmatprep.subr.bf16.mxu1 %v2417_v0 }
 0x38e   :  { %2007 = vmatpush3.bf16.msra.mxu1 %v2130_v25  ;;  %v1147_v25 = vld [vmem:[#allocation18 + $0x120] sm:$0xff] }
 0x38f   :  { %2008 = vmatprep.subr.bf16.mxu1 %v2417_v0 }
 0x392   :  { %2009 = vmatpush3.bf16.msra.mxu1 %v2131_v26  ;;  %v1844_v26 = vcombine.high %v1143_v24, %v1147_v25 }
 0x393   :  { %2010 = vmatprep.subr.bf16.mxu1 %v2417_v0 }
 0x396   :  { %2011 = vmatpush3.bf16.msra.mxu1 %v2132_v27  ;;  %v1843_v27 = vcombine.low %v1143_v24, %v1147_v25  ;;  %v1802_v24 = vld [vmem:[#allocation16] ss:$0 sm:$0xff] }
 0x397   :  { %2012 = vmatprep.subr.bf16.mxu1 %v2417_v0 }
 0x39a   :  { %2013 = vmatpush3.bf16.msra.mxu1 %v2133_v28  ;;  %v1151_v28 = vld [vmem:[#allocation18 + $0x140] sm:$0xff] }
 0x39b   :  { %2014 = vmatprep.subr.bf16.mxu1 %v2417_v0  ;;  %v1852_v32 = vcombine.high %v1151_v28, %v1155_v29 }
 0x39e   :  { %2015 = vmatpush3.bf16.msra.mxu1 %v2134_v49 }
 0x39f   :  { %2016 = vmatprep.subr.bf16.mxu1 %v2417_v0 }
 0x3a2   :  { %2017 = vmatpush3.bf16.msra.mxu1 %v2135_v50  ;;  %v1128_v50 = vld [vmem:[#allocation18 + $0x88] sm:$0xff] }
 0x3a3   :  { %1537 = vmatprep.subr.bf16.mxu1 %v1812_v9  ;;  %v1167_v9 = vld [vmem:[#allocation18 + $0x1c0] sm:$0xff] }
 0x3a4   :  { %v1868_v12 = vcombine.high %v1167_v9, %v1171_v10 }
 0x458   :  { %v756_v36 = vpop.f32.mrb[4].mxu1 }
 0x459   :  { %v757_v37 = vadd.f32 %v756_v36, %v635_v34  ;;  %v758_v38 = vpop.f32.mrb[5].mxu1  ;;  %v1851_v34 = vcombine.low %v1151_v28, %v1155_v29  ;;  %v1163_v36 = vld [vmem:[#allocation18 + $0x1a0] sm:$0xff]  ;;  %v1121_v28 = vld [vmem:[#allocation18 + $0x50] sm:$0xff] }
 0x45a   :  { %v759_v39 = vadd.f32 %v758_v38, %v639_v35  ;;  %v760_v40 = vpop.f32.mrb[6].mxu1  ;;  %v1159_v35 = vld [vmem:[#allocation18 + $0x180] sm:$0xff] }
 0x45b   :  { %763 = vst [vmem:[%s2889_s19] sm:$0xff] %v757_v37  ;;  %v761_v41 = vpop.f32.mrb[7].mxu1  ;;  %v1859_v38 = vcombine.low %v1159_v35, %v1163_v36 }
 0x45c   :  { %764 = vst [vmem:[%s2889_s19 + $0x8] sm:$0xff] %v759_v39  ;;  %v766_v42 = vmul.f32 0.5, %v759_v39  ;;  %v1793_v39 = vld [vmem:[#allocation13] ss:$0 sm:$0xff] }
 0x45e   :  { %v767_v43 = vmul.f32 1.442695, %v766_v42 }
 0x460   :  { %2144 = vpow2.f32 %v767_v43 }
 0x46a   :  { %v2145_v45 = vpop.eup %2144 }
 0x46b   :  { %v769_v46 = vmul.f32 %v2145_v45, %v765_v44  ;;  %v1120_v44 = vld [vmem:[#allocation18 + $0x48] sm:$0xff] }
 0x46c   :  { %v1124_v45 = vld [vmem:[#allocation18 + $0x68] sm:$0xff] }
 0x46d   :  { %v770_v47 = vadd.f32 %v769_v46, %v757_v37  ;;  %v1860_v37 = vcombine.high %v1159_v35, %v1163_v36  ;;  %v1822_v49 = vcombine.high %v1120_v44, %v1124_v45  ;;  %v1126_v35 = vld [vmem:[#allocation18 + $0x78] sm:$0xff] }
 0x46f   :  { %v771_v48 = vpack.c.bf16 %v770_v47, %v770_v47 }
 0x471   :  { %1999 = vmatmul.mubr.bf16.vlgmr.msra.gmra.mrb[8].mxu0 %v771_v48 }
 0x472   :  { %2038 = vmatprep.mubr.msk.bf16.mxu0 %vm2418_vm0, %v2417_v0  ;;  %2023 = vmatpush3.bf16.msra.mxu0 %v2136_v51  ;;  %v1132_v51 = vld [vmem:[#allocation18 + $0xa8] sm:$0xff] }
 0x473   :  { %2024 = vmatprep.subr.bf16.mxu0 %v2417_v0 }
 0x476   :  { %2025 = vmatpush3.bf16.msra.mxu0 %v2137_v52  ;;  %v1821_v52 = vcombine.low %v1120_v44, %v1124_v45  ;;  %v1134_v44 = vld [vmem:[#allocation18 + $0xb8] sm:$0xff] }
 0x477   :  { %2026 = vmatprep.subr.bf16.mxu0 %v2417_v0 }
 0x47a   :  { %2027 = vmatpush3.bf16.msra.mxu0 %v2138_v53  ;;  %v1830_v53 = vcombine.high %v1128_v50, %v1132_v51 }
 0x47b   :  { %2028 = vmatprep.subr.bf16.mxu0 %v2417_v0 }
 0x47e   :  { %2029 = vmatpush3.bf16.msra.mxu0 %v2139_v54  ;;  %v1136_v54 = vld [vmem:[#allocation18 + $0xc8] sm:$0xff] }
 0x47f   :  { %2030 = vmatprep.subr.bf16.mxu0 %v2417_v0 }
 0x482   :  { %2031 = vmatpush3.bf16.msra.mxu0 %v2140_v55  ;;  %v1140_v55 = vld [vmem:[#allocation18 + $0xe8] sm:$0xff] }
 0x483   :  { %2032 = vmatprep.subr.bf16.mxu0 %v2417_v0 }
 0x486   :  { %2033 = vmatpush3.bf16.msra.mxu0 %v2141_v56  ;;  %v1829_v56 = vcombine.low %v1128_v50, %v1132_v51  ;;  %v1141_v50 = vld [vmem:[#allocation18 + $0xf0] sm:$0xff]  ;;  %v1138_v51 = vld [vmem:[#allocation18 + $0xd8] sm:$0xff] }
 0x487   :  { %2034 = vmatprep.subr.bf16.mxu0 %v2417_v0 }
 0x48a   :  { %2035 = vmatpush3.bf16.msra.mxu0 %v2142_v2 }
 0x48b   :  { %2036 = vmatprep.subr.bf16.mxu0 %v2417_v0  ;;  %v1131_v0 = vld [vmem:[#allocation18 + $0xa0] sm:$0xff] }
 0x48c   :  { %v1828_v18 = vcombine.high %v1127_v17, %v1131_v0  ;;  %v1827_v19 = vcombine.low %v1127_v17, %v1131_v0  ;;  %v1113_v17 = vld [vmem:[#allocation18 + $0x10] sm:$0xff] }
 0x48d   :  { %v1117_v0 = vld [vmem:[#allocation18 + $0x30] sm:$0xff] }
 0x48e   :  { %2037 = vmatpush3.bf16.msra.mxu0 %v2143_v3  ;;  %v1160_v3 = vld [vmem:[#allocation18 + $0x188] sm:$0xff]  ;;  %v1815_v21 = vcombine.low %v1113_v17, %v1117_v0 }
 0x48f   :  { %1578 = vmatprep.subr.bf16.mxu0 %v1814_v14  ;;  %v1862_v7 = vcombine.high %v1160_v3, %v1164_v4  ;;  %v1867_v14 = vcombine.low %v1167_v9, %v1171_v10  ;;  %v1161_v10 = vld [vmem:[#allocation18 + $0x190] sm:$0xff] }
 0x544   :  { %v877_v58 = vpop.f32.mrb[8].mxu0 }
 0x545   :  { %v878_v59 = vadd.f32 %v1784_v57, %v877_v58  ;;  %v2000_v60 = vpop.f32.mrb[9].mxu0  ;;  %v1838_v57 = vcombine.high %v1136_v54, %v1140_v55  ;;  %v1144_v58 = vld [vmem:[#allocation18 + $0x108] sm:$0xff] }
 0x546   :  { %v880_v61 = vpop.f32.mrb[10].mxu0  ;;  %v1837_v60 = vcombine.low %v1136_v54, %v1140_v55 }
 0x547   :  { %v883_v62 = vmax.f32 %v878_v59, 0.0  ;;  %v2001_v63 = vpop.f32.mrb[11].mxu0  ;;  %v1148_v59 = vld [vmem:[#allocation18 + $0x128] sm:$0xff] }
 0x548   :  { %v1846_v61 = vcombine.high %v1144_v58, %v1148_v59  ;;  %v1156_v63 = vld [vmem:[#allocation18 + $0x168] sm:$0xff] }
 0x549   :  { %v884_v1 = vpack.c.bf16 %v883_v62, %v883_v62  ;;  %v1152_v62 = vld [vmem:[#allocation18 + $0x148] sm:$0xff] }
 0x54a   :  { %v1854_v2 = vcombine.high %v1152_v62, %v1156_v63  ;;  %v1853_v5 = vcombine.low %v1152_v62, %v1156_v63 }
 0x54b   :  { %2019 = vmatmul.mubr.bf16.vlgmr.msra.gmra.mrb[8].mxu1 %v884_v1  ;;  %v1845_v1 = vcombine.low %v1144_v58, %v1148_v59  ;;  %v1149_v58 = vld [vmem:[#allocation18 + $0x130] sm:$0xff]  ;;  %v1146_v59 = vld [vmem:[#allocation18 + $0x118] sm:$0xff] }
 0x54c   :  { %1569 = vmatprep.mubr.bf16.mxu1 %v2419_v6  ;;  %1538 = vmatpush1.bf16.msra.mxu1 %v1811_v8  ;;  %v1861_v8 = vcombine.low %v1160_v3, %v1164_v4  ;;  %v1154_v3 = vld [vmem:[#allocation18 + $0x158] sm:$0xff] }
 0x54d   :  { %1539 = vmatprep.subr.bf16.mxu1 %v1820_v15  ;;  %v1158_v4 = vld [vmem:[#allocation18 + $0x178] sm:$0xff] }
 0x54e   :  { %v1858_v9 = vcombine.high %v1154_v3, %v1158_v4 }
 0x550   :  { %1540 = vmatpush1.bf16.msra.mxu1 %v1819_v16 }
 0x551   :  { %1541 = vmatprep.subr.bf16.mxu1 %v1828_v18  ;;  %v1114_v18 = vld [vmem:[#allocation18 + $0x18] sm:$0xff] }
 0x554   :  { %1542 = vmatpush1.bf16.msra.mxu1 %v1827_v19  ;;  %v1816_v19 = vcombine.high %v1113_v17, %v1117_v0  ;;  %v1169_v0 = vld [vmem:[#allocation18 + $0x1d0] sm:$0xff] }
 0x555   :  { %1543 = vmatprep.subr.bf16.mxu1 %v1836_v22  ;;  %v1817_v22 = vcombine.low %v1114_v18, %v1118_v20 }
 0x558   :  { %1544 = vmatpush1.bf16.msra.mxu1 %v1835_v23  ;;  %v1818_v23 = vcombine.high %v1114_v18, %v1118_v20  ;;  %v1173_v18 = vld [vmem:[#allocation18 + $0x1f0] sm:$0xff]  ;;  %v1174_v20 = vld [vmem:[#allocation18 + $0x1f8] sm:$0xff] }
 0x559   :  { %1545 = vmatprep.subr.bf16.mxu1 %v1844_v26 }
 0x55c   :  { %1546 = vmatpush1.bf16.msra.mxu1 %v1843_v27 }
 0x55d   :  { %1547 = vmatprep.subr.bf16.mxu1 %v1852_v32  ;;  %v1125_v32 = vld [vmem:[#allocation18 + $0x70] sm:$0xff] }
 0x55e   :  { %v1823_v45 = vcombine.low %v1121_v28, %v1125_v32 }
 0x560   :  { %1548 = vmatpush1.bf16.msra.mxu1 %v1851_v34  ;;  %v1122_v34 = vld [vmem:[#allocation18 + $0x58] sm:$0xff] }
 0x561   :  { %1549 = vmatprep.subr.bf16.mxu1 %v1860_v37 }
 0x564   :  { %1550 = vmatpush1.bf16.msra.mxu1 %v1859_v38 }
 0x565   :  { %1551 = vmatprep.subr.bf16.mxu1 %v1868_v12  ;;  %v1162_v12 = vld [vmem:[#allocation18 + $0x198] sm:$0xff] }
 0x568   :  { %1552 = vmatpush1.bf16.msra.mxu1 %v1867_v14 }
 0x569   :  { %1619 = vmatprep.subr.bf16.mxu1 %v1816_v19  ;;  %v1170_v19 = vld [vmem:[#allocation18 + $0x1d8] sm:$0xff] }
 0x61e   :  { %v990_v40 = vpop.f32.mrb[8].mxu1 }
 0x61f   :  { %v991_v41 = vadd.f32 %v1793_v39, %v990_v40  ;;  %v2020_v42 = vpop.f32.mrb[9].mxu1  ;;  %v1824_v39 = vcombine.high %v1121_v28, %v1125_v32  ;;  %v1826_v40 = vcombine.high %v1122_v34, %v1126_v35  ;;  %v1175_v28 = vld [vmem:[%s2887_s17] sm:$0xff] }
 0x620   :  { %v993_v43 = vpop.f32.mrb[10].mxu1  ;;  %v1133_v42 = vld [vmem:[#allocation18 + $0xb0] sm:$0xff]  ;;  %v1180_v32 = vrot.slane %v1175_v28, %v634_v31 }
 0x621   :  { %v996_v46 = vmax.f32 %v991_v41, 0.0  ;;  %v2021_v47 = vpop.f32.mrb[11].mxu1  ;;  %v1129_v41 = vld [vmem:[#allocation18 + $0x90] sm:$0xff]  ;;  %v1130_v43 = vld [vmem:[#allocation18 + $0x98] sm:$0xff] }
 0x622   :  { %v1832_v47 = vcombine.high %v1129_v41, %v1133_v42  ;;  %v1833_v54 = vcombine.low %v1130_v43, %v1134_v44 }
 0x623   :  { %v997_v48 = vpack.c.bf16 %v996_v46, %v996_v46  ;;  %v1825_v46 = vcombine.low %v1122_v34, %v1126_v35  ;;  %v1184_v35 = vrot.slane %v1175_v28, %v638_v33  ;;  %v1195_v33 = vsub.s32 4, %v2793_v30 }
 0x625   :  { %2039 = vmatmul.mubr.bf16.vlgmr.msra.gmra.mrb[12].mxu0 %v997_v48  ;;  %v1834_v48 = vcombine.high %v1130_v43, %v1134_v44 }
 0x626   :  { %1579 = vmatpush1.bf16.msra.mxu0 %v1813_v13  ;;  %1610 = vmatprep.mubr.bf16.mxu0 %v2419_v6  ;;  %v1172_v13 = vld [vmem:[#allocation18 + $0x1e8] sm:$0xff] }
 0x627   :  { %1580 = vmatprep.subr.bf16.mxu0 %v1822_v49  ;;  %v1869_v15 = vcombine.low %v1168_v11, %v1172_v13  ;;  %v1870_v16 = vcombine.high %v1168_v11, %v1172_v13  ;;  %v1137_v49 = vld [vmem:[#allocation18 + $0xd0] sm:$0xff]  ;;  %v1166_v13 = vld [vmem:[#allocation18 + $0x1b8] sm:$0xff] }
 0x628   :  { %v1840_v55 = vcombine.high %v1137_v49, %v1141_v50  ;;  %v1165_v11 = vld [vmem:[#allocation18 + $0x1b0] sm:$0xff]  ;;  %v1866_v17 = vcombine.high %v1162_v12, %v1166_v13 }
 0x62a   :  { %1581 = vmatpush1.bf16.msra.mxu0 %v1821_v52  ;;  %v1142_v52 = vld [vmem:[#allocation18 + $0xf8] sm:$0xff] }
 0x62b   :  { %1582 = vmatprep.subr.bf16.mxu0 %v1830_v53  ;;  %v1831_v53 = vcombine.low %v1129_v41, %v1133_v42  ;;  %v1841_v62 = vcombine.low %v1138_v51, %v1142_v52 }
 0x62e   :  { %1583 = vmatpush1.bf16.msra.mxu0 %v1829_v56  ;;  %v1842_v56 = vcombine.high %v1138_v51, %v1142_v52  ;;  %v1203_v52 = vsub.s32 6, %v2793_v30 }
 0x62f   :  { %1584 = vmatprep.subr.bf16.mxu0 %v1838_v57  ;;  %v1145_v57 = vld [vmem:[#allocation18 + $0x110] sm:$0xff] }
 0x630   :  { %v1848_v63 = vcombine.high %v1145_v57, %v1149_v58 }
 0x632   :  { %1585 = vmatpush1.bf16.msra.mxu0 %v1837_v60  ;;  %v1150_v60 = vld [vmem:[#allocation18 + $0x138] sm:$0xff] }
 0x633   :  { %1586 = vmatprep.subr.bf16.mxu0 %v1846_v61  ;;  %v1839_v61 = vcombine.low %v1137_v49, %v1141_v50 }
 0x636   :  { %1587 = vmatpush1.bf16.msra.mxu0 %v1845_v1  ;;  %v1153_v1 = vld [vmem:[#allocation18 + $0x150] sm:$0xff] }
 0x637   :  { %1588 = vmatprep.subr.bf16.mxu0 %v1854_v2  ;;  %v1157_v2 = vld [vmem:[#allocation18 + $0x170] sm:$0xff] }
 0x638   :  { %v1855_v14 = vcombine.low %v1153_v1, %v1157_v2 }
 0x63a   :  { %1589 = vmatpush1.bf16.msra.mxu0 %v1853_v5  ;;  %v1847_v5 = vcombine.low %v1145_v57, %v1149_v58 }
 0x63b   :  { %1590 = vmatprep.subr.bf16.mxu0 %v1862_v7  ;;  %v1849_v7 = vcombine.low %v1146_v59, %v1150_v60 }
 0x63e   :  { %1591 = vmatpush1.bf16.msra.mxu0 %v1861_v8  ;;  %v1856_v8 = vcombine.high %v1153_v1, %v1157_v2 }
 0x63f   :  { %1592 = vmatprep.subr.bf16.mxu0 %v1870_v16  ;;  %v1864_v16 = vcombine.high %v1161_v10, %v1165_v11 }
 0x642   :  { %1593 = vmatpush1.bf16.msra.mxu0 %v1869_v15  ;;  %v1857_v15 = vcombine.low %v1154_v3, %v1158_v4 }
 0x643   :  { %1660 = vmatprep.subr.bf16.mxu0 %v1818_v23  ;;  %v1872_v23 = vcombine.high %v1169_v0, %v1173_v18 }
 0x6f8   :  { %v1103_v25 = vpop.f32.mrb[12].mxu0 }
 0x6f9   :  { %v1104_v26 = vadd.f32 %v1802_v24, %v1103_v25  ;;  %v2040_v27 = vpop.f32.mrb[13].mxu0  ;;  %v1874_v24 = vcombine.high %v1170_v19, %v1174_v20  ;;  %v1871_v25 = vcombine.low %v1169_v0, %v1173_v18 }
 0x6fa   :  { %v1106_v29 = vpop.f32.mrb[14].mxu0  ;;  %v1187_v27 = vsub.s32 2, %v2793_v30 }
 0x6fb   :  { %v1109_v36 = vmax.f32 %v1104_v26, 0.0  ;;  %v2041_v37 = vpop.f32.mrb[15].mxu0  ;;  %v1873_v26 = vcombine.low %v1170_v19, %v1174_v20  ;;  %v1191_v29 = vsub.s32 3, %v2793_v30 }
 0x6fc   :  { %v1188_v34 = vrot.slane %v1175_v28, %v1187_v27 }
 0x6fd   :  { %v2825_v38 = vpack.c.bf16 %v1109_v36, %v1109_v36  ;;  %v1192_v36 = vrot.slane %v1175_v28, %v1191_v29 }
 0x6ff   :  { %1570 = vmatmul.mubr.bf16.vlgmr.msra.gmra.mrb[12].mxu1 %v2825_v38  ;;  %1611 = vmatmul.mubr.bf16.vlgmr.msra.gmra.mrb[16].mxu0 %v2825_v38 }
 0x700   :  { %1620 = vmatpush1.bf16.msra.mxu1 %v1815_v21  ;;  %1661 = vmatpush1.bf16.msra.mxu0 %v1817_v22  ;;  %v1863_v21 = vcombine.low %v1161_v10, %v1165_v11  ;;  %v1865_v22 = vcombine.low %v1162_v12, %v1166_v13 }
 0x701   :  { %1621 = vmatprep.subr.bf16.mxu1 %v1824_v39  ;;  %1662 = vmatprep.subr.bf16.mxu0 %v1826_v40 }
 0x702   :  { %1651 = vmatprep.mubr.bf16.mxu1 %v2419_v6  ;;  %1692 = vmatprep.mubr.bf16.mxu0 %v2419_v6  ;;  %v1850_v6 = vcombine.high %v1146_v59, %v1150_v60 }
 0x704   :  { %1622 = vmatpush1.bf16.msra.mxu1 %v1823_v45  ;;  %1663 = vmatpush1.bf16.msra.mxu0 %v1825_v46 }
 0x705   :  { %1623 = vmatprep.subr.bf16.mxu1 %v1832_v47  ;;  %1664 = vmatprep.subr.bf16.mxu0 %v1834_v48 }
 0x708   :  { %1624 = vmatpush1.bf16.msra.mxu1 %v1831_v53  ;;  %1665 = vmatpush1.bf16.msra.mxu0 %v1833_v54  ;;  %v1199_v53 = vsub.s32 5, %v2793_v30  ;;  %v1207_v54 = vsub.s32 7, %v2793_v30 }
 0x709   :  { %1625 = vmatprep.subr.bf16.mxu1 %v1840_v55  ;;  %1666 = vmatprep.subr.bf16.mxu0 %v1842_v56  ;;  %v1196_v55 = vrot.slane %v1175_v28, %v1195_v33  ;;  %v1204_v56 = vrot.slane %v1175_v28, %v1203_v52 }
 0x70a   :  { %v1200_v57 = vrot.slane %v1175_v28, %v1199_v53  ;;  %v1208_v58 = vrot.slane %v1175_v28, %v1207_v54 }
 0x70c   :  { %1626 = vmatpush1.bf16.msra.mxu1 %v1839_v61  ;;  %1667 = vmatpush1.bf16.msra.mxu0 %v1841_v62 }
 0x70d   :  { %1627 = vmatprep.subr.bf16.mxu1 %v1848_v63  ;;  %1668 = vmatprep.subr.bf16.mxu0 %v1850_v6 }
 0x710   :  { %1628 = vmatpush1.bf16.msra.mxu1 %v1847_v5  ;;  %1669 = vmatpush1.bf16.msra.mxu0 %v1849_v7 }
 0x711   :  { %1629 = vmatprep.subr.bf16.mxu1 %v1856_v8  ;;  %1670 = vmatprep.subr.bf16.mxu0 %v1858_v9 }
 0x714   :  { %1630 = vmatpush1.bf16.msra.mxu1 %v1855_v14  ;;  %1671 = vmatpush1.bf16.msra.mxu0 %v1857_v15 }
 0x715   :  { %1631 = vmatprep.subr.bf16.mxu1 %v1864_v16  ;;  %1672 = vmatprep.subr.bf16.mxu0 %v1866_v17 }
 0x718   :  { %1632 = vmatpush1.bf16.msra.mxu1 %v1863_v21  ;;  %1673 = vmatpush1.bf16.msra.mxu0 %v1865_v22 }
 0x719   :  { %1633 = vmatprep.subr.bf16.mxu1 %v1872_v23  ;;  %1674 = vmatprep.subr.bf16.mxu0 %v1874_v24 }
 0x71c   :  { %1634 = vmatpush1.bf16.msra.mxu1 %v1871_v25  ;;  %1675 = vmatpush1.bf16.msra.mxu0 %v1873_v26 }
 0x71f   :  { %1652 = vmatmul.mubr.bf16.vlgmr.msra.gmra.mrb[16].mxu1 %v2825_v38  ;;  %1693 = vmatmul.mubr.bf16.vlgmr.msra.gmra.mrb[20].mxu0 %v2825_v38 }
 0x7d2   :  { %v1571_v37 = vpop.f32.mrb[12].mxu1  ;;  %v1612_v39 = vpop.f32.mrb[16].mxu0 }
 0x7d3   :  { %v1572_v40 = vadd.f32 %v1571_v37, %v1180_v32  ;;  %v1613_v38 = vadd.f32 %v1612_v39, %v1188_v34  ;;  %v1573_v41 = vpop.f32.mrb[13].mxu1  ;;  %v1614_v42 = vpop.f32.mrb[17].mxu0 }
 0x7d4   :  { %v1574_v43 = vadd.f32 %v1573_v41, %v1184_v35  ;;  %v1615_v44 = vadd.f32 %v1614_v42, %v1192_v36  ;;  %v1575_v45 = vpop.f32.mrb[14].mxu1  ;;  %v1616_v46 = vpop.f32.mrb[18].mxu0 }
 0x7d5   :  { %v1701_v47 = vmax.f32 %v1572_v40, 0.0  ;;  %v1703_v48 = vmax.f32 %v1613_v38, 0.0  ;;  %v1576_v49 = vpop.f32.mrb[15].mxu1  ;;  %v1617_v50 = vpop.f32.mrb[19].mxu0 }
 0x7d6   :  { %v1702_v31 = vmax.f32 %v1574_v43, 0.0  ;;  %v1704_v51 = vmax.f32 %v1615_v44, 0.0 }
 0x7d7   :  { %1709 = vst [vmem:[%s2888_s18] sm:$0xff] %v1701_v47  ;;  %1711 = vst [vmem:[%s2888_s18 + $0x10] sm:$0xff] %v1703_v48 }
 0x7d8   :  { %1710 = vst [vmem:[%s2888_s18 + $0x8] sm:$0xff] %v1702_v31  ;;  %1712 = vst [vmem:[%s2888_s18 + $0x18] sm:$0xff] %v1704_v51 }
 0x7f2   :  { %v1653_v59 = vpop.f32.mrb[16].mxu1  ;;  %v1694_v60 = vpop.f32.mrb[20].mxu0 }
 0x7f3   :  { %v1654_v61 = vadd.f32 %v1653_v59, %v1196_v55  ;;  %v1695_v62 = vadd.f32 %v1694_v60, %v1204_v56  ;;  %v1655_v63 = vpop.f32.mrb[17].mxu1  ;;  %v1696_v6 = vpop.f32.mrb[21].mxu0 }
 0x7f4   :  { %v1656_v1 = vadd.f32 %v1655_v63, %v1200_v57  ;;  %v1697_v2 = vadd.f32 %v1696_v6, %v1208_v58  ;;  %v1657_v3 = vpop.f32.mrb[18].mxu1  ;;  %v1698_v4 = vpop.f32.mrb[22].mxu0 }
 0x7f5   :  { %v1705_v5 = vmax.f32 %v1654_v61, 0.0  ;;  %v1707_v7 = vmax.f32 %v1695_v62, 0.0  ;;  %v1658_v8 = vpop.f32.mrb[19].mxu1  ;;  %v1699_v9 = vpop.f32.mrb[23].mxu0 }
 0x7f6   :  { %v1706_v10 = vmax.f32 %v1656_v1, 0.0  ;;  %v1708_v30 = vmax.f32 %v1697_v2, 0.0 }
 0x7f7   :  { %1713 = vst [vmem:[%s2888_s18 + $0x20] sm:$0xff] %v1705_v5  ;;  %1715 = vst [vmem:[%s2888_s18 + $0x30] sm:$0xff] %v1707_v7 }
 0x7f8   :  { %1714 = vst [vmem:[%s2888_s18 + $0x28] sm:$0xff] %v1706_v10  ;;  %1716 = vst [vmem:[%s2888_s18 + $0x38] sm:$0xff] %v1708_v30 }
 0x7f9   :  { %1725 = vsyncpa [#allocation3], 1 }
 0x7fa   :  { %1726 = vsyncpa [#allocation5], 1 }
 0x7fb   :  { %1727 = vsyncpa [#allocation8], 1 }
 0x7fc   :  { %1728 = vsyncpa [#allocation11], 1 }
 0x7fd   :  { %1729 = vsyncpa [#allocation14], 1 }
 0x7fe   :  { %1730 = vsyncpa [#allocation17], 1 }

</bundles_post_ra>
